<compile_context>
chip_gen: v7x
topology: tpu7x:2x2x1
jax: 0.10.0
libtpu: 0.0.40
codegen_flags: <defaults>
</compile_context>

<pallas_src>
import jax
import jax.numpy as jnp
import numpy as np
from jax.experimental import pallas as pl
from jax.experimental.pallas import tpu as pltpu

# Channel sizes fixed by the PyTorch module.
_C_IN, _C1, _C2, _C3, _C4 = 2, 64, 32, 16, 1


def _build_fused_call(H, W):
    """Returns the fused (conv1+conv2+conv3·conv4) pallas_call for (H, W)."""
    Hp, Wp = H + 2, W + 2
    P = Hp * Wp                       # flat padded-grid positions
    PL = ((P + 127) // 128) * 128     # lane-dense (multiple of 128)

    # Tap offsets in flat padded-grid coordinates; tap k = kh*3 + kw.
    offs = tuple(dh * Wp + dw for dh in (-1, 0, 1) for dw in (-1, 0, 1))

    def shifted(src, off):
        # shifted[:, p] = src[:, (p + off) mod PL].  For interior p the index
        # never wraps and never leaves [0, P), so interior outputs are exact;
        # wrapped lanes only reach border/tail outputs, which the mask zeroes.
        if off == 0:
            return src
        return pltpu.roll(src, shift=(-off) % PL, axis=1)

    def conv3x3(src, w_ref):
        # Per-tap MXU accumulation: 9 small matmuls, no im2col buffer, no DMAs.
        acc = None
        for k in range(9):
            t = jnp.dot(w_ref[k], shifted(src, offs[k]),
                        preferred_element_type=jnp.float32)
            acc = t if acc is None else acc + t
        return acc

    def kernel(x_ref, w1_ref, b1_ref, w2_ref, b2_ref, w34_ref, mb_ref, out_ref):
        mask = mb_ref[0:1, :]      # 1 on interior, 0 on 1-px border & lane tail
        outbias = mb_ref[1:2, :]   # mask * (w4 @ b3) + b4  (precomputed)

        # conv1: 2 -> 64, 3x3, pad 1
        a1 = (conv3x3(x_ref[...], w1_ref) + b1_ref[...]) * mask
        # conv2: 64 -> 32, 3x3, pad 1
        a2 = (conv3x3(a1, w2_ref) + b2_ref[...]) * mask
        # conv3 (3x3, 32->16) with the 1x1 conv4 (16->1) folded in
        a3 = conv3x3(a2, w34_ref)
        # Border of the padded grid evaluates to b4 (bias-only), as in PyTorch.
        out_ref[...] = a3 * mask + outbias

    vmem = pl.BlockSpec(memory_space=pltpu.MemorySpace.VMEM)
    return pl.pallas_call(
        kernel,
        out_shape=jax.ShapeDtypeStruct((_C4, PL), jnp.float32),
        in_specs=[vmem] * 7,
        out_specs=vmem,
    )


@jax.jit
def direct_model_forward(x_chw, params):
    """x_chw: (2, H, W) float32 -> (1, 1, H+2, W+2) float32 (matches PyTorch)."""
    w1, b1, w2, b2, w3, b3, w4, b4 = params
    c_in, H, W = x_chw.shape
    Hp, Wp = H + 2, W + 2
    P = Hp * Wp
    PL = ((P + 127) // 128) * 128

    # Channel-major zero-padded grid, flattened and lane-padded to PL columns.
    xp = jnp.pad(x_chw, ((0, 0), (1, 1), (1, 1))).reshape(c_in, P)
    xp = jnp.pad(xp, ((0, 0), (0, PL - P)))

    # Interior mask over the padded grid: 1 inside, 0 on the 1-pixel border and
    # on the lane-padding tail.
    row = jax.lax.broadcasted_iota(jnp.int32, (Hp, Wp), 0)
    col = jax.lax.broadcasted_iota(jnp.int32, (Hp, Wp), 1)
    interior = (row >= 1) & (row <= Hp - 2) & (col >= 1) & (col <= Wp - 2)
    mask = jnp.pad(interior.astype(jnp.float32).reshape(1, P),
                   ((0, 0), (0, PL - P)))

    def pack3x3(w):  # (Cout, Cin, 3, 3) -> (9, Cout, Cin), tap-major
        cout, cin = w.shape[0], w.shape[1]
        return jnp.transpose(w, (2, 3, 0, 1)).reshape(9, cout, cin)

    w1p = pack3x3(w1)                                   # (9, 64, 2)
    w2p = pack3x3(w2)                                   # (9, 32, 64)
    # Fold the pointwise conv4 into conv3 (exact).
    w4m = w4.reshape(_C4, _C3)                          # (1, 16)
    w34 = jnp.einsum('oc,kcd->kod', w4m, pack3x3(w3))   # (9, 1, 32)
    b34 = jnp.dot(w4m, b3.reshape(_C3, 1))              # (1, 1)
    # Combined epilogue constants: out = mask*acc + (mask*b34 + b4).
    mb = jnp.concatenate([mask, mask * b34 + b4.reshape(1, 1)], axis=0)  # (2,PL)

    out_flat = _build_fused_call(H, W)(
        xp, w1p, b1.reshape(_C1, 1), w2p, b2.reshape(_C2, 1), w34, mb)
    # Channel-major flat == NCHW flat: crop the lane padding and reshape.
    return out_flat[:, :P].reshape(1, _C4, Hp, Wp)


def init_params(key):
    """PyTorch-style U(-1/sqrt(fan_in), 1/sqrt(fan_in)) init (arrays only)."""
    layer_defs = [(_C_IN, _C1, 3), (_C1, _C2, 3), (_C2, _C3, 3), (_C3, _C4, 1)]
    params = []
    for cin, cout, k in layer_defs:
        key, kw_key, kb_key = jax.random.split(key, 3)
        bound = 1.0 / float(np.sqrt(cin * k * k))
        params.append(jax.random.uniform(kw_key, (cout, cin, k, k),
                                         jnp.float32, -bound, bound))
        params.append(jax.random.uniform(kb_key, (cout,),
                                         jnp.float32, -bound, bound))
    return tuple(params)


def reference_forward(x_chw, params):
    """Pure-XLA lax.conv reference (every layer uses padding=1, incl. the 1x1)."""
    w1, b1, w2, b2, w3, b3, w4, b4 = params
    x = x_chw[None]
    for w, b in ((w1, b1), (w2, b2), (w3, b3), (w4, b4)):
        x = jax.lax.conv_general_dilated(
            x, w, window_strides=(1, 1), padding=[(1, 1), (1, 1)],
            dimension_numbers=("NCHW", "OIHW", "NCHW")) + b.reshape(1, -1, 1, 1)
    return x


if __name__ == "__main__":
    key = jax.random.PRNGKey(0)
    key, xkey = jax.random.split(key)

    H = W = 16
    x = jax.random.normal(xkey, (_C_IN, H, W), dtype=jnp.float32)  # board features
    params = init_params(key)

    out = jax.block_until_ready(direct_model_forward(x, params))
    assert out.shape == (1, 1, H + 2, W + 2), out.shape

    ref = jax.block_until_ready(reference_forward(x, params))
    err = float(jnp.max(jnp.abs(out - ref)))
    assert err < 1e-3, f"mismatch vs lax.conv reference: {err}"

    print("KERNEL_OK")
</pallas_src>

<mosaic_0001>
module attributes {stable_mosaic.version = 11 : i64} {
  func.func @kernel(%arg0: memref<2x384xf32, #tpu.memory_space<vmem>>, %arg1: memref<9x64x2xf32, #tpu.memory_space<vmem>>, %arg2: memref<64x1xf32, #tpu.memory_space<vmem>>, %arg3: memref<9x32x64xf32, #tpu.memory_space<vmem>>, %arg4: memref<32x1xf32, #tpu.memory_space<vmem>>, %arg5: memref<9x1x32xf32, #tpu.memory_space<vmem>>, %arg6: memref<2x384xf32, #tpu.memory_space<vmem>>, %arg7: memref<1x384xf32, #tpu.memory_space<vmem>>) attributes {dimension_semantics = [], scalar_prefetch = 0 : i64, scratch_operands = 0 : i64, tpu.core_type = #tpu.core_type<tc>} {
    %c0 = arith.constant 0 : index
    %c0_0 = arith.constant 0 : index
    %0 = vector.load %arg6[%c0, %c0_0] : memref<2x384xf32, #tpu.memory_space<vmem>>, vector<1x384xf32>
    %c1 = arith.constant 1 : index
    %c0_1 = arith.constant 0 : index
    %1 = vector.load %arg6[%c1, %c0_1] : memref<2x384xf32, #tpu.memory_space<vmem>>, vector<1x384xf32>
    %c0_2 = arith.constant 0 : index
    %c0_3 = arith.constant 0 : index
    %2 = vector.load %arg0[%c0_2, %c0_3] : memref<2x384xf32, #tpu.memory_space<vmem>>, vector<2x384xf32>
    %c0_4 = arith.constant 0 : index
    %c0_5 = arith.constant 0 : index
    %c0_6 = arith.constant 0 : index
    %3 = vector.load %arg1[%c0_4, %c0_5, %c0_6] : memref<9x64x2xf32, #tpu.memory_space<vmem>>, vector<1x64x2xf32>
    %4 = vector.shape_cast %3 : vector<1x64x2xf32> to vector<64x2xf32>
    %c19_i32 = arith.constant 19 : i32
    %5 = tpu.dynamic_rotate %2 by %c19_i32 dim 1 : vector<2x384xf32>, i32 -> vector<2x384xf32>
    %cst = arith.constant dense<0.000000e+00> : vector<64x384xf32>
    %6 = tpu.matmul %4, %5, %cst {dimension_numbers = #tpu.dot_dimension_numbers<[1], [0], [0], [1], [0, 0, 1, 1], [], []>} : vector<64x2xf32>, vector<2x384xf32>, vector<64x384xf32> -> vector<64x384xf32>
    %c1_7 = arith.constant 1 : index
    %c0_8 = arith.constant 0 : index
    %c0_9 = arith.constant 0 : index
    %7 = vector.load %arg1[%c1_7, %c0_8, %c0_9] : memref<9x64x2xf32, #tpu.memory_space<vmem>>, vector<1x64x2xf32>
    %8 = vector.shape_cast %7 : vector<1x64x2xf32> to vector<64x2xf32>
    %c18_i32 = arith.constant 18 : i32
    %9 = tpu.dynamic_rotate %2 by %c18_i32 dim 1 : vector<2x384xf32>, i32 -> vector<2x384xf32>
    %cst_10 = arith.constant dense<0.000000e+00> : vector<64x384xf32>
    %10 = tpu.matmul %8, %9, %cst_10 {dimension_numbers = #tpu.dot_dimension_numbers<[1], [0], [0], [1], [0, 0, 1, 1], [], []>} : vector<64x2xf32>, vector<2x384xf32>, vector<64x384xf32> -> vector<64x384xf32>
    %11 = arith.addf %6, %10 : vector<64x384xf32>
    %c2 = arith.constant 2 : index
    %c0_11 = arith.constant 0 : index
    %c0_12 = arith.constant 0 : index
    %12 = vector.load %arg1[%c2, %c0_11, %c0_12] : memref<9x64x2xf32, #tpu.memory_space<vmem>>, vector<1x64x2xf32>
    %13 = vector.shape_cast %12 : vector<1x64x2xf32> to vector<64x2xf32>
    %c17_i32 = arith.constant 17 : i32
    %14 = tpu.dynamic_rotate %2 by %c17_i32 dim 1 : vector<2x384xf32>, i32 -> vector<2x384xf32>
    %cst_13 = arith.constant dense<0.000000e+00> : vector<64x384xf32>
    %15 = tpu.matmul %13, %14, %cst_13 {dimension_numbers = #tpu.dot_dimension_numbers<[1], [0], [0], [1], [0, 0, 1, 1], [], []>} : vector<64x2xf32>, vector<2x384xf32>, vector<64x384xf32> -> vector<64x384xf32>
    %16 = arith.addf %11, %15 : vector<64x384xf32>
    %c3 = arith.constant 3 : index
    %c0_14 = arith.constant 0 : index
    %c0_15 = arith.constant 0 : index
    %17 = vector.load %arg1[%c3, %c0_14, %c0_15] : memref<9x64x2xf32, #tpu.memory_space<vmem>>, vector<1x64x2xf32>
    %18 = vector.shape_cast %17 : vector<1x64x2xf32> to vector<64x2xf32>
    %c1_i32 = arith.constant 1 : i32
    %19 = tpu.dynamic_rotate %2 by %c1_i32 dim 1 : vector<2x384xf32>, i32 -> vector<2x384xf32>
    %cst_16 = arith.constant dense<0.000000e+00> : vector<64x384xf32>
    %20 = tpu.matmul %18, %19, %cst_16 {dimension_numbers = #tpu.dot_dimension_numbers<[1], [0], [0], [1], [0, 0, 1, 1], [], []>} : vector<64x2xf32>, vector<2x384xf32>, vector<64x384xf32> -> vector<64x384xf32>
    %21 = arith.addf %16, %20 : vector<64x384xf32>
    %c4 = arith.constant 4 : index
    %c0_17 = arith.constant 0 : index
    %c0_18 = arith.constant 0 : index
    %22 = vector.load %arg1[%c4, %c0_17, %c0_18] : memref<9x64x2xf32, #tpu.memory_space<vmem>>, vector<1x64x2xf32>
    %23 = vector.shape_cast %22 : vector<1x64x2xf32> to vector<64x2xf32>
    %cst_19 = arith.constant dense<0.000000e+00> : vector<64x384xf32>
    %24 = tpu.matmul %23, %2, %cst_19 {dimension_numbers = #tpu.dot_dimension_numbers<[1], [0], [0], [1], [0, 0, 1, 1], [], []>} : vector<64x2xf32>, vector<2x384xf32>, vector<64x384xf32> -> vector<64x384xf32>
    %25 = arith.addf %21, %24 : vector<64x384xf32>
    %c5 = arith.constant 5 : index
    %c0_20 = arith.constant 0 : index
    %c0_21 = arith.constant 0 : index
    %26 = vector.load %arg1[%c5, %c0_20, %c0_21] : memref<9x64x2xf32, #tpu.memory_space<vmem>>, vector<1x64x2xf32>
    %27 = vector.shape_cast %26 : vector<1x64x2xf32> to vector<64x2xf32>
    %c383_i32 = arith.constant 383 : i32
    %28 = tpu.dynamic_rotate %2 by %c383_i32 dim 1 : vector<2x384xf32>, i32 -> vector<2x384xf32>
    %cst_22 = arith.constant dense<0.000000e+00> : vector<64x384xf32>
    %29 = tpu.matmul %27, %28, %cst_22 {dimension_numbers = #tpu.dot_dimension_numbers<[1], [0], [0], [1], [0, 0, 1, 1], [], []>} : vector<64x2xf32>, vector<2x384xf32>, vector<64x384xf32> -> vector<64x384xf32>
    %30 = arith.addf %25, %29 : vector<64x384xf32>
    %c6 = arith.constant 6 : index
    %c0_23 = arith.constant 0 : index
    %c0_24 = arith.constant 0 : index
    %31 = vector.load %arg1[%c6, %c0_23, %c0_24] : memref<9x64x2xf32, #tpu.memory_space<vmem>>, vector<1x64x2xf32>
    %32 = vector.shape_cast %31 : vector<1x64x2xf32> to vector<64x2xf32>
    %c367_i32 = arith.constant 367 : i32
    %33 = tpu.dynamic_rotate %2 by %c367_i32 dim 1 : vector<2x384xf32>, i32 -> vector<2x384xf32>
    %cst_25 = arith.constant dense<0.000000e+00> : vector<64x384xf32>
    %34 = tpu.matmul %32, %33, %cst_25 {dimension_numbers = #tpu.dot_dimension_numbers<[1], [0], [0], [1], [0, 0, 1, 1], [], []>} : vector<64x2xf32>, vector<2x384xf32>, vector<64x384xf32> -> vector<64x384xf32>
    %35 = arith.addf %30, %34 : vector<64x384xf32>
    %c7 = arith.constant 7 : index
    %c0_26 = arith.constant 0 : index
    %c0_27 = arith.constant 0 : index
    %36 = vector.load %arg1[%c7, %c0_26, %c0_27] : memref<9x64x2xf32, #tpu.memory_space<vmem>>, vector<1x64x2xf32>
    %37 = vector.shape_cast %36 : vector<1x64x2xf32> to vector<64x2xf32>
    %c366_i32 = arith.constant 366 : i32
    %38 = tpu.dynamic_rotate %2 by %c366_i32 dim 1 : vector<2x384xf32>, i32 -> vector<2x384xf32>
    %cst_28 = arith.constant dense<0.000000e+00> : vector<64x384xf32>
    %39 = tpu.matmul %37, %38, %cst_28 {dimension_numbers = #tpu.dot_dimension_numbers<[1], [0], [0], [1], [0, 0, 1, 1], [], []>} : vector<64x2xf32>, vector<2x384xf32>, vector<64x384xf32> -> vector<64x384xf32>
    %40 = arith.addf %35, %39 : vector<64x384xf32>
    %c8 = arith.constant 8 : index
    %c0_29 = arith.constant 0 : index
    %c0_30 = arith.constant 0 : index
    %41 = vector.load %arg1[%c8, %c0_29, %c0_30] : memref<9x64x2xf32, #tpu.memory_space<vmem>>, vector<1x64x2xf32>
    %42 = vector.shape_cast %41 : vector<1x64x2xf32> to vector<64x2xf32>
    %c365_i32 = arith.constant 365 : i32
    %43 = tpu.dynamic_rotate %2 by %c365_i32 dim 1 : vector<2x384xf32>, i32 -> vector<2x384xf32>
    %cst_31 = arith.constant dense<0.000000e+00> : vector<64x384xf32>
    %44 = tpu.matmul %42, %43, %cst_31 {dimension_numbers = #tpu.dot_dimension_numbers<[1], [0], [0], [1], [0, 0, 1, 1], [], []>} : vector<64x2xf32>, vector<2x384xf32>, vector<64x384xf32> -> vector<64x384xf32>
    %45 = arith.addf %40, %44 : vector<64x384xf32>
    %c0_32 = arith.constant 0 : index
    %c0_33 = arith.constant 0 : index
    %46 = vector.load %arg2[%c0_32, %c0_33] : memref<64x1xf32, #tpu.memory_space<vmem>>, vector<64x1xf32>
    %47 = vector.broadcast %46 : vector<64x1xf32> to vector<64x384xf32>
    %48 = arith.addf %45, %47 : vector<64x384xf32>
    %49 = vector.broadcast %0 : vector<1x384xf32> to vector<64x384xf32>
    %50 = arith.mulf %48, %49 : vector<64x384xf32>
    %c0_34 = arith.constant 0 : index
    %c0_35 = arith.constant 0 : index
    %c0_36 = arith.constant 0 : index
    %51 = vector.load %arg3[%c0_34, %c0_35, %c0_36] : memref<9x32x64xf32, #tpu.memory_space<vmem>>, vector<1x32x64xf32>
    %52 = vector.shape_cast %51 : vector<1x32x64xf32> to vector<32x64xf32>
    %c19_i32_37 = arith.constant 19 : i32
    %53 = tpu.dynamic_rotate %50 by %c19_i32_37 dim 1 : vector<64x384xf32>, i32 -> vector<64x384xf32>
    %cst_38 = arith.constant dense<0.000000e+00> : vector<32x384xf32>
    %54 = tpu.matmul %52, %53, %cst_38 {dimension_numbers = #tpu.dot_dimension_numbers<[1], [0], [0], [1], [0, 0, 1, 1], [], []>} : vector<32x64xf32>, vector<64x384xf32>, vector<32x384xf32> -> vector<32x384xf32>
    %c1_39 = arith.constant 1 : index
    %c0_40 = arith.constant 0 : index
    %c0_41 = arith.constant 0 : index
    %55 = vector.load %arg3[%c1_39, %c0_40, %c0_41] : memref<9x32x64xf32, #tpu.memory_space<vmem>>, vector<1x32x64xf32>
    %56 = vector.shape_cast %55 : vector<1x32x64xf32> to vector<32x64xf32>
    %c18_i32_42 = arith.constant 18 : i32
    %57 = tpu.dynamic_rotate %50 by %c18_i32_42 dim 1 : vector<64x384xf32>, i32 -> vector<64x384xf32>
    %cst_43 = arith.constant dense<0.000000e+00> : vector<32x384xf32>
    %58 = tpu.matmul %56, %57, %cst_43 {dimension_numbers = #tpu.dot_dimension_numbers<[1], [0], [0], [1], [0, 0, 1, 1], [], []>} : vector<32x64xf32>, vector<64x384xf32>, vector<32x384xf32> -> vector<32x384xf32>
    %59 = arith.addf %54, %58 : vector<32x384xf32>
    %c2_44 = arith.constant 2 : index
    %c0_45 = arith.constant 0 : index
    %c0_46 = arith.constant 0 : index
    %60 = vector.load %arg3[%c2_44, %c0_45, %c0_46] : memref<9x32x64xf32, #tpu.memory_space<vmem>>, vector<1x32x64xf32>
    %61 = vector.shape_cast %60 : vector<1x32x64xf32> to vector<32x64xf32>
    %c17_i32_47 = arith.constant 17 : i32
    %62 = tpu.dynamic_rotate %50 by %c17_i32_47 dim 1 : vector<64x384xf32>, i32 -> vector<64x384xf32>
    %cst_48 = arith.constant dense<0.000000e+00> : vector<32x384xf32>
    %63 = tpu.matmul %61, %62, %cst_48 {dimension_numbers = #tpu.dot_dimension_numbers<[1], [0], [0], [1], [0, 0, 1, 1], [], []>} : vector<32x64xf32>, vector<64x384xf32>, vector<32x384xf32> -> vector<32x384xf32>
    %64 = arith.addf %59, %63 : vector<32x384xf32>
    %c3_49 = arith.constant 3 : index
    %c0_50 = arith.constant 0 : index
    %c0_51 = arith.constant 0 : index
    %65 = vector.load %arg3[%c3_49, %c0_50, %c0_51] : memref<9x32x64xf32, #tpu.memory_space<vmem>>, vector<1x32x64xf32>
    %66 = vector.shape_cast %65 : vector<1x32x64xf32> to vector<32x64xf32>
    %c1_i32_52 = arith.constant 1 : i32
    %67 = tpu.dynamic_rotate %50 by %c1_i32_52 dim 1 : vector<64x384xf32>, i32 -> vector<64x384xf32>
    %cst_53 = arith.constant dense<0.000000e+00> : vector<32x384xf32>
    %68 = tpu.matmul %66, %67, %cst_53 {dimension_numbers = #tpu.dot_dimension_numbers<[1], [0], [0], [1], [0, 0, 1, 1], [], []>} : vector<32x64xf32>, vector<64x384xf32>, vector<32x384xf32> -> vector<32x384xf32>
    %69 = arith.addf %64, %68 : vector<32x384xf32>
    %c4_54 = arith.constant 4 : index
    %c0_55 = arith.constant 0 : index
    %c0_56 = arith.constant 0 : index
    %70 = vector.load %arg3[%c4_54, %c0_55, %c0_56] : memref<9x32x64xf32, #tpu.memory_space<vmem>>, vector<1x32x64xf32>
    %71 = vector.shape_cast %70 : vector<1x32x64xf32> to vector<32x64xf32>
    %cst_57 = arith.constant dense<0.000000e+00> : vector<32x384xf32>
    %72 = tpu.matmul %71, %50, %cst_57 {dimension_numbers = #tpu.dot_dimension_numbers<[1], [0], [0], [1], [0, 0, 1, 1], [], []>} : vector<32x64xf32>, vector<64x384xf32>, vector<32x384xf32> -> vector<32x384xf32>
    %73 = arith.addf %69, %72 : vector<32x384xf32>
    %c5_58 = arith.constant 5 : index
    %c0_59 = arith.constant 0 : index
    %c0_60 = arith.constant 0 : index
    %74 = vector.load %arg3[%c5_58, %c0_59, %c0_60] : memref<9x32x64xf32, #tpu.memory_space<vmem>>, vector<1x32x64xf32>
    %75 = vector.shape_cast %74 : vector<1x32x64xf32> to vector<32x64xf32>
    %c383_i32_61 = arith.constant 383 : i32
    %76 = tpu.dynamic_rotate %50 by %c383_i32_61 dim 1 : vector<64x384xf32>, i32 -> vector<64x384xf32>
    %cst_62 = arith.constant dense<0.000000e+00> : vector<32x384xf32>
    %77 = tpu.matmul %75, %76, %cst_62 {dimension_numbers = #tpu.dot_dimension_numbers<[1], [0], [0], [1], [0, 0, 1, 1], [], []>} : vector<32x64xf32>, vector<64x384xf32>, vector<32x384xf32> -> vector<32x384xf32>
    %78 = arith.addf %73, %77 : vector<32x384xf32>
    %c6_63 = arith.constant 6 : index
    %c0_64 = arith.constant 0 : index
    %c0_65 = arith.constant 0 : index
    %79 = vector.load %arg3[%c6_63, %c0_64, %c0_65] : memref<9x32x64xf32, #tpu.memory_space<vmem>>, vector<1x32x64xf32>
    %80 = vector.shape_cast %79 : vector<1x32x64xf32> to vector<32x64xf32>
    %c367_i32_66 = arith.constant 367 : i32
    %81 = tpu.dynamic_rotate %50 by %c367_i32_66 dim 1 : vector<64x384xf32>, i32 -> vector<64x384xf32>
    %cst_67 = arith.constant dense<0.000000e+00> : vector<32x384xf32>
    %82 = tpu.matmul %80, %81, %cst_67 {dimension_numbers = #tpu.dot_dimension_numbers<[1], [0], [0], [1], [0, 0, 1, 1], [], []>} : vector<32x64xf32>, vector<64x384xf32>, vector<32x384xf32> -> vector<32x384xf32>
    %83 = arith.addf %78, %82 : vector<32x384xf32>
    %c7_68 = arith.constant 7 : index
    %c0_69 = arith.constant 0 : index
    %c0_70 = arith.constant 0 : index
    %84 = vector.load %arg3[%c7_68, %c0_69, %c0_70] : memref<9x32x64xf32, #tpu.memory_space<vmem>>, vector<1x32x64xf32>
    %85 = vector.shape_cast %84 : vector<1x32x64xf32> to vector<32x64xf32>
    %c366_i32_71 = arith.constant 366 : i32
    %86 = tpu.dynamic_rotate %50 by %c366_i32_71 dim 1 : vector<64x384xf32>, i32 -> vector<64x384xf32>
    %cst_72 = arith.constant dense<0.000000e+00> : vector<32x384xf32>
    %87 = tpu.matmul %85, %86, %cst_72 {dimension_numbers = #tpu.dot_dimension_numbers<[1], [0], [0], [1], [0, 0, 1, 1], [], []>} : vector<32x64xf32>, vector<64x384xf32>, vector<32x384xf32> -> vector<32x384xf32>
    %88 = arith.addf %83, %87 : vector<32x384xf32>
    %c8_73 = arith.constant 8 : index
    %c0_74 = arith.constant 0 : index
    %c0_75 = arith.constant 0 : index
    %89 = vector.load %arg3[%c8_73, %c0_74, %c0_75] : memref<9x32x64xf32, #tpu.memory_space<vmem>>, vector<1x32x64xf32>
    %90 = vector.shape_cast %89 : vector<1x32x64xf32> to vector<32x64xf32>
    %c365_i32_76 = arith.constant 365 : i32
    %91 = tpu.dynamic_rotate %50 by %c365_i32_76 dim 1 : vector<64x384xf32>, i32 -> vector<64x384xf32>
    %cst_77 = arith.constant dense<0.000000e+00> : vector<32x384xf32>
    %92 = tpu.matmul %90, %91, %cst_77 {dimension_numbers = #tpu.dot_dimension_numbers<[1], [0], [0], [1], [0, 0, 1, 1], [], []>} : vector<32x64xf32>, vector<64x384xf32>, vector<32x384xf32> -> vector<32x384xf32>
    %93 = arith.addf %88, %92 : vector<32x384xf32>
    %c0_78 = arith.constant 0 : index
    %c0_79 = arith.constant 0 : index
    %94 = vector.load %arg4[%c0_78, %c0_79] : memref<32x1xf32, #tpu.memory_space<vmem>>, vector<32x1xf32>
    %95 = vector.broadcast %94 : vector<32x1xf32> to vector<32x384xf32>
    %96 = arith.addf %93, %95 : vector<32x384xf32>
    %97 = vector.broadcast %0 : vector<1x384xf32> to vector<32x384xf32>
    %98 = arith.mulf %96, %97 : vector<32x384xf32>
    %c0_80 = arith.constant 0 : index
    %c0_81 = arith.constant 0 : index
    %c0_82 = arith.constant 0 : index
    %99 = vector.load %arg5[%c0_80, %c0_81, %c0_82] : memref<9x1x32xf32, #tpu.memory_space<vmem>>, vector<1x1x32xf32>
    %100 = vector.shape_cast %99 : vector<1x1x32xf32> to vector<1x32xf32>
    %c19_i32_83 = arith.constant 19 : i32
    %101 = tpu.dynamic_rotate %98 by %c19_i32_83 dim 1 : vector<32x384xf32>, i32 -> vector<32x384xf32>
    %cst_84 = arith.constant dense<0.000000e+00> : vector<1x384xf32>
    %102 = tpu.matmul %100, %101, %cst_84 {dimension_numbers = #tpu.dot_dimension_numbers<[1], [0], [0], [1], [0, 0, 1, 1], [], []>} : vector<1x32xf32>, vector<32x384xf32>, vector<1x384xf32> -> vector<1x384xf32>
    %c1_85 = arith.constant 1 : index
    %c0_86 = arith.constant 0 : index
    %c0_87 = arith.constant 0 : index
    %103 = vector.load %arg5[%c1_85, %c0_86, %c0_87] : memref<9x1x32xf32, #tpu.memory_space<vmem>>, vector<1x1x32xf32>
    %104 = vector.shape_cast %103 : vector<1x1x32xf32> to vector<1x32xf32>
    %c18_i32_88 = arith.constant 18 : i32
    %105 = tpu.dynamic_rotate %98 by %c18_i32_88 dim 1 : vector<32x384xf32>, i32 -> vector<32x384xf32>
    %cst_89 = arith.constant dense<0.000000e+00> : vector<1x384xf32>
    %106 = tpu.matmul %104, %105, %cst_89 {dimension_numbers = #tpu.dot_dimension_numbers<[1], [0], [0], [1], [0, 0, 1, 1], [], []>} : vector<1x32xf32>, vector<32x384xf32>, vector<1x384xf32> -> vector<1x384xf32>
    %107 = arith.addf %102, %106 : vector<1x384xf32>
    %c2_90 = arith.constant 2 : index
    %c0_91 = arith.constant 0 : index
    %c0_92 = arith.constant 0 : index
    %108 = vector.load %arg5[%c2_90, %c0_91, %c0_92] : memref<9x1x32xf32, #tpu.memory_space<vmem>>, vector<1x1x32xf32>
    %109 = vector.shape_cast %108 : vector<1x1x32xf32> to vector<1x32xf32>
    %c17_i32_93 = arith.constant 17 : i32
    %110 = tpu.dynamic_rotate %98 by %c17_i32_93 dim 1 : vector<32x384xf32>, i32 -> vector<32x384xf32>
    %cst_94 = arith.constant dense<0.000000e+00> : vector<1x384xf32>
    %111 = tpu.matmul %109, %110, %cst_94 {dimension_numbers = #tpu.dot_dimension_numbers<[1], [0], [0], [1], [0, 0, 1, 1], [], []>} : vector<1x32xf32>, vector<32x384xf32>, vector<1x384xf32> -> vector<1x384xf32>
    %112 = arith.addf %107, %111 : vector<1x384xf32>
    %c3_95 = arith.constant 3 : index
    %c0_96 = arith.constant 0 : index
    %c0_97 = arith.constant 0 : index
    %113 = vector.load %arg5[%c3_95, %c0_96, %c0_97] : memref<9x1x32xf32, #tpu.memory_space<vmem>>, vector<1x1x32xf32>
    %114 = vector.shape_cast %113 : vector<1x1x32xf32> to vector<1x32xf32>
    %c1_i32_98 = arith.constant 1 : i32
    %115 = tpu.dynamic_rotate %98 by %c1_i32_98 dim 1 : vector<32x384xf32>, i32 -> vector<32x384xf32>
    %cst_99 = arith.constant dense<0.000000e+00> : vector<1x384xf32>
    %116 = tpu.matmul %114, %115, %cst_99 {dimension_numbers = #tpu.dot_dimension_numbers<[1], [0], [0], [1], [0, 0, 1, 1], [], []>} : vector<1x32xf32>, vector<32x384xf32>, vector<1x384xf32> -> vector<1x384xf32>
    %117 = arith.addf %112, %116 : vector<1x384xf32>
    %c4_100 = arith.constant 4 : index
    %c0_101 = arith.constant 0 : index
    %c0_102 = arith.constant 0 : index
    %118 = vector.load %arg5[%c4_100, %c0_101, %c0_102] : memref<9x1x32xf32, #tpu.memory_space<vmem>>, vector<1x1x32xf32>
    %119 = vector.shape_cast %118 : vector<1x1x32xf32> to vector<1x32xf32>
    %cst_103 = arith.constant dense<0.000000e+00> : vector<1x384xf32>
    %120 = tpu.matmul %119, %98, %cst_103 {dimension_numbers = #tpu.dot_dimension_numbers<[1], [0], [0], [1], [0, 0, 1, 1], [], []>} : vector<1x32xf32>, vector<32x384xf32>, vector<1x384xf32> -> vector<1x384xf32>
    %121 = arith.addf %117, %120 : vector<1x384xf32>
    %c5_104 = arith.constant 5 : index
    %c0_105 = arith.constant 0 : index
    %c0_106 = arith.constant 0 : index
    %122 = vector.load %arg5[%c5_104, %c0_105, %c0_106] : memref<9x1x32xf32, #tpu.memory_space<vmem>>, vector<1x1x32xf32>
    %123 = vector.shape_cast %122 : vector<1x1x32xf32> to vector<1x32xf32>
    %c383_i32_107 = arith.constant 383 : i32
    %124 = tpu.dynamic_rotate %98 by %c383_i32_107 dim 1 : vector<32x384xf32>, i32 -> vector<32x384xf32>
    %cst_108 = arith.constant dense<0.000000e+00> : vector<1x384xf32>
    %125 = tpu.matmul %123, %124, %cst_108 {dimension_numbers = #tpu.dot_dimension_numbers<[1], [0], [0], [1], [0, 0, 1, 1], [], []>} : vector<1x32xf32>, vector<32x384xf32>, vector<1x384xf32> -> vector<1x384xf32>
    %126 = arith.addf %121, %125 : vector<1x384xf32>
    %c6_109 = arith.constant 6 : index
    %c0_110 = arith.constant 0 : index
    %c0_111 = arith.constant 0 : index
    %127 = vector.load %arg5[%c6_109, %c0_110, %c0_111] : memref<9x1x32xf32, #tpu.memory_space<vmem>>, vector<1x1x32xf32>
    %128 = vector.shape_cast %127 : vector<1x1x32xf32> to vector<1x32xf32>
    %c367_i32_112 = arith.constant 367 : i32
    %129 = tpu.dynamic_rotate %98 by %c367_i32_112 dim 1 : vector<32x384xf32>, i32 -> vector<32x384xf32>
    %cst_113 = arith.constant dense<0.000000e+00> : vector<1x384xf32>
    %130 = tpu.matmul %128, %129, %cst_113 {dimension_numbers = #tpu.dot_dimension_numbers<[1], [0], [0], [1], [0, 0, 1, 1], [], []>} : vector<1x32xf32>, vector<32x384xf32>, vector<1x384xf32> -> vector<1x384xf32>
    %131 = arith.addf %126, %130 : vector<1x384xf32>
    %c7_114 = arith.constant 7 : index
    %c0_115 = arith.constant 0 : index
    %c0_116 = arith.constant 0 : index
    %132 = vector.load %arg5[%c7_114, %c0_115, %c0_116] : memref<9x1x32xf32, #tpu.memory_space<vmem>>, vector<1x1x32xf32>
    %133 = vector.shape_cast %132 : vector<1x1x32xf32> to vector<1x32xf32>
    %c366_i32_117 = arith.constant 366 : i32
    %134 = tpu.dynamic_rotate %98 by %c366_i32_117 dim 1 : vector<32x384xf32>, i32 -> vector<32x384xf32>
    %cst_118 = arith.constant dense<0.000000e+00> : vector<1x384xf32>
    %135 = tpu.matmul %133, %134, %cst_118 {dimension_numbers = #tpu.dot_dimension_numbers<[1], [0], [0], [1], [0, 0, 1, 1], [], []>} : vector<1x32xf32>, vector<32x384xf32>, vector<1x384xf32> -> vector<1x384xf32>
    %136 = arith.addf %131, %135 : vector<1x384xf32>
    %c8_119 = arith.constant 8 : index
    %c0_120 = arith.constant 0 : index
    %c0_121 = arith.constant 0 : index
    %137 = vector.load %arg5[%c8_119, %c0_120, %c0_121] : memref<9x1x32xf32, #tpu.memory_space<vmem>>, vector<1x1x32xf32>
    %138 = vector.shape_cast %137 : vector<1x1x32xf32> to vector<1x32xf32>
    %c365_i32_122 = arith.constant 365 : i32
    %139 = tpu.dynamic_rotate %98 by %c365_i32_122 dim 1 : vector<32x384xf32>, i32 -> vector<32x384xf32>
    %cst_123 = arith.constant dense<0.000000e+00> : vector<1x384xf32>
    %140 = tpu.matmul %138, %139, %cst_123 {dimension_numbers = #tpu.dot_dimension_numbers<[1], [0], [0], [1], [0, 0, 1, 1], [], []>} : vector<1x32xf32>, vector<32x384xf32>, vector<1x384xf32> -> vector<1x384xf32>
    %141 = arith.addf %136, %140 : vector<1x384xf32>
    %142 = arith.mulf %141, %0 : vector<1x384xf32>
    %143 = arith.addf %142, %1 : vector<1x384xf32>
    %c0_124 = arith.constant 0 : index
    %c0_125 = arith.constant 0 : index
    %144 = vector.load %arg7[%c0_124, %c0_125] : memref<1x384xf32, #tpu.memory_space<vmem>>, vector<1x384xf32>
    tpu.vector_store %arg7[%c0_124, %c0_125], %143 {strides = array<i32>} : memref<1x384xf32, #tpu.memory_space<vmem>>, vector<1x384xf32>,
    return
  }
}

</mosaic_0001>

<bundles_post_ra>
// kernel: direct_model_forward.1
= control target key start
LH: loop header
LB: loop body
LE: loop exit
PB: predicated region body
PF: predicated region fallthrough
CT: control target
= control target key end

     0   :  { %v12408_v0 = vlaneseq  ;;  %v9352_v2 = vmov 1983009808   ;;  %v12412_v7 = vmov 0.0   ;;  %vm89_vm0 = vcmask 15360   ;;  %s9355_s28 = smov 19   ;;  %s9356_s29 = smov 17   ;;  %s12400_s0 = inlined_call_operand.vmem [shape: f32[2,384], index: 0, kind: input, shape index: {}]   ;;  %s12401_s1 = inlined_call_operand.vmem [shape: f32[9,64,2], index: 1, kind: input, shape index: {}]   ;;  %s12402_s2 = inlined_call_operand.vmem [shape: f32[64,1], index: 2, kind: input, shape index: {}]   ;;  %s12403_s6 = inlined_call_operand.vmem [shape: f32[2,384], index: 6, kind: input, shape index: {}]   ;;  %s12404_s3 = inlined_call_operand.vmem [shape: f32[9,32,64], index: 3, kind: input, shape index: {}]   ;;  %s12405_s4 = inlined_call_operand.vmem [shape: f32[32,1], index: 4, kind: input, shape index: {}]   ;;  %s12406_s5 = inlined_call_operand.vmem [shape: f32[9,1,32], index: 5, kind: input, shape index: {}]   ;;  %s12407_s7 = inlined_call_operand.vmem [shape: f32[1,384], index: 7, kind: output, shape index: {}]  }
   0x1   :  { %v29_v1 = vld [vmem:[%s12400_s0] sm:$0x3f]  ;;  %v41_v3 = vunpack.c.l.s4 %v9352_v2  ;;  %188 = vmatprep.mubr.f32.mxu0 %v12412_v7  ;;  %s9354_s0 = smov 18   ;;  %s9357_s30 = smov 1   ;;  %vm114_vm2 = vcmask 1041408   ;;  %v6860_v20 = vld [vmem:[%s12401_s1 + $0x48] sm:$0xff] }
   0x2   :  { %v9410_v4 = vshrl.u32 %v12408_v0, 7  ;;  %v39_v6 = vcombine.high %v29_v1, %v29_v1  ;;  %v6859_v8 = vld [vmem:[%s12401_s1 + $0x40] sm:$0xff]  ;;  %s9358_s8 = smov 127   ;;  %s9359_s9 = smov 111   ;;  %v9475_v13 = vand.u32 127, %v12408_v0  ;;  %v6861_v22 = vld [vmem:[%s12401_s1 + $0x50] sm:$0xff] }
   0x3   :  { %v42_v5 = vunpack.c.0.s8 %v41_v3  ;;  %7460 = vmatprep.mubr.msk.f32.mxu1 %vm89_vm0, %v6859_v8  ;;  %s9360_s10 = smov 110   ;;  %s9361_s11 = smov 109   ;;  %v6862_v25 = vld [vmem:[%s12401_s1 + $0x58] sm:$0xff]  ;;  %v6863_v29 = vld [vmem:[%s12401_s1 + $0x60] sm:$0xff]  ;;  %v6864_v32 = vld [vmem:[%s12401_s1 + $0x68] sm:$0xff]  ;;  %vm2903_vm10 = vcmask 523264  }
   0x4   :  { %12431 = vst [vmem:[#allocation2_spill] sm:$0xff] %v9410_v4  ;;  %vm85_vm1 = vcmp.lt.s32.totalorder %v9475_v13, 18  ;;  %vm66_vm3 = vcmp.lt.s32.totalorder %v9475_v13, 19  ;;  %vm608_vm4 = vcmp.lt.s32.totalorder %v9475_v13, 17  ;;  %v6865_v34 = vld [vmem:[%s12401_s1 + $0x70] sm:$0xff]  ;;  %v6866_v37 = vld [vmem:[%s12401_s1 + $0x78] sm:$0xff] }
   0x5   :  { %v45_v9 = vsub.s32 %v42_v5, %v9410_v4  ;;  %v30_v39 = vld [vmem:[%s12401_s1] sm:$0xff]  ;;  %vm902_vm5 = vcmp.lt.s32.totalorder %v9475_v13, 1  ;;  %v31_v40 = vld [vmem:[%s12401_s1 + $0x8] sm:$0xff]  ;;  %v32_v43 = vld [vmem:[%s12401_s1 + $0x10] sm:$0xff]  ;;  %vm1477_vm6 = vcmp.lt.s32.totalorder %v9475_v13, 127  ;;  %vm1771_vm7 = vcmp.lt.s32.totalorder %v9475_v13, 111 }
   0x6   :  { %v33_v45 = vld [vmem:[%s12401_s1 + $0x18] sm:$0xff]  ;;  %v34_v46 = vld [vmem:[%s12401_s1 + $0x20] sm:$0xff]  ;;  %v35_v47 = vld [vmem:[%s12401_s1 + $0x28] sm:$0xff]  ;;  %vm2065_vm8 = vcmp.lt.s32.totalorder %v9475_v13, 110  ;;  %vm2359_vm9 = vcmp.lt.s32.totalorder %v9475_v13, 109  ;;  %vm5252_vm11 = vcmask 261120  }
   0x7   :  { %v9418_v10 = vrot.slane %v29_v1, %v45_v9  ;;  %v9420_v11 = vrot.slane %v39_v6, %v45_v9  ;;  %v9582_v48 = vld [vmem:[%s12401_s1 + $0x30] sm:$0xff]  ;;  %v9592_v49 = vld [vmem:[%s12401_s1 + $0x38] sm:$0xff]  ;;  %v9597_v50 = vld [vmem:[%s12401_s1 + $0x80] sm:$0xff]  ;;  %vm9364_vm12 = vmmov 0  }
   0x8   :  { %v9608_v51 = vld [vmem:[%s12401_s1 + $0x88] sm:$0xff]  ;;  %v9613_v52 = vld [vmem:[%s12401_s1 + $0x90] sm:$0xff]  ;;  %v9629_v55 = vld [vmem:[%s12401_s1 + $0x98] sm:$0xff] }
   0x9   :  { %79 = vrot.lane.b32.xlu0 %v9418_v10, %s9354_s0  ;;  %83 = vrot.lane.b32.xlu1 %v9420_v11, %s9354_s0  ;;  %v9428_v12 = vcombine.high %v9418_v10, %v9418_v10  ;;  %v9634_v56 = vld [vmem:[%s12401_s1 + $0xa0] sm:$0xff]  ;;  %v9650_v57 = vld [vmem:[%s12401_s1 + $0xa8] sm:$0xff] }
   0xa   :  { %v9655_v58 = vld [vmem:[%s12401_s1 + $0xb0] sm:$0xff]  ;;  %v9668_v60 = vld [vmem:[%s12401_s1 + $0xb8] sm:$0xff]  ;;  %v9673_v61 = vld [vmem:[%s12401_s1 + $0xc0] sm:$0xff] }
   0xb   :  { %v9685_v62 = vld [vmem:[%s12401_s1 + $0xc8] sm:$0xff]  ;;  %v9694_v2 = vld [vmem:[%s12401_s1 + $0xd0] sm:$0xff]  ;;  %v9709_v5 = vld [vmem:[%s12401_s1 + $0xd8] sm:$0xff] }
   0xc   :  { %v9714_v6 = vld [vmem:[%s12401_s1 + $0xe0] sm:$0xff]  ;;  %v9733_v9 = vld [vmem:[%s12401_s1 + $0xf0] sm:$0xff] }
   0xd   :  { %81 = vrot.lane.b32.xlu0 %v9428_v12, %s9354_s0  ;;  %58 = vrot.lane.b32.xlu1 %v9418_v10, %s9355_s28 }
  0x11   :  { %60 = vrot.lane.b32.xlu0 %v9428_v12, %s9355_s28  ;;  %62 = vrot.lane.b32.xlu1 %v9420_v11, %s9355_s28 }
  0x15   :  { %602 = vrot.lane.b32.xlu0 %v9418_v10, %s9356_s29  ;;  %604 = vrot.lane.b32.xlu1 %v9428_v12, %s9356_s29 }
  0x19   :  { %606 = vrot.lane.b32.xlu0 %v9420_v11, %s9356_s29  ;;  %896 = vrot.lane.b32.xlu1 %v9418_v10, %s9357_s30 }
  0x1d   :  { %898 = vrot.lane.b32.xlu0 %v9428_v12, %s9357_s30  ;;  %900 = vrot.lane.b32.xlu1 %v9420_v11, %s9357_s30 }
  0x21   :  { %1473 = vrot.lane.b32.xlu0 %v9428_v12, %s9358_s8  ;;  %1475 = vrot.lane.b32.xlu1 %v9420_v11, %s9358_s8 }
  0x25   :  { %1471 = vrot.lane.b32.xlu0 %v9418_v10, %s9358_s8  ;;  %1767 = vrot.lane.b32.xlu1 %v9428_v12, %s9359_s9 }
  0x29   :  { %1769 = vrot.lane.b32.xlu0 %v9420_v11, %s9359_s9  ;;  %1765 = vrot.lane.b32.xlu1 %v9418_v10, %s9359_s9 }
  0x2d   :  { %2061 = vrot.lane.b32.xlu0 %v9428_v12, %s9360_s10  ;;  %2063 = vrot.lane.b32.xlu1 %v9420_v11, %s9360_s10 }
  0x31   :  { %2059 = vrot.lane.b32.xlu0 %v9418_v10, %s9360_s10  ;;  %2355 = vrot.lane.b32.xlu1 %v9428_v12, %s9361_s11 }
  0x35   :  { %2357 = vrot.lane.b32.xlu0 %v9420_v11, %s9361_s11  ;;  %2353 = vrot.lane.b32.xlu1 %v9418_v10, %s9361_s11 }
  0x7b   :  { %v80_v14 = vpop.permute.xlu0 %79  ;;  %v84_v15 = vpop.permute.xlu1 %83 }
  0x7c   :  { %v88_v21 = vsel %vm85_vm1, %v84_v15, %v80_v14 }
  0x7f   :  { %v82_v16 = vpop.permute.xlu0 %81  ;;  %v59_v17 = vpop.permute.xlu1 %58 }
  0x80   :  { %v87_v18 = vsel %vm85_vm1, %v80_v14, %v82_v16  ;;  %v86_v19 = vsel %vm85_vm1, %v82_v16, %v84_v15  ;;  %v9747_v14 = vld [vmem:[%s12401_s1 + $0xf8] sm:$0xff]  ;;  %v9752_v15 = vld [vmem:[%s12401_s1 + $0x100] sm:$0xff]  ;;  %v9765_v16 = vld [vmem:[%s12401_s1 + $0x108] sm:$0xff] }
  0x81   :  { %6867 = vmatprep.subr.msk.mxu0 %vm114_vm2, %v87_v18  ;;  %7458 = vmatprep.subr.msk.mxu1 %vm114_vm2, %v86_v19 }
  0x82   :  { %6868 = vmatpush1.msk.msra.mxu0 %vm114_vm2, %v88_v21  ;;  %7459 = vmatpush3.msk.msra.mxu1 %vm114_vm2, %v86_v19  ;;  %v9774_v19 = vld [vmem:[%s12401_s1 + $0x110] sm:$0xff] }
  0x83   :  { %6869 = vmatmul.mubr.msk.f32.vlgmr.msra.gmra.mrb[0].mxu0 %vm89_vm0, %v6859_v8  ;;  %7461 = vmatmul.mubr.msk.f32.vlgmr.msra.gmra.mrb[0].mxu1 %vm89_vm0, %v6860_v20  ;;  %v61_v23 = vpop.permute.xlu0 %60  ;;  %v63_v24 = vpop.permute.xlu1 %62  ;;  %v9728_v8 = vld [vmem:[%s12401_s1 + $0xe8] sm:$0xff] }
  0x84   :  { %194 = vmatprep.mubr.f32.mxu0 %v12412_v7  ;;  %7463 = vmatprep.mubr.msk.f32.mxu1 %vm89_vm0, %v6861_v22  ;;  %v69_v26 = vsel %vm66_vm3, %v63_v24, %v59_v17  ;;  %v68_v27 = vsel %vm66_vm3, %v59_v17, %v61_v23  ;;  %v67_v28 = vsel %vm66_vm3, %v61_v23, %v63_v24  ;;  %v9799_v23 = vld [vmem:[%s12401_s1 + $0x120] sm:$0xff]  ;;  %v9816_v24 = vld [vmem:[%s12401_s1 + $0x128] sm:$0xff] }
  0x85   :  { %6886 = vmatprep.subr.msk.mxu0 %vm114_vm2, %v68_v27  ;;  %7472 = vmatprep.subr.msk.mxu1 %vm114_vm2, %v67_v28  ;;  %v9840_v27 = vld [vmem:[%s12401_s1 + $0x140] sm:$0xff] }
  0x86   :  { %6887 = vmatpush1.msk.msra.mxu0 %vm114_vm2, %v69_v26  ;;  %7473 = vmatpush3.msk.msra.mxu1 %vm114_vm2, %v67_v28  ;;  %v9835_v26 = vld [vmem:[%s12401_s1 + $0x138] sm:$0xff]  ;;  %v9853_v28 = vld [vmem:[%s12401_s1 + $0x148] sm:$0xff] }
  0x87   :  { %6870 = vmatmul.mubr.msk.f32.gmra.mrb[2].mxu0 %vm89_vm0, %v6860_v20  ;;  %7464 = vmatmul.mubr.msk.f32.gmra.mrb[2].mxu1 %vm89_vm0, %v6862_v25  ;;  %v603_v30 = vpop.permute.xlu0 %602  ;;  %v605_v31 = vpop.permute.xlu1 %604 }
  0x88   :  { %200 = vmatprep.mubr.f32.mxu0 %v12412_v7  ;;  %7466 = vmatprep.mubr.msk.f32.mxu1 %vm89_vm0, %v6863_v29  ;;  %v610_v33 = vsel %vm608_vm4, %v603_v30, %v605_v31 }
  0x89   :  { %6913 = vmatprep.subr.msk.mxu0 %vm114_vm2, %v610_v33  ;;  %v9878_v33 = vld [vmem:[%s12401_s1 + $0x158] sm:$0xff] }
  0x8b   :  { %6871 = vmatmul.mubr.msk.f32.gmra.mrb[4].mxu0 %vm89_vm0, %v6861_v22  ;;  %7467 = vmatmul.mubr.msk.f32.gmra.mrb[4].mxu1 %vm89_vm0, %v6864_v32  ;;  %v607_v35 = vpop.permute.xlu0 %606  ;;  %v9531_v36 = vpop.permute.xlu1 %896  ;;  %v9794_v22 = vld [vmem:[%s12401_s1 + $0x118] sm:$0xff] }
  0x8c   :  { %206 = vmatprep.mubr.f32.mxu0 %v12412_v7  ;;  %7469 = vmatprep.mubr.msk.f32.mxu1 %vm89_vm0, %v6865_v34  ;;  %v609_v38 = vsel %vm608_vm4, %v605_v31, %v607_v35  ;;  %v611_v53 = vsel %vm608_vm4, %v607_v35, %v603_v30  ;;  %v9862_v31 = vld [vmem:[%s12401_s1 + $0x150] sm:$0xff]  ;;  %v9897_v35 = vld [vmem:[%s12401_s1 + $0x168] sm:$0xff] }
  0x8d   :  { %7486 = vmatprep.subr.msk.mxu1 %vm114_vm2, %v609_v38 }
  0x8f   :  { %6872 = vmatmul.mubr.msk.f32.gmra.mrb[6].mxu0 %vm89_vm0, %v6862_v25  ;;  %7470 = vmatmul.mubr.msk.f32.gmra.mrb[6].mxu1 %vm89_vm0, %v6866_v37  ;;  %v899_v41 = vpop.permute.xlu0 %898  ;;  %v9552_v42 = vpop.permute.xlu1 %900 }
  0x90   :  { %212 = vmatprep.mubr.f32.mxu0 %v12412_v7  ;;  %7474 = vmatprep.mubr.msk.f32.mxu1 %vm89_vm0, %v30_v39  ;;  %v903_v44 = vsel %vm902_vm5, %v899_v41, %v9552_v42  ;;  %v904_v54 = vsel %vm902_vm5, %v9531_v36, %v899_v41  ;;  %v905_v20 = vsel %vm902_vm5, %v9552_v42, %v9531_v36  ;;  %v9902_v36 = vld [vmem:[%s12401_s1 + $0x170] sm:$0xff]  ;;  %v9927_v41 = vld [vmem:[%s12401_s1 + $0x180] sm:$0xff]  ;;  %v9362_v42 = vmov 0  }
  0x91   :  { %8630 = vset.pattern.permute.xlu1 %v9362_v42  ;;  %8629 = vset.pattern.permute.xlu0 %v9362_v42 }
  0x93   :  { %6873 = vmatmul.mubr.msk.f32.gmra.mrb[8].mxu0 %vm89_vm0, %v6863_v29  ;;  %7475 = vmatmul.mubr.msk.f32.vlgmr.msra.gmra.mrb[0].mxu1 %vm89_vm0, %v31_v40  ;;  %v9657_v59 = vpop.permute.xlu0 %1473  ;;  %v9689_v1 = vpop.permute.xlu1 %1475 }
  0x94   :  { %218 = vmatprep.mubr.f32.mxu0 %v12412_v7  ;;  %7477 = vmatprep.mubr.msk.f32.mxu1 %vm89_vm0, %v32_v43 }
  0x95   :  { %7487 = vmatpush3.msk.msra.mxu1 %vm114_vm2, %v609_v38  ;;  %v9916_v38 = vld [vmem:[%s12401_s1 + $0x178] sm:$0xff] }
  0x96   :  { %7500 = vmatprep.subr.msk.mxu1 %vm114_vm2, %v903_v44 }
  0x97   :  { %6874 = vmatmul.mubr.msk.f32.gmra.mrb[10].mxu0 %vm89_vm0, %v6864_v32  ;;  %7478 = vmatmul.mubr.msk.f32.gmra.mrb[2].mxu1 %vm89_vm0, %v33_v45  ;;  %v9687_v63 = vpop.permute.xlu0 %1471 }
  0x98   :  { %224 = vmatprep.mubr.f32.mxu0 %v12412_v7  ;;  %7480 = vmatprep.mubr.msk.f32.mxu1 %vm89_vm0, %v34_v46  ;;  %v1480_v3 = vsel %vm1477_vm6, %v9689_v1, %v9687_v63 }
  0x9b   :  { %6875 = vmatmul.mubr.msk.f32.gmra.mrb[12].mxu0 %vm89_vm0, %v6865_v34  ;;  %7481 = vmatmul.mubr.msk.f32.gmra.mrb[4].mxu1 %vm89_vm0, %v35_v47  ;;  %v9767_v17 = vpop.permute.xlu0 %1769  ;;  %v9883_v34 = vld [vmem:[%s12401_s1 + $0x160] sm:$0xff] }
  0x9c   :  { %230 = vmatprep.mubr.f32.mxu0 %v12412_v7  ;;  %7483 = vmatprep.mubr.msk.f32.mxu1 %vm89_vm0, %v9582_v48 }
  0x9f   :  { %6876 = vmatmul.mubr.msk.f32.gmra.mrb[14].mxu0 %vm89_vm0, %v6866_v37  ;;  %7484 = vmatmul.mubr.msk.f32.gmra.mrb[6].mxu1 %vm89_vm0, %v9592_v49  ;;  %v9823_v25 = vpop.permute.xlu0 %2061 }
  0xa0   :  { %439 = vmatprep.mubr.f32.mxu0 %v12412_v7  ;;  %7488 = vmatprep.mubr.msk.f32.mxu1 %vm89_vm0, %v9597_v50 }
  0xa3   :  { %6888 = vmatmul.mubr.msk.f32.vlgmr.msra.gmra.mrb[0].mxu0 %vm89_vm0, %v30_v39  ;;  %7489 = vmatmul.mubr.msk.f32.vlgmr.msra.gmra.mrb[0].mxu1 %vm89_vm0, %v9608_v51  ;;  %v9855_v29 = vpop.permute.xlu0 %2059  ;;  %v2638_v39 = vld [vmem:[%s12402_s2] sm:$0xff] }
  0xa4   :  { %445 = vmatprep.mubr.f32.mxu0 %v12412_v7  ;;  %7491 = vmatprep.mubr.msk.f32.mxu1 %vm89_vm0, %v9613_v52 }
  0xa5   :  { %6914 = vmatpush1.msk.msra.mxu0 %vm114_vm2, %v611_v53  ;;  %7501 = vmatpush3.msk.msra.mxu1 %vm114_vm2, %v903_v44  ;;  %v2640_v44 = vld [vmem:[%s12402_s2 + $0x10] sm:$0xff]  ;;  %v2643_v53 = vld [vmem:[%s12402_s2 + $0x28] sm:$0xff] }
  0xa6   :  { %7514 = vmatprep.subr.msk.mxu1 %vm114_vm2, %v9420_v11  ;;  %6940 = vmatprep.subr.msk.mxu0 %vm114_vm2, %v904_v54  ;;  %v2642_v54 = vld [vmem:[%s12402_s2 + $0x20] sm:$0xff] }
  0xa7   :  { %6889 = vmatmul.mubr.msk.f32.gmra.mrb[2].mxu0 %vm89_vm0, %v31_v40  ;;  %7492 = vmatmul.mubr.msk.f32.gmra.mrb[2].mxu1 %vm89_vm0, %v9629_v55  ;;  %v2639_v40 = vld [vmem:[%s12402_s2 + $0x8] sm:$0xff] }
  0xa8   :  { %451 = vmatprep.mubr.f32.mxu0 %v12412_v7  ;;  %7494 = vmatprep.mubr.msk.f32.mxu1 %vm89_vm0, %v9634_v56 }
  0xa9   :  { %2648 = vperm.xlu0 %8629, %v2638_v39   ;;  %2653 = vperm.xlu1 %8630, %v2639_v40  }
  0xab   :  { %6890 = vmatmul.mubr.msk.f32.gmra.mrb[4].mxu0 %vm89_vm0, %v32_v43  ;;  %7495 = vmatmul.mubr.msk.f32.gmra.mrb[4].mxu1 %vm89_vm0, %v9650_v57  ;;  %v2641_v43 = vld [vmem:[%s12402_s2 + $0x18] sm:$0xff] }
  0xac   :  { %457 = vmatprep.mubr.f32.mxu0 %v12412_v7  ;;  %7497 = vmatprep.mubr.msk.f32.mxu1 %vm89_vm0, %v9655_v58 }
  0xad   :  { %2663 = vperm.xlu0 %8629, %v2641_v43   ;;  %2658 = vperm.xlu1 %8630, %v2640_v44  }
  0xaf   :  { %6891 = vmatmul.mubr.msk.f32.gmra.mrb[6].mxu0 %vm89_vm0, %v33_v45  ;;  %7498 = vmatmul.mubr.msk.f32.gmra.mrb[6].mxu1 %vm89_vm0, %v9668_v60  ;;  %v9946_v45 = vld [vmem:[%s12401_s1 + $0x188] sm:$0xff] }
  0xb0   :  { %463 = vmatprep.mubr.f32.mxu0 %v12412_v7  ;;  %7502 = vmatprep.mubr.msk.f32.mxu1 %vm89_vm0, %v9673_v61 }
  0xb1   :  { %2673 = vperm.xlu0 %8629, %v2643_v53   ;;  %2668 = vperm.xlu1 %8630, %v2642_v54  }
  0xb3   :  { %6892 = vmatmul.mubr.msk.f32.gmra.mrb[8].mxu0 %vm89_vm0, %v34_v46  ;;  %7503 = vmatmul.mubr.msk.f32.vlgmr.msra.gmra.mrb[0].mxu1 %vm89_vm0, %v9685_v62  ;;  %v9948_v46 = vpop.permute.xlu0 %2357 }
  0xb4   :  { %469 = vmatprep.mubr.f32.mxu0 %v12412_v7  ;;  %7505 = vmatprep.mubr.msk.f32.mxu1 %vm89_vm0, %v9694_v2 }
  0xb5   :  { %7515 = vmatpush3.msk.msra.mxu1 %vm114_vm2, %v9420_v11  ;;  %v9735_v11 = vpop.permute.xlu1 %1767 }
  0xb6   :  { %7528 = vmatprep.subr.msk.mxu1 %vm114_vm2, %v1480_v3 }
  0xb7   :  { %6893 = vmatmul.mubr.msk.f32.gmra.mrb[10].mxu0 %vm89_vm0, %v35_v47  ;;  %7506 = vmatmul.mubr.msk.f32.gmra.mrb[2].mxu1 %vm89_vm0, %v9709_v5 }
  0xb8   :  { %475 = vmatprep.mubr.f32.mxu0 %v12412_v7  ;;  %7508 = vmatprep.mubr.msk.f32.mxu1 %vm89_vm0, %v9714_v6 }
  0xb9   :  { %v9769_v18 = vpop.permute.xlu1 %1765 }
  0xba   :  { %v1774_v21 = vsel %vm1771_vm7, %v9767_v17, %v9769_v18 }
  0xbb   :  { %6894 = vmatmul.mubr.msk.f32.gmra.mrb[12].mxu0 %vm89_vm0, %v9582_v48  ;;  %7509 = vmatmul.mubr.msk.f32.gmra.mrb[4].mxu1 %vm89_vm0, %v9728_v8  ;;  %v9955_v48 = vld [vmem:[%s12401_s1 + $0x190] sm:$0xff] }
  0xbc   :  { %481 = vmatprep.mubr.f32.mxu0 %v12412_v7  ;;  %7511 = vmatprep.mubr.msk.f32.mxu1 %vm89_vm0, %v9733_v9 }
  0xbd   :  { %v9857_v30 = vpop.permute.xlu1 %2063 }
  0xbe   :  { %v2068_v32 = vsel %vm2065_vm8, %v9857_v30, %v9855_v29 }
  0xbf   :  { %6895 = vmatmul.mubr.msk.f32.gmra.mrb[14].mxu0 %vm89_vm0, %v9592_v49  ;;  %7512 = vmatmul.mubr.msk.f32.gmra.mrb[6].mxu1 %vm89_vm0, %v9747_v14 }
  0xc0   :  { %709 = vmatprep.mubr.f32.mxu0 %v12412_v7  ;;  %7516 = vmatprep.mubr.msk.f32.mxu1 %vm89_vm0, %v9752_v15 }
  0xc1   :  { %v9904_v37 = vpop.permute.xlu1 %2355 }
  0xc3   :  { %6915 = vmatmul.mubr.msk.f32.vlgmr.msra.gmra.mrb[0].mxu0 %vm89_vm0, %v9597_v50  ;;  %7517 = vmatmul.mubr.msk.f32.vlgmr.msra.gmra.mrb[0].mxu1 %vm89_vm0, %v9765_v16  ;;  %v1478_v50 = vsel %vm1477_vm6, %v9657_v59, %v9689_v1  ;;  %v10060_v1 = vld [vmem:[%s12401_s1 + $0x1d8] sm:$0xff] }
  0xc4   :  { %715 = vmatprep.mubr.f32.mxu0 %v12412_v7  ;;  %7519 = vmatprep.mubr.msk.f32.mxu1 %vm89_vm0, %v9774_v19 }
  0xc5   :  { %6941 = vmatpush1.msk.msra.mxu0 %vm114_vm2, %v905_v20  ;;  %7529 = vmatpush3.msk.msra.mxu1 %vm114_vm2, %v1480_v3  ;;  %v9950_v47 = vpop.permute.xlu1 %2353  ;;  %v10078_v3 = vld [vmem:[%s12401_s1 + $0x1e8] sm:$0xff]  ;;  %v10117_v20 = vld [vmem:[%s12401_s1 + $0x210] sm:$0xff] }
  0xc6   :  { %7542 = vmatprep.subr.msk.mxu1 %vm114_vm2, %v1774_v21  ;;  %6967 = vmatprep.subr.msk.mxu0 %vm114_vm2, %v9428_v12  ;;  %v9821_v12 = vld [vmem:[%s12401_s1 + $0x130] sm:$0xff]  ;;  %v2362_v49 = vsel %vm2359_vm9, %v9948_v46, %v9950_v47 }
  0xc7   :  { %6916 = vmatmul.mubr.msk.f32.gmra.mrb[2].mxu0 %vm89_vm0, %v9608_v51  ;;  %7520 = vmatmul.mubr.msk.f32.gmra.mrb[2].mxu1 %vm89_vm0, %v9794_v22  ;;  %v9975_v51 = vld [vmem:[%s12401_s1 + $0x198] sm:$0xff] }
  0xc8   :  { %721 = vmatprep.mubr.f32.mxu0 %v12412_v7  ;;  %7522 = vmatprep.mubr.msk.f32.mxu1 %vm89_vm0, %v9799_v23 }
  0xcb   :  { %6917 = vmatmul.mubr.msk.f32.gmra.mrb[4].mxu0 %vm89_vm0, %v9613_v52  ;;  %7523 = vmatmul.mubr.msk.f32.gmra.mrb[4].mxu1 %vm89_vm0, %v9816_v24  ;;  %v9980_v52 = vld [vmem:[%s12401_s1 + $0x1a0] sm:$0xff] }
  0xcc   :  { %727 = vmatprep.mubr.f32.mxu0 %v12412_v7  ;;  %7525 = vmatprep.mubr.msk.f32.mxu1 %vm89_vm0, %v9821_v12 }
  0xcf   :  { %6918 = vmatmul.mubr.msk.f32.gmra.mrb[6].mxu0 %vm89_vm0, %v9629_v55  ;;  %7526 = vmatmul.mubr.msk.f32.gmra.mrb[6].mxu1 %vm89_vm0, %v9835_v26  ;;  %v10008_v55 = vld [vmem:[%s12401_s1 + $0x1b0] sm:$0xff] }
  0xd0   :  { %733 = vmatprep.mubr.f32.mxu0 %v12412_v7  ;;  %7530 = vmatprep.mubr.msk.f32.mxu1 %vm89_vm0, %v9840_v27 }
  0xd3   :  { %6919 = vmatmul.mubr.msk.f32.gmra.mrb[8].mxu0 %vm89_vm0, %v9634_v56  ;;  %7531 = vmatmul.mubr.msk.f32.vlgmr.msra.gmra.mrb[0].mxu1 %vm89_vm0, %v9853_v28  ;;  %v2645_v56 = vld [vmem:[%s12402_s2 + $0x38] sm:$0xff] }
  0xd4   :  { %739 = vmatprep.mubr.f32.mxu0 %v12412_v7  ;;  %7533 = vmatprep.mubr.msk.f32.mxu1 %vm89_vm0, %v9862_v31 }
  0xd5   :  { %7543 = vmatpush3.msk.msra.mxu1 %vm114_vm2, %v1774_v21  ;;  %2683 = vperm.xlu0 %8629, %v2645_v56   ;;  %v1772_v21 = vsel %vm1771_vm7, %v9735_v11, %v9767_v17  ;;  %v10161_v17 = vld [vmem:[%s12401_s1 + $0x230] sm:$0xff] }
  0xd6   :  { %7556 = vmatprep.subr.msk.mxu1 %vm114_vm2, %v2068_v32 }
  0xd7   :  { %6920 = vmatmul.mubr.msk.f32.gmra.mrb[10].mxu0 %vm89_vm0, %v9650_v57  ;;  %7534 = vmatmul.mubr.msk.f32.gmra.mrb[2].mxu1 %vm89_vm0, %v9878_v33  ;;  %v2644_v57 = vld [vmem:[%s12402_s2 + $0x30] sm:$0xff] }
  0xd8   :  { %745 = vmatprep.mubr.f32.mxu0 %v12412_v7  ;;  %7536 = vmatprep.mubr.msk.f32.mxu1 %vm89_vm0, %v9883_v34 }
  0xd9   :  { %2678 = vperm.xlu1 %8630, %v2644_v57  }
  0xdb   :  { %6921 = vmatmul.mubr.msk.f32.gmra.mrb[12].mxu0 %vm89_vm0, %v9655_v58  ;;  %7537 = vmatmul.mubr.msk.f32.gmra.mrb[4].mxu1 %vm89_vm0, %v9897_v35  ;;  %v10026_v58 = vld [vmem:[%s12401_s1 + $0x1b8] sm:$0xff] }
  0xdc   :  { %751 = vmatprep.mubr.f32.mxu0 %v12412_v7  ;;  %7539 = vmatprep.mubr.msk.f32.mxu1 %vm89_vm0, %v9902_v36 }
  0xdf   :  { %6922 = vmatmul.mubr.msk.f32.gmra.mrb[14].mxu0 %vm89_vm0, %v9668_v60  ;;  %7540 = vmatmul.mubr.msk.f32.gmra.mrb[6].mxu1 %vm89_vm0, %v9916_v38  ;;  %v10031_v60 = vld [vmem:[%s12401_s1 + $0x1c0] sm:$0xff] }
  0xe0   :  { %1003 = vmatprep.mubr.f32.mxu0 %v12412_v7  ;;  %7544 = vmatprep.mubr.msk.f32.mxu1 %vm89_vm0, %v9927_v41 }
  0xe3   :  { %6942 = vmatmul.mubr.msk.f32.vlgmr.msra.gmra.mrb[0].mxu0 %vm89_vm0, %v9673_v61  ;;  %7545 = vmatmul.mubr.msk.f32.vlgmr.msra.gmra.mrb[0].mxu1 %vm89_vm0, %v9946_v45  ;;  %v10043_v61 = vld [vmem:[%s12401_s1 + $0x1c8] sm:$0xff] }
  0xe4   :  { %1009 = vmatprep.mubr.f32.mxu0 %v12412_v7  ;;  %7547 = vmatprep.mubr.msk.f32.mxu1 %vm89_vm0, %v9955_v48 }
  0xe5   :  { %7557 = vmatpush3.msk.msra.mxu1 %vm114_vm2, %v2068_v32  ;;  %6968 = vmatpush1.msk.msra.mxu0 %vm114_vm2, %v9418_v10  ;;  %v10003_v10 = vld [vmem:[%s12401_s1 + $0x1a8] sm:$0xff] }
  0xe6   :  { %7570 = vmatprep.subr.msk.mxu1 %vm114_vm2, %v2362_v49  ;;  %6994 = vmatprep.subr.msk.mxu0 %vm114_vm2, %v1478_v50 }
  0xe7   :  { %6943 = vmatmul.mubr.msk.f32.gmra.mrb[2].mxu0 %vm89_vm0, %v9685_v62  ;;  %7548 = vmatmul.mubr.msk.f32.gmra.mrb[2].mxu1 %vm89_vm0, %v9975_v51  ;;  %v10048_v62 = vld [vmem:[%s12401_s1 + $0x1d0] sm:$0xff] }
  0xe8   :  { %1015 = vmatprep.mubr.f32.mxu0 %v12412_v7  ;;  %7550 = vmatprep.mubr.msk.f32.mxu1 %vm89_vm0, %v9980_v52 }
  0xeb   :  { %6944 = vmatmul.mubr.msk.f32.gmra.mrb[4].mxu0 %vm89_vm0, %v9694_v2  ;;  %7551 = vmatmul.mubr.msk.f32.gmra.mrb[4].mxu1 %vm89_vm0, %v10003_v10  ;;  %v10065_v2 = vld [vmem:[%s12401_s1 + $0x1e0] sm:$0xff] }
  0xec   :  { %1021 = vmatprep.mubr.f32.mxu0 %v12412_v7  ;;  %7553 = vmatprep.mubr.msk.f32.mxu1 %vm89_vm0, %v10008_v55 }
  0xef   :  { %6945 = vmatmul.mubr.msk.f32.gmra.mrb[6].mxu0 %vm89_vm0, %v9709_v5  ;;  %7554 = vmatmul.mubr.msk.f32.gmra.mrb[6].mxu1 %vm89_vm0, %v10026_v58  ;;  %v10083_v5 = vld [vmem:[%s12401_s1 + $0x1f0] sm:$0xff] }
  0xf0   :  { %1027 = vmatprep.mubr.f32.mxu0 %v12412_v7  ;;  %7558 = vmatprep.mubr.msk.f32.mxu1 %vm89_vm0, %v10031_v60 }
  0xf3   :  { %6946 = vmatmul.mubr.msk.f32.gmra.mrb[8].mxu0 %vm89_vm0, %v9714_v6  ;;  %7559 = vmatmul.mubr.msk.f32.vlgmr.msra.gmra.mrb[0].mxu1 %vm89_vm0, %v10043_v61  ;;  %v10095_v6 = vld [vmem:[%s12401_s1 + $0x1f8] sm:$0xff] }
  0xf4   :  { %1033 = vmatprep.mubr.f32.mxu0 %v12412_v7  ;;  %7561 = vmatprep.mubr.msk.f32.mxu1 %vm89_vm0, %v10048_v62 }
  0xf5   :  { %7571 = vmatpush3.msk.msra.mxu1 %vm114_vm2, %v2362_v49 }
  0xf7   :  { %6947 = vmatmul.mubr.msk.f32.gmra.mrb[10].mxu0 %vm89_vm0, %v9728_v8  ;;  %7562 = vmatmul.mubr.msk.f32.gmra.mrb[2].mxu1 %vm89_vm0, %v10060_v1  ;;  %v10100_v8 = vld [vmem:[%s12401_s1 + $0x200] sm:$0xff] }
  0xf8   :  { %1039 = vmatprep.mubr.f32.mxu0 %v12412_v7  ;;  %7564 = vmatprep.mubr.msk.f32.mxu1 %vm89_vm0, %v10065_v2 }
  0xfb   :  { %6948 = vmatmul.mubr.msk.f32.gmra.mrb[12].mxu0 %vm89_vm0, %v9733_v9  ;;  %7565 = vmatmul.mubr.msk.f32.gmra.mrb[4].mxu1 %vm89_vm0, %v10078_v3  ;;  %v10112_v9 = vld [vmem:[%s12401_s1 + $0x208] sm:$0xff] }
  0xfc   :  { %1045 = vmatprep.mubr.f32.mxu0 %v12412_v7  ;;  %7567 = vmatprep.mubr.msk.f32.mxu1 %vm89_vm0, %v10083_v5 }
  0xff   :  { %6949 = vmatmul.mubr.msk.f32.gmra.mrb[14].mxu0 %vm89_vm0, %v9747_v14  ;;  %7568 = vmatmul.mubr.msk.f32.gmra.mrb[6].mxu1 %vm89_vm0, %v10095_v6  ;;  %v1479_v14 = vsel %vm1477_vm6, %v9687_v63, %v9657_v59  ;;  %v10137_v59 = vld [vmem:[%s12401_s1 + $0x218] sm:$0xff]  ;;  %v10142_v63 = vld [vmem:[%s12401_s1 + $0x220] sm:$0xff] }
 0x100   :  { %1284 = vmatprep.mubr.f32.mxu0 %v12412_v7  ;;  %7572 = vmatprep.mubr.msk.f32.mxu1 %vm89_vm0, %v10100_v8 }
 0x103   :  { %6969 = vmatmul.mubr.msk.f32.vlgmr.msra.gmra.mrb[0].mxu0 %vm89_vm0, %v9752_v15  ;;  %7573 = vmatmul.mubr.msk.f32.vlgmr.msra.gmra.mrb[0].mxu1 %vm89_vm0, %v10112_v9  ;;  %v10156_v15 = vld [vmem:[%s12401_s1 + $0x228] sm:$0xff] }
 0x104   :  { %1290 = vmatprep.mubr.f32.mxu0 %v12412_v7  ;;  %7575 = vmatprep.mubr.msk.f32.mxu1 %vm89_vm0, %v10117_v20 }
 0x105   :  { %6995 = vmatpush1.msk.msra.mxu0 %vm114_vm2, %v1479_v14 }
 0x106   :  { %7021 = vmatprep.subr.msk.mxu0 %vm114_vm2, %v1772_v21 }
 0x107   :  { %6970 = vmatmul.mubr.msk.f32.gmra.mrb[2].mxu0 %vm89_vm0, %v9765_v16  ;;  %7576 = vmatmul.mubr.msk.f32.gmra.mrb[2].mxu1 %vm89_vm0, %v10137_v59  ;;  %v10173_v16 = vld [vmem:[%s12401_s1 + $0x238] sm:$0xff] }
 0x108   :  { %1296 = vmatprep.mubr.f32.mxu0 %v12412_v7  ;;  %7578 = vmatprep.mubr.msk.f32.mxu1 %vm89_vm0, %v10142_v63 }
 0x10b   :  { %6971 = vmatmul.mubr.msk.f32.gmra.mrb[4].mxu0 %vm89_vm0, %v9774_v19  ;;  %7579 = vmatmul.mubr.msk.f32.gmra.mrb[4].mxu1 %vm89_vm0, %v10156_v15  ;;  %v1773_v19 = vsel %vm1771_vm7, %v9769_v18, %v9735_v11  ;;  %v2067_v11 = vsel %vm2065_vm8, %v9855_v29, %v9823_v25  ;;  %v2360_v18 = vsel %vm2359_vm9, %v9904_v37, %v9948_v46 }
 0x10c   :  { %1302 = vmatprep.mubr.f32.mxu0 %v12412_v7  ;;  %7581 = vmatprep.mubr.msk.f32.mxu1 %vm89_vm0, %v10161_v17 }
 0x10f   :  { %6972 = vmatmul.mubr.msk.f32.gmra.mrb[6].mxu0 %vm89_vm0, %v9794_v22  ;;  %7582 = vmatmul.mubr.msk.f32.gmra.mrb[6].mxu1 %vm89_vm0, %v10173_v16  ;;  %v2066_v22 = vsel %vm2065_vm8, %v9823_v25, %v9857_v30  ;;  %v12409_v25 = vsub.s32 2, %v9410_v4 }
 0x110   :  { %1308 = vmatprep.mubr.f32.mxu0 %v12412_v7  ;;  %2980 = vmatprep.mubr.f32.mxu1 %v12412_v7 }
 0x113   :  { %6973 = vmatmul.mubr.msk.f32.gmra.mrb[8].mxu0 %vm89_vm0, %v9799_v23  ;;  %v2361_v23 = vsel %vm2359_vm9, %v9950_v47, %v9904_v37 }
 0x114   :  { %1314 = vmatprep.mubr.f32.mxu0 %v12412_v7 }
 0x117   :  { %6974 = vmatmul.mubr.msk.f32.gmra.mrb[10].mxu0 %vm89_vm0, %v9816_v24 }
 0x118   :  { %1320 = vmatprep.mubr.f32.mxu0 %v12412_v7 }
 0x11b   :  { %6975 = vmatmul.mubr.msk.f32.gmra.mrb[12].mxu0 %vm89_vm0, %v9821_v12 }
 0x11c   :  { %1326 = vmatprep.mubr.f32.mxu0 %v12412_v7 }
 0x11f   :  { %6976 = vmatmul.mubr.msk.f32.gmra.mrb[14].mxu0 %vm89_vm0, %v9835_v26  ;;  %v26_v26 = vld [vmem:[%s12403_s6] ss:$2 sm:$0x7] }
 0x120   :  { %1578 = vmatprep.mubr.f32.mxu0 %v12412_v7 }
 0x123   :  { %6996 = vmatmul.mubr.msk.f32.vlgmr.msra.gmra.mrb[0].mxu0 %vm89_vm0, %v9840_v27 }
 0x124   :  { %1584 = vmatprep.mubr.f32.mxu0 %v12412_v7  ;;  %7022 = vmatpush1.msk.msra.mxu0 %vm114_vm2, %v1773_v19 }
 0x125   :  { %7048 = vmatprep.subr.msk.mxu0 %vm114_vm2, %v2066_v22 }
 0x127   :  { %6997 = vmatmul.mubr.msk.f32.gmra.mrb[2].mxu0 %vm89_vm0, %v9853_v28  ;;  %v10322_v28 = vrot.slane %v26_v26, %v12409_v25 }
 0x128   :  { %1590 = vmatprep.mubr.f32.mxu0 %v12412_v7  ;;  %v2649_v24 = vpop.permute.xlu0 %2648  ;;  %v2654_v12 = vpop.permute.xlu1 %2653 }
 0x129   :  { %12432 = vst [vmem:[#allocation3_spill] sm:$0xff] %v10322_v28 }
 0x12b   :  { %6998 = vmatmul.mubr.msk.f32.gmra.mrb[4].mxu0 %vm89_vm0, %v9862_v31 }
 0x12c   :  { %1596 = vmatprep.mubr.f32.mxu0 %v12412_v7  ;;  %v10318_v27 = vpop.permute.xlu0 %2663  ;;  %v2659_v29 = vpop.permute.xlu1 %2658 }
 0x12f   :  { %6999 = vmatmul.mubr.msk.f32.gmra.mrb[6].mxu0 %vm89_vm0, %v9878_v33 }
 0x130   :  { %1602 = vmatprep.mubr.f32.mxu0 %v12412_v7  ;;  %v10326_v37 = vpop.permute.xlu0 %2673  ;;  %v10329_v40 = vpop.permute.xlu1 %2668 }
 0x133   :  { %7000 = vmatmul.mubr.msk.f32.gmra.mrb[8].mxu0 %vm89_vm0, %v9883_v34 }
 0x134   :  { %1608 = vmatprep.mubr.f32.mxu0 %v12412_v7 }
 0x137   :  { %7001 = vmatmul.mubr.msk.f32.gmra.mrb[10].mxu0 %vm89_vm0, %v9897_v35 }
 0x138   :  { %1614 = vmatprep.mubr.f32.mxu0 %v12412_v7 }
 0x13b   :  { %7002 = vmatmul.mubr.msk.f32.gmra.mrb[12].mxu0 %vm89_vm0, %v9902_v36 }
 0x13c   :  { %1620 = vmatprep.mubr.f32.mxu0 %v12412_v7 }
 0x13f   :  { %7003 = vmatmul.mubr.msk.f32.gmra.mrb[14].mxu0 %vm89_vm0, %v9916_v38 }
 0x140   :  { %1872 = vmatprep.mubr.f32.mxu0 %v12412_v7 }
 0x143   :  { %7023 = vmatmul.mubr.msk.f32.vlgmr.msra.gmra.mrb[0].mxu0 %vm89_vm0, %v9927_v41 }
 0x144   :  { %1878 = vmatprep.mubr.f32.mxu0 %v12412_v7  ;;  %7049 = vmatpush1.msk.msra.mxu0 %vm114_vm2, %v2067_v11 }
 0x145   :  { %7075 = vmatprep.subr.msk.mxu0 %vm114_vm2, %v2360_v18 }
 0x147   :  { %7024 = vmatmul.mubr.msk.f32.gmra.mrb[2].mxu0 %vm89_vm0, %v9946_v45 }
 0x148   :  { %1884 = vmatprep.mubr.f32.mxu0 %v12412_v7 }
 0x14b   :  { %7025 = vmatmul.mubr.msk.f32.gmra.mrb[4].mxu0 %vm89_vm0, %v9955_v48 }
 0x14c   :  { %1890 = vmatprep.mubr.f32.mxu0 %v12412_v7 }
 0x14f   :  { %7026 = vmatmul.mubr.msk.f32.gmra.mrb[6].mxu0 %vm89_vm0, %v9975_v51 }
 0x150   :  { %1896 = vmatprep.mubr.f32.mxu0 %v12412_v7 }
 0x153   :  { %7027 = vmatmul.mubr.msk.f32.gmra.mrb[8].mxu0 %vm89_vm0, %v9980_v52 }
 0x154   :  { %1902 = vmatprep.mubr.f32.mxu0 %v12412_v7  ;;  %v10343_v51 = vpop.permute.xlu0 %2683 }
 0x157   :  { %7028 = vmatmul.mubr.msk.f32.gmra.mrb[10].mxu0 %vm89_vm0, %v10003_v10 }
 0x158   :  { %1908 = vmatprep.mubr.f32.mxu0 %v12412_v7  ;;  %v10346_v53 = vpop.permute.xlu1 %2678 }
 0x15b   :  { %7029 = vmatmul.mubr.msk.f32.gmra.mrb[12].mxu0 %vm89_vm0, %v10008_v55 }
 0x15c   :  { %1914 = vmatprep.mubr.f32.mxu0 %v12412_v7 }
 0x15f   :  { %7030 = vmatmul.mubr.msk.f32.gmra.mrb[14].mxu0 %vm89_vm0, %v10026_v58 }
 0x160   :  { %2166 = vmatprep.mubr.f32.mxu0 %v12412_v7 }
 0x163   :  { %7050 = vmatmul.mubr.msk.f32.vlgmr.msra.gmra.mrb[0].mxu0 %vm89_vm0, %v10031_v60 }
 0x164   :  { %2172 = vmatprep.mubr.f32.mxu0 %v12412_v7  ;;  %7076 = vmatpush1.msk.msra.mxu0 %vm114_vm2, %v2361_v23 }
 0x167   :  { %7051 = vmatmul.mubr.msk.f32.gmra.mrb[2].mxu0 %vm89_vm0, %v10043_v61 }
 0x168   :  { %2178 = vmatprep.mubr.f32.mxu0 %v12412_v7 }
 0x16b   :  { %7052 = vmatmul.mubr.msk.f32.gmra.mrb[4].mxu0 %vm89_vm0, %v10048_v62 }
 0x16c   :  { %2184 = vmatprep.mubr.f32.mxu0 %v12412_v7 }
 0x16f   :  { %7053 = vmatmul.mubr.msk.f32.gmra.mrb[6].mxu0 %vm89_vm0, %v10060_v1 }
 0x170   :  { %2190 = vmatprep.mubr.f32.mxu0 %v12412_v7 }
 0x173   :  { %7054 = vmatmul.mubr.msk.f32.gmra.mrb[8].mxu0 %vm89_vm0, %v10065_v2 }
 0x174   :  { %2196 = vmatprep.mubr.f32.mxu0 %v12412_v7 }
 0x177   :  { %7055 = vmatmul.mubr.msk.f32.gmra.mrb[10].mxu0 %vm89_vm0, %v10078_v3 }
 0x178   :  { %2202 = vmatprep.mubr.f32.mxu0 %v12412_v7 }
 0x17b   :  { %7056 = vmatmul.mubr.msk.f32.gmra.mrb[12].mxu0 %vm89_vm0, %v10083_v5  ;;  %v12411_v5 = vsub.s32 0, %v9410_v4 }
 0x17c   :  { %2208 = vmatprep.mubr.f32.mxu0 %v12412_v7 }
 0x17f   :  { %7057 = vmatmul.mubr.msk.f32.gmra.mrb[14].mxu0 %vm89_vm0, %v10095_v6  ;;  %v12410_v6 = vsub.s32 1, %v9410_v4 }
 0x180   :  { %2460 = vmatprep.mubr.f32.mxu0 %v12412_v7 }
 0x181   :  { %v10375_v21 = vrot.slane %v26_v26, %v12410_v6 }
 0x183   :  { %7077 = vmatmul.mubr.msk.f32.vlgmr.msra.gmra.mrb[0].mxu0 %vm89_vm0, %v10100_v8  ;;  %12434 = vst [vmem:[#allocation5_spill] sm:$0xff] %v10375_v21 }
 0x184   :  { %2466 = vmatprep.mubr.f32.mxu0 %v12412_v7 }
 0x187   :  { %7078 = vmatmul.mubr.msk.f32.gmra.mrb[2].mxu0 %vm89_vm0, %v10112_v9 }
 0x188   :  { %2472 = vmatprep.mubr.f32.mxu0 %v12412_v7 }
 0x18b   :  { %7079 = vmatmul.mubr.msk.f32.gmra.mrb[4].mxu0 %vm89_vm0, %v10117_v20  ;;  %v10371_v20 = vrot.slane %v26_v26, %v12411_v5 }
 0x18c   :  { %2478 = vmatprep.mubr.f32.mxu0 %v12412_v7 }
 0x18d   :  { %12433 = vst [vmem:[#allocation4_spill] sm:$0xff] %v10371_v20 }
 0x18f   :  { %7080 = vmatmul.mubr.msk.f32.gmra.mrb[6].mxu0 %vm89_vm0, %v10137_v59 }
 0x190   :  { %2484 = vmatprep.mubr.f32.mxu0 %v12412_v7 }
 0x193   :  { %7081 = vmatmul.mubr.msk.f32.gmra.mrb[8].mxu0 %vm89_vm0, %v10142_v63 }
 0x194   :  { %2490 = vmatprep.mubr.f32.mxu0 %v12412_v7 }
 0x197   :  { %7082 = vmatmul.mubr.msk.f32.gmra.mrb[10].mxu0 %vm89_vm0, %v10156_v15 }
 0x198   :  { %2496 = vmatprep.mubr.f32.mxu0 %v12412_v7 }
 0x19b   :  { %7083 = vmatmul.mubr.msk.f32.gmra.mrb[12].mxu0 %vm89_vm0, %v10161_v17 }
 0x19c   :  { %2502 = vmatprep.mubr.f32.mxu0 %v12412_v7 }
 0x19f   :  { %7084 = vmatmul.mubr.msk.f32.gmra.mrb[14].mxu0 %vm89_vm0, %v10173_v16 }
 0x1a0   :  { %5320 = vmatprep.mubr.f32.mxu0 %v12412_v7 }
 0x1d6   :  { %v7574_v30 = vpop.f32.mrb[0].mxu1 }
 0x1d7   :  { %v2575_v31 = vpop.f32.mrb[1].mxu1  ;;  %v2691_v32 = vadd.f32 %v7574_v30, %v2654_v12 }
 0x1d8   :  { %v2688_v33 = vadd.f32 %v2649_v24, %v2575_v31 }
 0x1d9   :  { %v2731_v34 = vmul.f32 %v10322_v28, %v2691_v32 }
 0x1da   :  { %v2728_v35 = vmul.f32 %v10322_v28, %v2688_v33  ;;  %v7577_v36 = vpop.f32.mrb[2].mxu1 }
 0x1db   :  { %v2697_v38 = vadd.f32 %v7577_v36, %v10318_v27  ;;  %v2585_v39 = vpop.f32.mrb[3].mxu1 }
 0x1dc   :  { %v2694_v41 = vadd.f32 %v2659_v29, %v2585_v39  ;;  %v10331_v42 = vpack.i.bf16 %v2731_v34, %v2728_v35  ;;  %v10337_v46 = vpack.c.bf16 %v2731_v34, %v2728_v35 }
 0x1dd   :  { %v2737_v43 = vmul.f32 %v10322_v28, %v2697_v38 }
 0x1de   :  { %v2734_v44 = vmul.f32 %v10322_v28, %v2694_v41  ;;  %v7580_v45 = vpop.f32.mrb[4].mxu1  ;;  %8632 = vrot.lane.b32.xlu1 %v10331_v42, %s9354_s0 }
 0x1df   :  { %v2703_v47 = vadd.f32 %v7580_v45, %v10326_v37  ;;  %v2595_v48 = vpop.f32.mrb[5].mxu1 }
 0x1e0   :  { %v2700_v49 = vadd.f32 %v10329_v40, %v2595_v48  ;;  %v10341_v50 = vpack.i.bf16 %v2737_v43, %v2734_v44  ;;  %v10351_v55 = vpack.c.bf16 %v2737_v43, %v2734_v44 }
 0x1e1   :  { %v2743_v52 = vmul.f32 %v10322_v28, %v2703_v47 }
 0x1e2   :  { %v2740_v54 = vmul.f32 %v10322_v28, %v2700_v49  ;;  %v7583_v10 = vpop.f32.mrb[6].mxu1  ;;  %8637 = vrot.lane.b32.xlu0 %v10341_v50, %s9354_s0 }
 0x1e3   :  { %v2709_v56 = vadd.f32 %v7583_v10, %v10343_v51  ;;  %v2605_v57 = vpop.f32.mrb[7].mxu1 }
 0x1e4   :  { %v2706_v58 = vadd.f32 %v10346_v53, %v2605_v57  ;;  %v10355_v60 = vpack.i.bf16 %v2743_v52, %v2740_v54  ;;  %v10361_v1 = vpack.c.bf16 %v2743_v52, %v2740_v54 }
 0x1e5   :  { %v2749_v61 = vmul.f32 %v10322_v28, %v2709_v56 }
 0x1e6   :  { %v2746_v62 = vmul.f32 %v10322_v28, %v2706_v58  ;;  %8642 = vrot.lane.b32.xlu1 %v10355_v60, %s9354_s0 }
 0x1e8   :  { %v10363_v2 = vpack.i.bf16 %v2749_v61, %v2746_v62  ;;  %v10365_v3 = vpack.c.bf16 %v2749_v61, %v2746_v62 }
 0x256   :  { %v2462_v8 = vpop.f32.mrb[0].mxu0 }
 0x257   :  { %v2464_v9 = vpop.f32.mrb[1].mxu0  ;;  %v2686_v14 = vadd.f32 %v2649_v24, %v2462_v8 }
 0x258   :  { %v2687_v59 = vadd.f32 %v2649_v24, %v2464_v9 }
 0x259   :  { %v10378_v19 = vmul.f32 %v10371_v20, %v2686_v14 }
 0x25a   :  { %v2468_v63 = vpop.f32.mrb[2].mxu0  ;;  %v10384_v11 = vmul.f32 %v10375_v21, %v2687_v59 }
 0x25b   :  { %v2689_v15 = vadd.f32 %v2654_v12, %v2468_v63  ;;  %v2470_v17 = vpop.f32.mrb[3].mxu0 }
 0x25c   :  { %v2690_v16 = vadd.f32 %v2654_v12, %v2470_v17 }
 0x25d   :  { %v10381_v22 = vmul.f32 %v10371_v20, %v2689_v15 }
 0x25e   :  { %v10387_v18 = vmul.f32 %v10375_v21, %v2690_v16  ;;  %v2474_v23 = vpop.f32.mrb[4].mxu0 }
 0x25f   :  { %v2476_v26 = vpop.f32.mrb[5].mxu0  ;;  %v10391_v24 = vpack.i.bf16 %v10381_v22, %v10378_v19  ;;  %v2692_v30 = vadd.f32 %v2659_v29, %v2474_v23 }
 0x260   :  { %v10395_v12 = vpack.i.bf16 %v10387_v18, %v10384_v11  ;;  %v2693_v31 = vadd.f32 %v2659_v29, %v2476_v26 }
 0x261   :  { %8647 = vrot.lane.b32.xlu1 %v10391_v24, %s9354_s0  ;;  %v10408_v39 = vmul.f32 %v10371_v20, %v2692_v30 }
 0x262   :  { %v2480_v32 = vpop.f32.mrb[6].mxu0  ;;  %8652 = vrot.lane.b32.xlu0 %v10395_v12, %s9354_s0  ;;  %v10414_v41 = vmul.f32 %v10375_v21, %v2693_v31 }
 0x263   :  { %v2695_v33 = vadd.f32 %v10318_v27, %v2480_v32  ;;  %v2482_v34 = vpop.f32.mrb[7].mxu0 }
 0x264   :  { %v2696_v35 = vadd.f32 %v10318_v27, %v2482_v34 }
 0x265   :  { %v10411_v29 = vmul.f32 %v10371_v20, %v2695_v33 }
 0x266   :  { %v10417_v43 = vmul.f32 %v10375_v21, %v2696_v35  ;;  %v2486_v44 = vpop.f32.mrb[8].mxu0 }
 0x267   :  { %v2488_v27 = vpop.f32.mrb[9].mxu0  ;;  %v10421_v45 = vpack.i.bf16 %v10411_v29, %v10408_v39  ;;  %v2698_v48 = vadd.f32 %v10329_v40, %v2486_v44 }
 0x268   :  { %v10425_v47 = vpack.i.bf16 %v10417_v43, %v10414_v41  ;;  %v2699_v49 = vadd.f32 %v10329_v40, %v2488_v27 }
 0x269   :  { %8657 = vrot.lane.b32.xlu0 %v10421_v45, %s9354_s0  ;;  %v10440_v61 = vmul.f32 %v10371_v20, %v2698_v48  ;;  %v10579_v48 = vpop.permute.xlu1 %8632 }
 0x26a   :  { %v2492_v52 = vpop.f32.mrb[10].mxu0  ;;  %8662 = vrot.lane.b32.xlu1 %v10425_v47, %s9354_s0  ;;  %v10446_v62 = vmul.f32 %v10375_v21, %v2699_v49 }
 0x26b   :  { %v2701_v54 = vadd.f32 %v10326_v37, %v2492_v52  ;;  %v2494_v10 = vpop.f32.mrb[11].mxu0  ;;  %v10587_v52 = vpop.permute.xlu0 %8637 }
 0x26c   :  { %v2702_v56 = vadd.f32 %v10326_v37, %v2494_v10  ;;  %v8635_v10 = vunpack.i.h.bf16 %v10579_v48  ;;  %v12415_v5 = vunpack.i.h.bf16 %v10587_v52 }
 0x26d   :  { %v10443_v40 = vmul.f32 %v10371_v20, %v2701_v54  ;;  %v10585_v49 = vpop.permute.xlu1 %8642 }
 0x26e   :  { %v10449_v8 = vmul.f32 %v10375_v21, %v2702_v56  ;;  %v2498_v9 = vpop.f32.mrb[12].mxu0  ;;  %v8634_v56 = vunpack.i.l.bf16 %v10579_v48  ;;  %v8645_v58 = vunpack.i.h.bf16 %v10585_v49 }
 0x26f   :  { %v2500_v37 = vpop.f32.mrb[13].mxu0  ;;  %v10453_v14 = vpack.i.bf16 %v10443_v40, %v10440_v61  ;;  %v2704_v63 = vadd.f32 %v10346_v53, %v2498_v9 }
 0x270   :  { %v10457_v59 = vpack.i.bf16 %v10449_v8, %v10446_v62  ;;  %v2705_v15 = vadd.f32 %v10346_v53, %v2500_v37 }
 0x271   :  { %8667 = vrot.lane.b32.xlu1 %v10453_v14, %s9354_s0  ;;  %v10472_v32 = vmul.f32 %v10371_v20, %v2704_v63 }
 0x272   :  { %v2504_v17 = vpop.f32.mrb[14].mxu0  ;;  %8672 = vrot.lane.b32.xlu0 %v10457_v59, %s9354_s0  ;;  %v10478_v33 = vmul.f32 %v10375_v21, %v2705_v15 }
 0x273   :  { %v2707_v16 = vadd.f32 %v10343_v51, %v2504_v17  ;;  %v2506_v23 = vpop.f32.mrb[15].mxu0 }
 0x274   :  { %v2708_v26 = vadd.f32 %v10343_v51, %v2506_v23 }
 0x275   :  { %v10475_v53 = vmul.f32 %v10371_v20, %v2707_v16 }
 0x276   :  { %v10481_v34 = vmul.f32 %v10375_v21, %v2708_v26 }
 0x277   :  { %v10485_v51 = vpack.i.bf16 %v10475_v53, %v10472_v32 }
 0x278   :  { %v10489_v35 = vpack.i.bf16 %v10481_v34, %v10478_v33 }
 0x279   :  { %8677 = vrot.lane.b32.xlu0 %v10485_v51, %s9354_s0 }
 0x27a   :  { %8682 = vrot.lane.b32.xlu1 %v10489_v35, %s9354_s0 }
 0x27d   :  { %8687 = vrot.lane.b32.xlu0 %v10363_v2, %s9354_s0 }
 0x27e   :  { %8692 = vrot.lane.b32.xlu1 %v10391_v24, %s9355_s28 }
 0x281   :  { %8697 = vrot.lane.b32.xlu0 %v10395_v12, %s9355_s28 }
 0x282   :  { %8702 = vrot.lane.b32.xlu1 %v10331_v42, %s9355_s28 }
 0x285   :  { %8707 = vrot.lane.b32.xlu0 %v10421_v45, %s9355_s28 }
 0x286   :  { %8712 = vrot.lane.b32.xlu1 %v10425_v47, %s9355_s28 }
 0x289   :  { %8717 = vrot.lane.b32.xlu0 %v10341_v50, %s9355_s28 }
 0x28a   :  { %8722 = vrot.lane.b32.xlu1 %v10453_v14, %s9355_s28 }
 0x28d   :  { %8727 = vrot.lane.b32.xlu0 %v10457_v59, %s9355_s28 }
 0x28e   :  { %8732 = vrot.lane.b32.xlu1 %v10355_v60, %s9355_s28 }
 0x291   :  { %8737 = vrot.lane.b32.xlu0 %v10485_v51, %s9355_s28 }
 0x292   :  { %8742 = vrot.lane.b32.xlu1 %v10489_v35, %s9355_s28 }
 0x295   :  { %8747 = vrot.lane.b32.xlu0 %v10363_v2, %s9355_s28 }
 0x296   :  { %8752 = vrot.lane.b32.xlu1 %v10391_v24, %s9356_s29 }
 0x299   :  { %8757 = vrot.lane.b32.xlu0 %v10395_v12, %s9356_s29 }
 0x29a   :  { %8762 = vrot.lane.b32.xlu1 %v10331_v42, %s9356_s29 }
 0x29d   :  { %8767 = vrot.lane.b32.xlu0 %v10421_v45, %s9356_s29 }
 0x29e   :  { %8772 = vrot.lane.b32.xlu1 %v10425_v47, %s9356_s29 }
 0x2a1   :  { %8777 = vrot.lane.b32.xlu0 %v10341_v50, %s9356_s29 }
 0x2a2   :  { %8782 = vrot.lane.b32.xlu1 %v10453_v14, %s9356_s29 }
 0x2a5   :  { %8787 = vrot.lane.b32.xlu0 %v10457_v59, %s9356_s29 }
 0x2a6   :  { %8792 = vrot.lane.b32.xlu1 %v10355_v60, %s9356_s29 }
 0x2a9   :  { %8797 = vrot.lane.b32.xlu0 %v10485_v51, %s9356_s29 }
 0x2aa   :  { %8802 = vrot.lane.b32.xlu1 %v10489_v35, %s9356_s29 }
 0x2ad   :  { %8807 = vrot.lane.b32.xlu0 %v10363_v2, %s9356_s29 }
 0x2ae   :  { %8812 = vrot.lane.b32.xlu1 %v10391_v24, %s9357_s30 }
 0x2b1   :  { %8817 = vrot.lane.b32.xlu0 %v10395_v12, %s9357_s30 }
 0x2b2   :  { %8822 = vrot.lane.b32.xlu1 %v10331_v42, %s9357_s30 }
 0x2b5   :  { %8827 = vrot.lane.b32.xlu0 %v10421_v45, %s9357_s30 }
 0x2b6   :  { %8832 = vrot.lane.b32.xlu1 %v10425_v47, %s9357_s30 }
 0x2b9   :  { %8837 = vrot.lane.b32.xlu0 %v10341_v50, %s9357_s30 }
 0x2ba   :  { %8842 = vrot.lane.b32.xlu1 %v10453_v14, %s9357_s30 }
 0x2bd   :  { %8847 = vrot.lane.b32.xlu0 %v10457_v59, %s9357_s30 }
 0x2be   :  { %8852 = vrot.lane.b32.xlu1 %v10355_v60, %s9357_s30 }
 0x2c1   :  { %8857 = vrot.lane.b32.xlu0 %v10485_v51, %s9357_s30 }
 0x2c2   :  { %8862 = vrot.lane.b32.xlu1 %v10489_v35, %s9357_s30 }
 0x2c5   :  { %8867 = vrot.lane.b32.xlu0 %v10363_v2, %s9357_s30 }
 0x2c6   :  { %8872 = vrot.lane.b32.xlu1 %v10395_v12, %s9358_s8 }
 0x2c9   :  { %8877 = vrot.lane.b32.xlu0 %v10331_v42, %s9358_s8 }
 0x2ca   :  { %8882 = vrot.lane.b32.xlu1 %v10391_v24, %s9358_s8 }
 0x2cd   :  { %8887 = vrot.lane.b32.xlu0 %v10425_v47, %s9358_s8 }
 0x2ce   :  { %8892 = vrot.lane.b32.xlu1 %v10341_v50, %s9358_s8 }
 0x2d1   :  { %8897 = vrot.lane.b32.xlu0 %v10421_v45, %s9358_s8 }
 0x2d2   :  { %8902 = vrot.lane.b32.xlu1 %v10457_v59, %s9358_s8 }
 0x2d3   :  { %v8648_v54 = vpop.permute.xlu1 %8647 }
 0x2d4   :  { %v8650_v9 = vunpack.i.h.bf16 %v8648_v54  ;;  %v8649_v37 = vunpack.i.l.bf16 %v8648_v54  ;;  %v10595_v63 = vpop.permute.xlu0 %8652 }
 0x2d5   :  { %v8655_v15 = vunpack.i.h.bf16 %v10595_v63  ;;  %v8654_v17 = vunpack.i.l.bf16 %v10595_v63  ;;  %8907 = vrot.lane.b32.xlu0 %v10355_v60, %s9358_s8 }
 0x2d6   :  { %v2895_v16 = vsel %vm85_vm1, %v8634_v56, %v8649_v37  ;;  %v2896_v23 = vsel %vm85_vm1, %v8635_v10, %v8650_v9  ;;  %8912 = vrot.lane.b32.xlu1 %v10453_v14, %s9358_s8 }
 0x2d7   :  { %v2887_v26 = vsel %vm85_vm1, %v8649_v37, %v8654_v17  ;;  %v2888_v54 = vsel %vm85_vm1, %v8650_v9, %v8655_v15  ;;  %v7883_v25 = vpack.c.bf16 %v2896_v23, %v2895_v16  ;;  %v8639_v37 = vunpack.i.l.bf16 %v10587_v52 }
 0x2d8   :  { %v7881_v0 = vpack.c.bf16 %v2888_v54, %v2887_v26 }
 0x2d9   :  { %8922 = vrot.lane.b32.xlu0 %v10489_v35, %s9358_s8 }
 0x2da   :  { %8917 = vrot.lane.b32.xlu1 %v10363_v2, %s9358_s8  ;;  %7882 = vmatprep.subr.bf16.mxu1 %v7881_v0 }
 0x2db   :  { %v8658_v6 = vpop.permute.xlu0 %8657  ;;  %7884 = vmatpush1.bf16.msra.mxu1 %v7883_v25 }
 0x2dc   :  { %v8660_v27 = vunpack.i.h.bf16 %v8658_v6  ;;  %v8659_v44 = vunpack.i.l.bf16 %v8658_v6  ;;  %v10625_v31 = vpop.permute.xlu1 %8662 }
 0x2dd   :  { %v12414_v9 = vunpack.i.h.bf16 %v10625_v31  ;;  %v12416_v26 = vunpack.i.l.bf16 %v10625_v31  ;;  %8927 = vrot.lane.b32.xlu0 %v10485_v51, %s9358_s8  ;;  %v12435_v63 = vunpack.i.l.bf16 %v10625_v31 }
 0x2de   :  { %v2898_v0 = vsel %vm85_vm1, %v12415_v5, %v8660_v27  ;;  %v2897_v25 = vsel %vm85_vm1, %v8639_v37, %v8659_v44  ;;  %8932 = vrot.lane.b32.xlu1 %v10395_v12, %s9359_s9 }
 0x2df   :  { %v2889_v6 = vsel %vm85_vm1, %v8659_v44, %v12416_v26  ;;  %v2890_v16 = vsel %vm85_vm1, %v8660_v27, %v12414_v9  ;;  %v7887_v54 = vpack.c.bf16 %v2898_v0, %v2897_v25  ;;  %v8644_v44 = vunpack.i.l.bf16 %v10585_v49 }
 0x2e0   :  { %v7885_v23 = vpack.c.bf16 %v2890_v16, %v2889_v6 }
 0x2e1   :  { %8937 = vrot.lane.b32.xlu0 %v10331_v42, %s9359_s9 }
 0x2e2   :  { %8942 = vrot.lane.b32.xlu1 %v10391_v24, %s9359_s9  ;;  %7886 = vmatprep.subr.bf16.mxu1 %v7885_v23 }
 0x2e3   :  { %v8668_v30 = vpop.permute.xlu1 %8667  ;;  %7888 = vmatpush1.bf16.msra.mxu1 %v7887_v54 }
 0x2e4   :  { %v8670_v57 = vunpack.i.h.bf16 %v8668_v30  ;;  %v8669_v38 = vunpack.i.l.bf16 %v8668_v30  ;;  %v8673_v36 = vpop.permute.xlu0 %8672 }
 0x2e5   :  { %v8675_v7 = vunpack.i.h.bf16 %v8673_v36  ;;  %v8674_v27 = vunpack.i.l.bf16 %v8673_v36  ;;  %8947 = vrot.lane.b32.xlu0 %v10425_v47, %s9359_s9 }
 0x2e6   :  { %v2899_v0 = vsel %vm85_vm1, %v8644_v44, %v8669_v38  ;;  %v2900_v25 = vsel %vm85_vm1, %v8645_v58, %v8670_v57  ;;  %8952 = vrot.lane.b32.xlu1 %v10341_v50, %s9359_s9 }
 0x2e7   :  { %v2891_v49 = vsel %vm85_vm1, %v8669_v38, %v8674_v27  ;;  %v2892_v30 = vsel %vm85_vm1, %v8670_v57, %v8675_v7  ;;  %v7891_v36 = vpack.c.bf16 %v2900_v25, %v2899_v0 }
 0x2e8   :  { %v7889_v6 = vpack.c.bf16 %v2892_v30, %v2891_v49 }
 0x2e9   :  { %8957 = vrot.lane.b32.xlu0 %v10421_v45, %s9359_s9 }
 0x2ea   :  { %8962 = vrot.lane.b32.xlu1 %v10457_v59, %s9359_s9  ;;  %7890 = vmatprep.subr.bf16.mxu1 %v7889_v6 }
 0x2eb   :  { %v8678_v16 = vpop.permute.xlu0 %8677  ;;  %7892 = vmatpush1.bf16.msra.mxu1 %v7891_v36  ;;  %v2880_v36 = vsel %vm85_vm1, %v8655_v15, %v8635_v10  ;;  %v10710_v10 = vld [vmem:[%s12404_s3 + $0x20] sm:$0xff]  ;;  %v2881_v15 = vsel %vm85_vm1, %v12435_v63, %v8639_v37  ;;  %v10741_v37 = vld [vmem:[%s12404_s3 + $0x28] sm:$0xff]  ;;  %v10763_v63 = vld [vmem:[%s12404_s3 + $0x30] sm:$0xff] }
 0x2ec   :  { %v8680_v23 = vunpack.i.h.bf16 %v8678_v16  ;;  %v8679_v54 = vunpack.i.l.bf16 %v8678_v16  ;;  %v8683_v9 = vpop.permute.xlu1 %8682 }
 0x2ed   :  { %v8685_v5 = vunpack.i.h.bf16 %v8683_v9  ;;  %v8684_v26 = vunpack.i.l.bf16 %v8683_v9  ;;  %8967 = vrot.lane.b32.xlu0 %v10355_v60, %s9359_s9  ;;  %v2879_v9 = vsel %vm85_vm1, %v8654_v17, %v8634_v56 }
 0x2ee   :  { %8972 = vrot.lane.b32.xlu1 %v10453_v14, %s9359_s9  ;;  %v7897_v48 = vpack.c.bf16 %v2880_v36, %v2879_v9 }
 0x2ef   :  { %v8688_v38 = vpop.permute.xlu0 %8687  ;;  %v2893_v57 = vsel %vm85_vm1, %v8679_v54, %v8684_v26  ;;  %v2894_v0 = vsel %vm85_vm1, %v8680_v23, %v8685_v5 }
 0x2f0   :  { %v8690_v25 = vunpack.i.h.bf16 %v8688_v38  ;;  %v8689_v49 = vunpack.i.l.bf16 %v8688_v38  ;;  %v10679_v30 = vpop.permute.xlu1 %8692  ;;  %v7893_v6 = vpack.c.bf16 %v2894_v0, %v2893_v57 }
 0x2f1   :  { %8982 = vrot.lane.b32.xlu0 %v10489_v35, %s9359_s9 }
 0x2f2   :  { %v2901_v16 = vsel %vm85_vm1, %v8689_v49, %v8679_v54  ;;  %v2902_v38 = vsel %vm85_vm1, %v8690_v25, %v8680_v23  ;;  %8977 = vrot.lane.b32.xlu1 %v10363_v2, %s9359_s9  ;;  %7894 = vmatprep.subr.bf16.mxu1 %v7893_v6  ;;  %v12436_v23 = vunpack.i.h.bf16 %v10587_v52  ;;  %v12437_v54 = vunpack.i.h.bf16 %v10625_v31 }
 0x2f3   :  { %v10701_v57 = vpop.permute.xlu0 %8697  ;;  %v7895_v56 = vpack.c.bf16 %v2902_v38, %v2901_v16  ;;  %v2883_v52 = vsel %vm85_vm1, %v8674_v27, %v8644_v44  ;;  %v2884_v31 = vsel %vm85_vm1, %v8675_v7, %v8645_v58  ;;  %v12438_v38 = vmov 0.0  }
 0x2f4   :  { %v10703_v17 = vpop.permute.xlu1 %8702  ;;  %v2882_v0 = vsel %vm85_vm1, %v12437_v54, %v12436_v23  ;;  %v7905_v44 = vpack.c.bf16 %v2884_v31, %v2883_v52  ;;  %v12417_v7 = vunpack.i.h.bf16 %v10701_v57  ;;  %v12418_v58 = vunpack.i.l.bf16 %v10701_v57 }
 0x2f5   :  { %8987 = vrot.lane.b32.xlu0 %v10485_v51, %s9359_s9  ;;  %7896 = vmatpush1.bf16.msra.mxu1 %v7895_v56  ;;  %v7901_v36 = vpack.c.bf16 %v2882_v0, %v2881_v15  ;;  %v2885_v56 = vsel %vm85_vm1, %v8684_v26, %v8689_v49  ;;  %v8695_v15 = vunpack.i.h.bf16 %v10679_v30  ;;  %v8694_v23 = vunpack.i.l.bf16 %v10679_v30 }
 0x2f6   :  { %8992 = vrot.lane.b32.xlu1 %v10395_v12, %s9360_s10  ;;  %7898 = vmatprep.subr.bf16.mxu1 %v7897_v48  ;;  %v12419_v54 = vunpack.i.l.bf16 %v10703_v17 }
 0x2f7   :  { %v10726_v6 = vpop.permute.xlu0 %8707  ;;  %v2810_v31 = vsel %vm66_vm3, %v8694_v23, %v12418_v58 }
 0x2f8   :  { %v10728_v9 = vpop.permute.xlu1 %8712  ;;  %7098 = vmatmul.mubr.msk.f32.vlgmr.msra.gmra.mrb[8].mxu1 %vm2903_vm10, %v10710_v10  ;;  %v8709_v26 = vunpack.i.l.bf16 %v10726_v6 }
 0x2f9   :  { %8997 = vrot.lane.b32.xlu0 %v10331_v42, %s9360_s10  ;;  %7900 = vmatpush3.bf16.msra.mxu1 %v7897_v48  ;;  %v2886_v48 = vsel %vm85_vm1, %v8685_v5, %v8690_v25  ;;  %v12426_v5 = vunpack.i.h.bf16 %v10703_v17  ;;  %v2811_v25 = vsel %vm66_vm3, %v8695_v15, %v12417_v7  ;;  %v12439_v30 = vunpack.i.l.bf16 %v10728_v9 }
 0x2fa   :  { %9002 = vrot.lane.b32.xlu1 %v10391_v24, %s9360_s10  ;;  %7902 = vmatprep.subr.bf16.mxu1 %v7901_v36  ;;  %v7909_v0 = vpack.c.bf16 %v2886_v48, %v2885_v56  ;;  %v2818_v56 = vsel %vm66_vm3, %v12419_v54, %v8694_v23  ;;  %v7913_v58 = vpack.c.bf16 %v2811_v25, %v2810_v31 }
 0x2fb   :  { %v10745_v16 = vpop.permute.xlu0 %8717  ;;  %2986 = vmatprep.mubr.f32.mxu1 %v12438_v38  ;;  %v2819_v48 = vsel %vm66_vm3, %v12426_v5, %v8695_v15  ;;  %v2812_v23 = vsel %vm66_vm3, %v8709_v26, %v12439_v30  ;;  %v12440_v15 = vunpack.i.h.bf16 %v10728_v9 }
 0x2fc   :  { %v10750_v27 = vpop.permute.xlu1 %8722  ;;  %7099 = vmatmul.mubr.msk.f32.gmra.mrb[10].mxu1 %vm2903_vm10, %v10741_v37  ;;  %v12430_v54 = vunpack.i.h.bf16 %v10745_v16 }
 0x2fd   :  { %9007 = vrot.lane.b32.xlu0 %v10425_v47, %s9360_s10  ;;  %7904 = vmatpush3.bf16.msra.mxu1 %v7901_v36  ;;  %v8710_v36 = vunpack.i.h.bf16 %v10726_v6  ;;  %v7097_v6 = vld [vmem:[%s12404_s3 + $0x38] sm:$0xff]  ;;  %v8725_v30 = vunpack.i.h.bf16 %v10750_v27  ;;  %v8724_v31 = vunpack.i.l.bf16 %v10750_v27 }
 0x2fe   :  { %9012 = vrot.lane.b32.xlu1 %v10341_v50, %s9360_s10  ;;  %7906 = vmatprep.subr.bf16.mxu1 %v7905_v44 }
 0x2ff   :  { %v10773_v49 = vpop.permute.xlu0 %8727  ;;  %2992 = vmatprep.mubr.f32.mxu1 %v12438_v38  ;;  %v2813_v25 = vsel %vm66_vm3, %v8710_v36, %v12440_v15  ;;  %v2821_v27 = vsel %vm66_vm3, %v12430_v54, %v8710_v36 }
 0x300   :  { %v10778_v52 = vpop.permute.xlu1 %8732  ;;  %7100 = vmatmul.mubr.msk.f32.gmra.mrb[12].mxu1 %vm2903_vm10, %v10763_v63  ;;  %v7917_v28 = vpack.c.bf16 %v2813_v25, %v2812_v23 }
 0x301   :  { %9017 = vrot.lane.b32.xlu0 %v10421_v45, %s9360_s10  ;;  %7908 = vmatpush3.bf16.msra.mxu1 %v7905_v44  ;;  %v12429_v44 = vunpack.i.l.bf16 %v10745_v16  ;;  %v8734_v4 = vunpack.i.l.bf16 %v10778_v52 }
 0x302   :  { %9022 = vrot.lane.b32.xlu1 %v10457_v59, %s9360_s10  ;;  %7910 = vmatprep.subr.bf16.mxu1 %v7909_v0 }
 0x303   :  { %v8738_v7 = vpop.permute.xlu0 %8737  ;;  %2998 = vmatprep.mubr.f32.mxu1 %v12438_v38  ;;  %v2820_v5 = vsel %vm66_vm3, %v12429_v44, %v8709_v26  ;;  %v12441_v26 = vunpack.i.l.bf16 %v10773_v49 }
 0x304   :  { %v10814_v21 = vpop.permute.xlu1 %8742  ;;  %7101 = vmatmul.mubr.msk.f32.gmra.mrb[14].mxu1 %vm2903_vm10, %v7097_v6  ;;  %v8739_v23 = vunpack.i.l.bf16 %v8738_v7 }
 0x305   :  { %9027 = vrot.lane.b32.xlu0 %v10355_v60, %s9360_s10  ;;  %7912 = vmatpush3.bf16.msra.mxu1 %v7909_v0  ;;  %v7915_v0 = vpack.c.bf16 %v2819_v48, %v2818_v56  ;;  %v2814_v44 = vsel %vm66_vm3, %v8724_v31, %v12441_v26  ;;  %v8740_v48 = vunpack.i.h.bf16 %v8738_v7  ;;  %v7919_v26 = vpack.c.bf16 %v2821_v27, %v2820_v5 }
 0x306   :  { %9032 = vrot.lane.b32.xlu1 %v10453_v14, %s9360_s10  ;;  %7914 = vmatprep.subr.bf16.mxu1 %v7913_v58  ;;  %v8735_v58 = vunpack.i.h.bf16 %v10778_v52  ;;  %v8744_v52 = vunpack.i.l.bf16 %v10814_v21 }
 0x307   :  { %v10832_v15 = vpop.permute.xlu0 %8747  ;;  %7600 = vmatprep.mubr.msk.f32.mxu1 %vm2903_vm10, %v10710_v10  ;;  %v12442_v10 = vunpack.i.h.bf16 %v10773_v49 }
 0x308   :  { %v10841_v20 = vpop.permute.xlu1 %8752  ;;  %7601 = vmatmul.mubr.msk.f32.vlgmr.msra.gmra.mrb[16].mxu1 %vm2903_vm10, %v10741_v37  ;;  %v2822_v37 = vsel %vm66_vm3, %v8734_v4, %v8724_v31  ;;  %v2823_v7 = vsel %vm66_vm3, %v8735_v58, %v8725_v30 }
 0x309   :  { %v2815_v56 = vsel %vm66_vm3, %v8725_v30, %v12442_v10  ;;  %9042 = vrot.lane.b32.xlu0 %v10489_v35, %s9360_s10  ;;  %7916 = vmatpush1.bf16.msra.mxu1 %v7915_v0  ;;  %v8750_v10 = vunpack.i.h.bf16 %v10832_v15  ;;  %v8749_v0 = vunpack.i.l.bf16 %v10832_v15 }
 0x30a   :  { %9037 = vrot.lane.b32.xlu1 %v10363_v2, %s9360_s10  ;;  %7918 = vmatprep.subr.bf16.mxu1 %v7917_v28  ;;  %v7921_v36 = vpack.c.bf16 %v2815_v56, %v2814_v44  ;;  %v2816_v28 = vsel %vm66_vm3, %v8739_v23, %v8744_v52  ;;  %v7923_v44 = vpack.c.bf16 %v2823_v7, %v2822_v37  ;;  %v12445_v56 = vunpack.i.l.bf16 %v10701_v57 }
 0x30b   :  { %v10861_v25 = vpop.permute.xlu0 %8757  ;;  %7603 = vmatprep.mubr.msk.f32.mxu1 %vm2903_vm10, %v10763_v63  ;;  %v12443_v63 = vunpack.i.h.bf16 %v10814_v21  ;;  %v2825_v31 = vsel %vm66_vm3, %v8750_v10, %v8740_v48  ;;  %v12446_v37 = vunpack.i.h.bf16 %v10703_v17 }
 0x30c   :  { %v10869_v54 = vpop.permute.xlu1 %8762  ;;  %7604 = vmatmul.mubr.msk.f32.gmra.mrb[18].mxu1 %vm2903_vm10, %v7097_v6  ;;  %v2824_v6 = vsel %vm66_vm3, %v8749_v0, %v8739_v23  ;;  %v12447_v23 = vunpack.i.h.bf16 %v10701_v57  ;;  %v12448_v57 = vunpack.i.l.bf16 %v10745_v16 }
 0x30d   :  { %9047 = vrot.lane.b32.xlu0 %v10485_v51, %s9360_s10  ;;  %7920 = vmatpush1.bf16.msra.mxu1 %v7919_v26  ;;  %v2817_v5 = vsel %vm66_vm3, %v8740_v48, %v12443_v63  ;;  %v7927_v26 = vpack.c.bf16 %v2825_v31, %v2824_v6  ;;  %v12450_v63 = vunpack.i.h.bf16 %v10745_v16  ;;  %v12452_v31 = vunpack.i.l.bf16 %v10773_v49 }
 0x30e   :  { %9052 = vrot.lane.b32.xlu1 %v10395_v12, %s9361_s11  ;;  %7922 = vmatprep.subr.bf16.mxu1 %v7921_v36  ;;  %v7925_v27 = vpack.c.bf16 %v2817_v5, %v2816_v28  ;;  %v12444_v12 = vunpack.i.l.bf16 %v10703_v17  ;;  %v2803_v48 = vsel %vm66_vm3, %v12447_v23, %v12446_v37  ;;  %v10914_v17 = vld [vmem:[%s12404_s3] sm:$0xff]  ;;  %v12449_v28 = vunpack.i.l.bf16 %v10728_v9  ;;  %v10971_v37 = vld [vmem:[%s12404_s3 + $0x10] sm:$0xff] }
 0x30f   :  { %v10882_v30 = vpop.permute.xlu0 %8767  ;;  %3166 = vmatprep.mubr.f32.mxu1 %v12438_v38  ;;  %v12451_v5 = vunpack.i.h.bf16 %v10728_v9  ;;  %v2806_v16 = vsel %vm66_vm3, %v12452_v31, %v8734_v4  ;;  %v12453_v9 = vunpack.i.h.bf16 %v10773_v49  ;;  %v8760_v49 = vunpack.i.h.bf16 %v10861_v25 }
 0x310   :  { %v10889_v15 = vpop.permute.xlu1 %8772  ;;  %v2802_v36 = vsel %vm66_vm3, %v12445_v56, %v12444_v12  ;;  %v8755_v23 = vunpack.i.h.bf16 %v10841_v20 }
 0x311   :  { %9057 = vrot.lane.b32.xlu0 %v10331_v42, %s9361_s11  ;;  %7924 = vmatpush1.bf16.msra.mxu1 %v7923_v44  ;;  %v7929_v7 = vpack.c.bf16 %v2803_v48, %v2802_v36  ;;  %v12454_v36 = vunpack.i.h.bf16 %v10814_v21  ;;  %v8754_v48 = vunpack.i.l.bf16 %v10841_v20  ;;  %v8765_v21 = vunpack.i.h.bf16 %v10869_v54 }
 0x312   :  { %9062 = vrot.lane.b32.xlu1 %v10391_v24, %s9361_s11  ;;  %7926 = vmatprep.subr.bf16.mxu1 %v7925_v27  ;;  %v2804_v24 = vsel %vm66_vm3, %v12449_v28, %v12448_v57  ;;  %v2807_v27 = vsel %vm66_vm3, %v12453_v9, %v8735_v58  ;;  %v8759_v58 = vunpack.i.l.bf16 %v10861_v25  ;;  %v8775_v20 = vunpack.i.h.bf16 %v10889_v15 }
 0x313   :  { %v10907_v42 = vpop.permute.xlu0 %8777  ;;  %v7937_v4 = vpack.c.bf16 %v2807_v27, %v2806_v16  ;;  %v3338_v57 = vsel %vm608_vm4, %v8755_v23, %v8760_v49 }
 0x314   :  { %v10928_v44 = vpop.permute.xlu1 %8782 }
 0x315   :  { %9067 = vrot.lane.b32.xlu0 %v10425_v47, %s9361_s11  ;;  %7928 = vmatpush1.bf16.msra.mxu1 %v7927_v26  ;;  %v2805_v47 = vsel %vm66_vm3, %v12451_v5, %v12450_v63  ;;  %v8779_v63 = vunpack.i.l.bf16 %v10907_v42  ;;  %v5129_v5 = vld [vmem:[%s12405_s4] sm:$0xff] }
 0x316   :  { %9072 = vrot.lane.b32.xlu1 %v10341_v50, %s9361_s11  ;;  %7930 = vmatprep.subr.bf16.mxu1 %v7929_v7  ;;  %v7933_v6 = vpack.c.bf16 %v2805_v47, %v2804_v24  ;;  %v10949_v50 = vld [vmem:[%s12404_s3 + $0x8] sm:$0xff] }
 0x317   :  { %v10942_v12 = vpop.permute.xlu0 %8787 }
 0x318   :  { %7106 = vmatmul.mubr.msk.f32.vlgmr.msra.gmra.mrb[8].mxu1 %vm2903_vm10, %v10914_v17  ;;  %v10956_v56 = vpop.permute.xlu1 %8792  ;;  %v8790_v31 = vunpack.i.h.bf16 %v10942_v12  ;;  %v8789_v16 = vunpack.i.l.bf16 %v10942_v12 }
 0x319   :  { %9077 = vrot.lane.b32.xlu0 %v10421_v45, %s9361_s11  ;;  %7932 = vmatpush3.bf16.msra.mxu1 %v7929_v7  ;;  %v2808_v45 = vsel %vm66_vm3, %v8744_v52, %v8749_v0  ;;  %v8764_v52 = vunpack.i.l.bf16 %v10869_v54  ;;  %v8770_v7 = vunpack.i.h.bf16 %v10882_v30 }
 0x31a   :  { %9082 = vrot.lane.b32.xlu1 %v10457_v59, %s9361_s11  ;;  %7934 = vmatprep.subr.bf16.mxu1 %v7933_v6  ;;  %v2809_v59 = vsel %vm66_vm3, %v12454_v36, %v8750_v10  ;;  %v8774_v10 = vunpack.i.l.bf16 %v10889_v15  ;;  %v5130_v36 = vld [vmem:[%s12405_s4 + $0x8] sm:$0xff] }
 0x31b   :  { %3172 = vmatprep.mubr.f32.mxu1 %v12438_v38  ;;  %v10981_v0 = vpop.permute.xlu0 %8797  ;;  %v7941_v26 = vpack.c.bf16 %v2809_v59, %v2808_v45  ;;  %v3345_v28 = vsel %vm608_vm4, %v8764_v52, %v8754_v48  ;;  %v3340_v9 = vsel %vm608_vm4, %v8770_v7, %v8775_v20  ;;  %v8784_v45 = vunpack.i.l.bf16 %v10928_v44  ;;  %v7115_v15 = vld [vmem:[%s12404_s3 + $0x48] sm:$0xff] }
 0x31c   :  { %7107 = vmatmul.mubr.msk.f32.gmra.mrb[10].mxu1 %vm2903_vm10, %v10949_v50  ;;  %v11005_v24 = vpop.permute.xlu1 %8802  ;;  %v3331_v54 = vsel %vm608_vm4, %v8774_v10, %v8779_v63 }
 0x31d   :  { %9087 = vrot.lane.b32.xlu0 %v10355_v60, %s9361_s11  ;;  %7936 = vmatpush3.bf16.msra.mxu1 %v7933_v6  ;;  %v8769_v60 = vunpack.i.l.bf16 %v10882_v30  ;;  %v2753_v30 = vld [vmem:[%s12404_s3 + $0x18] sm:$0xff]  ;;  %v8780_v6 = vunpack.i.h.bf16 %v10907_v42 }
 0x31e   :  { %9092 = vrot.lane.b32.xlu1 %v10453_v14, %s9361_s11  ;;  %7938 = vmatprep.subr.bf16.mxu1 %v7937_v4  ;;  %v3337_v14 = vsel %vm608_vm4, %v8754_v48, %v8759_v58 }
 0x31f   :  { %3178 = vmatprep.mubr.f32.mxu1 %v12438_v38  ;;  %v7945_v47 = vpack.c.bf16 %v3338_v57, %v3337_v14  ;;  %v11030_v27 = vpop.permute.xlu0 %8807  ;;  %v3347_v59 = vsel %vm608_vm4, %v8779_v63, %v8769_v60  ;;  %v8795_v14 = vunpack.i.h.bf16 %v10956_v56  ;;  %v3332_v25 = vsel %vm608_vm4, %v8775_v20, %v8780_v6 }
 0x320   :  { %7108 = vmatmul.mubr.msk.f32.gmra.mrb[12].mxu1 %vm2903_vm10, %v10971_v37  ;;  %v11054_v57 = vpop.permute.xlu1 %8812 }
 0x321   :  { %9102 = vrot.lane.b32.xlu0 %v10489_v35, %s9361_s11  ;;  %7940 = vmatpush3.bf16.msra.mxu1 %v7937_v4  ;;  %v3346_v35 = vsel %vm608_vm4, %v8765_v21, %v8755_v23  ;;  %v8785_v4 = vunpack.i.h.bf16 %v10928_v44  ;;  %v8794_v23 = vunpack.i.l.bf16 %v10956_v56  ;;  %v5131_v44 = vld [vmem:[%s12405_s4 + $0x10] sm:$0xff]  ;;  %v8805_v56 = vunpack.i.h.bf16 %v11005_v24 }
 0x322   :  { %9097 = vrot.lane.b32.xlu1 %v10363_v2, %s9361_s11  ;;  %7942 = vmatprep.subr.bf16.mxu1 %v7941_v26  ;;  %v3339_v2 = vsel %vm608_vm4, %v8769_v60, %v8774_v10  ;;  %v3334_v42 = vsel %vm608_vm4, %v8790_v31, %v8795_v14 }
 0x323   :  { %3184 = vmatprep.mubr.f32.mxu1 %v12438_v38  ;;  %v7949_v48 = vpack.c.bf16 %v3340_v9, %v3339_v2  ;;  %v3342_v60 = vsel %vm608_vm4, %v8785_v4, %v8790_v31  ;;  %v8809_v9 = vunpack.i.l.bf16 %v11030_v27 }
 0x324   :  { %7109 = vmatmul.mubr.msk.f32.gmra.mrb[14].mxu1 %vm2903_vm10, %v2753_v30 }
 0x325   :  { %9107 = vrot.lane.b32.xlu0 %v10485_v51, %s9361_s11  ;;  %7944 = vmatpush3.bf16.msra.mxu1 %v7941_v26  ;;  %v7947_v51 = vpack.c.bf16 %v3346_v35, %v3345_v28  ;;  %v3348_v26 = vsel %vm608_vm4, %v8780_v6, %v8770_v7  ;;  %v8800_v28 = vunpack.i.h.bf16 %v10981_v0  ;;  %v8799_v7 = vunpack.i.l.bf16 %v10981_v0 }
 0x326   :  { %5135 = vperm.xlu1 %8630, %v5129_v5   ;;  %7946 = vmatprep.subr.bf16.mxu1 %v7945_v47  ;;  %v8804_v35 = vunpack.i.l.bf16 %v11005_v24  ;;  %v3349_v5 = vsel %vm608_vm4, %v8794_v23, %v8784_v45  ;;  %v11075_v47 = vpop.permute.xlu0 %8817  ;;  %v7951_v2 = vpack.c.bf16 %v3348_v26, %v3347_v59  ;;  %v3350_v0 = vsel %vm608_vm4, %v8795_v14, %v8785_v4 }
 0x327   :  { %7622 = vmatprep.mubr.msk.f32.mxu1 %vm2903_vm10, %v10914_v17  ;;  %v3341_v17 = vsel %vm608_vm4, %v8784_v45, %v8789_v16  ;;  %v8810_v24 = vunpack.i.h.bf16 %v11030_v27  ;;  %v3344_v59 = vsel %vm608_vm4, %v8800_v28, %v8805_v56  ;;  %v3351_v27 = vsel %vm608_vm4, %v8809_v9, %v8799_v7 }
 0x328   :  { %7623 = vmatmul.mubr.msk.f32.vlgmr.msra.gmra.mrb[16].mxu1 %vm2903_vm10, %v10949_v50  ;;  %v5132_v50 = vld [vmem:[%s12405_s4 + $0x18] sm:$0xff]  ;;  %v3343_v45 = vsel %vm608_vm4, %v8799_v7, %v8804_v35  ;;  %v3330_v26 = vsel %vm608_vm4, %v8760_v49, %v8765_v21  ;;  %v7114_v7 = vld [vmem:[%s12404_s3 + $0x40] sm:$0xff]  ;;  %v8820_v20 = vunpack.i.h.bf16 %v11075_v47  ;;  %v8819_v63 = vunpack.i.l.bf16 %v11075_v47 }
 0x329   :  { %5140 = vperm.xlu0 %8629, %v5130_v36   ;;  %7948 = vmatpush1.bf16.msra.mxu1 %v7947_v51  ;;  %v7953_v36 = vpack.c.bf16 %v3342_v60, %v3341_v17  ;;  %v11088_v51 = vpop.permute.xlu1 %8822  ;;  %v7957_v4 = vpack.c.bf16 %v3344_v59, %v3343_v45  ;;  %v3335_v12 = vsel %vm608_vm4, %v8804_v35, %v8809_v9  ;;  %v8814_v14 = vunpack.i.l.bf16 %v11054_v57  ;;  %v7117_v45 = vld [vmem:[%s12404_s3 + $0x58] sm:$0xff] }
 0x32a   :  { %5145 = vperm.xlu1 %8630, %v5131_v44   ;;  %7950 = vmatprep.subr.bf16.mxu1 %v7949_v48  ;;  %v11095_v44 = vpop.permute.xlu0 %8827  ;;  %v3329_v48 = vsel %vm608_vm4, %v8759_v58, %v8764_v52  ;;  %v7965_v58 = vpack.c.bf16 %v3332_v25, %v3331_v54  ;;  %v3333_v52 = vsel %vm608_vm4, %v8789_v16, %v8794_v23  ;;  %v7116_v16 = vld [vmem:[%s12404_s3 + $0x50] sm:$0xff]  ;;  %v8815_v23 = vunpack.i.h.bf16 %v11054_v57 }
 0x32b   :  { %7625 = vmatprep.mubr.msk.f32.mxu1 %vm2903_vm10, %v10971_v37  ;;  %v7955_v37 = vpack.c.bf16 %v3350_v0, %v3349_v5  ;;  %v7969_v10 = vpack.c.bf16 %v3334_v42, %v3333_v52  ;;  %v3336_v6 = vsel %vm608_vm4, %v8805_v56, %v8810_v24  ;;  %v8825_v35 = vunpack.i.h.bf16 %v11088_v51 }
 0x32c   :  { %7626 = vmatmul.mubr.msk.f32.gmra.mrb[18].mxu1 %vm2903_vm10, %v2753_v30  ;;  %v3352_v30 = vsel %vm608_vm4, %v8810_v24, %v8800_v28  ;;  %v7961_v28 = vpack.c.bf16 %v3330_v26, %v3329_v48  ;;  %v8829_v56 = vunpack.i.l.bf16 %v11095_v44  ;;  %v8830_v0 = vunpack.i.h.bf16 %v11095_v44 }
 0x32d   :  { %5150 = vperm.xlu0 %8629, %v5132_v50   ;;  %7952 = vmatpush1.bf16.msra.mxu1 %v7951_v2  ;;  %v7959_v17 = vpack.c.bf16 %v3352_v30, %v3351_v27  ;;  %v11109_v60 = vpop.permute.xlu1 %8832  ;;  %v8824_v50 = vunpack.i.l.bf16 %v11088_v51  ;;  %v7973_v2 = vpack.c.bf16 %v3336_v6, %v3335_v12  ;;  %v3612_v57 = vsel %vm902_vm5, %v8814_v14, %v8819_v63 }
 0x32e   :  { %7954 = vmatprep.subr.bf16.mxu1 %v7953_v36  ;;  %3429 = vmatprep.mubr.f32.mxu1 %v12438_v38  ;;  %v11126_v49 = vpop.permute.xlu0 %8837  ;;  %v8834_v5 = vunpack.i.l.bf16 %v11109_v60  ;;  %v8835_v24 = vunpack.i.h.bf16 %v11109_v60  ;;  %v3613_v36 = vsel %vm902_vm5, %v8815_v23, %v8820_v20 }
 0x32f   :  { %v3620_v59 = vsel %vm902_vm5, %v8824_v50, %v8814_v14  ;;  %v8839_v27 = vunpack.i.l.bf16 %v11126_v49  ;;  %v8840_v48 = vunpack.i.h.bf16 %v11126_v49 }
 0x330   :  { %v3614_v44 = vsel %vm902_vm5, %v8829_v56, %v8834_v5 }
 0x331   :  { %7956 = vmatpush1.bf16.msra.mxu1 %v7955_v37  ;;  %v11141_v21 = vpop.permute.xlu1 %8842  ;;  %v3621_v37 = vsel %vm902_vm5, %v8825_v35, %v8815_v23  ;;  %v3622_v49 = vsel %vm902_vm5, %v8839_v27, %v8829_v56  ;;  %v3623_v12 = vsel %vm902_vm5, %v8840_v48, %v8830_v0  ;;  %v3607_v47 = vsel %vm902_vm5, %v8835_v24, %v8840_v48 }
 0x332   :  { %7958 = vmatprep.subr.bf16.mxu1 %v7957_v4  ;;  %v11150_v31 = vpop.permute.xlu0 %8847  ;;  %v7977_v4 = vpack.c.bf16 %v3613_v36, %v3612_v57  ;;  %v8845_v54 = vunpack.i.h.bf16 %v11141_v21  ;;  %v8844_v25 = vunpack.i.l.bf16 %v11141_v21  ;;  %v7979_v42 = vpack.c.bf16 %v3621_v37, %v3620_v59 }
 0x333   :  { %v8850_v26 = vunpack.i.h.bf16 %v11150_v31 }
 0x335   :  { %7960 = vmatpush1.bf16.msra.mxu1 %v7959_v17  ;;  %v11164_v9 = vpop.permute.xlu1 %8852  ;;  %v8849_v17 = vunpack.i.l.bf16 %v11150_v31  ;;  %v3617_v21 = vsel %vm902_vm5, %v8845_v54, %v8850_v26 }
 0x336   :  { %7962 = vmatprep.subr.bf16.mxu1 %v7961_v28  ;;  %v8858_v30 = vpop.permute.xlu0 %8857  ;;  %v8854_v52 = vunpack.i.l.bf16 %v11164_v9  ;;  %v8855_v6 = vunpack.i.h.bf16 %v11164_v9 }
 0x337   :  { %v8860_v31 = vunpack.i.h.bf16 %v8858_v30  ;;  %v8859_v23 = vunpack.i.l.bf16 %v8858_v30 }
 0x338   :  { %7118 = vmatmul.mubr.msk.f32.vlgmr.msra.gmra.mrb[8].mxu1 %vm2903_vm10, %v7114_v7  ;;  %v3625_v9 = vsel %vm902_vm5, %v8855_v6, %v8845_v54  ;;  %v3605_v54 = vsel %vm902_vm5, %v8820_v20, %v8825_v35  ;;  %v7127_v20 = vld [vmem:[%s12404_s3 + $0x68] sm:$0xff]  ;;  %v3609_v60 = vsel %vm902_vm5, %v8850_v26, %v8855_v6 }
 0x339   :  { %7964 = vmatpush3.bf16.msra.mxu1 %v7961_v28  ;;  %3435 = vmatprep.mubr.f32.mxu1 %v12438_v38  ;;  %v3615_v28 = vsel %vm902_vm5, %v8830_v0, %v8835_v24  ;;  %v7983_v0 = vpack.c.bf16 %v3623_v12, %v3622_v49  ;;  %v7126_v49 = vld [vmem:[%s12404_s3 + $0x60] sm:$0xff]  ;;  %v7128_v24 = vld [vmem:[%s12404_s3 + $0x70] sm:$0xff]  ;;  %v12455_v12 = vpack.c.bf16 %v10387_v18, %v10384_v11 }
 0x33a   :  { %7966 = vmatprep.subr.bf16.mxu1 %v7965_v58  ;;  %v12458_v11 = vpack.c.bf16 %v10411_v29, %v10408_v39  ;;  %v12462_v29 = vpack.c.bf16 %v10475_v53, %v10472_v32 }
 0x33c   :  { %7119 = vmatmul.mubr.msk.f32.gmra.mrb[10].mxu1 %vm2903_vm10, %v7115_v15 }
 0x33d   :  { %7968 = vmatpush3.bf16.msra.mxu1 %v7965_v58  ;;  %3441 = vmatprep.mubr.f32.mxu1 %v12438_v38  ;;  %v11203_v58 = vpop.permute.xlu1 %8862 }
 0x33e   :  { %7970 = vmatprep.subr.bf16.mxu1 %v7969_v10  ;;  %v8865_v14 = vunpack.i.h.bf16 %v11203_v58  ;;  %v8864_v56 = vunpack.i.l.bf16 %v11203_v58 }
 0x340   :  { %7120 = vmatmul.mubr.msk.f32.gmra.mrb[12].mxu1 %vm2903_vm10, %v7116_v16  ;;  %v3618_v37 = vsel %vm902_vm5, %v8859_v23, %v8864_v56 }
 0x341   :  { %7972 = vmatpush3.bf16.msra.mxu1 %v7969_v10  ;;  %3447 = vmatprep.mubr.f32.mxu1 %v12438_v38  ;;  %v7981_v10 = vpack.c.bf16 %v3615_v28, %v3614_v44  ;;  %v11265_v35 = vpop.permute.xlu1 %8872 }
 0x342   :  { %7974 = vmatprep.subr.bf16.mxu1 %v7973_v2 }
 0x344   :  { %7121 = vmatmul.mubr.msk.f32.gmra.mrb[14].mxu1 %vm2903_vm10, %v7117_v45 }
 0x345   :  { %7976 = vmatpush3.bf16.msra.mxu1 %v7973_v2  ;;  %7644 = vmatprep.mubr.msk.f32.mxu1 %vm2903_vm10, %v7114_v7  ;;  %v3616_v7 = vsel %vm902_vm5, %v8844_v25, %v8849_v17  ;;  %v8868_v2 = vpop.permute.xlu0 %8867 }
 0x346   :  { %7978 = vmatprep.subr.bf16.mxu1 %v7977_v4  ;;  %v8870_v57 = vunpack.i.h.bf16 %v8868_v2  ;;  %v8869_v36 = vunpack.i.l.bf16 %v8868_v2  ;;  %v7985_v59 = vpack.c.bf16 %v3617_v21, %v3616_v7  ;;  %v12456_v7 = vpack.c.bf16 %v10381_v22, %v10378_v19 }
 0x347   :  { %v12457_v21 = vpack.c.bf16 %v10417_v43, %v10414_v41  ;;  %v12459_v19 = vpack.c.bf16 %v10449_v8, %v10446_v62  ;;  %v12460_v41 = vpack.c.bf16 %v10443_v40, %v10440_v61  ;;  %v12461_v43 = vpack.c.bf16 %v10481_v34, %v10478_v33  ;;  %v7138_v62 = vld [vmem:[%s12404_s3 + $0x80] sm:$0xff]  ;;  %v7139_v61 = vld [vmem:[%s12404_s3 + $0x88] sm:$0xff] }
 0x348   :  { %7645 = vmatmul.mubr.msk.f32.vlgmr.msra.gmra.mrb[16].mxu1 %vm2903_vm10, %v7115_v15  ;;  %v3624_v15 = vsel %vm902_vm5, %v8854_v52, %v8844_v25  ;;  %v3626_v4 = vsel %vm902_vm5, %v8869_v36, %v8859_v23  ;;  %v3627_v44 = vsel %vm902_vm5, %v8870_v57, %v8860_v31  ;;  %v3611_v48 = vsel %vm902_vm5, %v8865_v14, %v8870_v57 }
 0x349   :  { %7980 = vmatpush1.bf16.msra.mxu1 %v7979_v42  ;;  %7647 = vmatprep.mubr.msk.f32.mxu1 %vm2903_vm10, %v7116_v16  ;;  %v3619_v16 = vsel %vm902_vm5, %v8860_v31, %v8865_v14  ;;  %v7987_v30 = vpack.c.bf16 %v3625_v9, %v3624_v15  ;;  %v7991_v25 = vpack.c.bf16 %v3627_v44, %v3626_v4  ;;  %v11276_v26 = vpop.permute.xlu0 %8877  ;;  %v11283_v42 = vpop.permute.xlu1 %8882  ;;  %v8875_v34 = vunpack.i.h.bf16 %v11265_v35 }
 0x34a   :  { %7982 = vmatprep.subr.bf16.mxu1 %v7981_v10  ;;  %v7989_v28 = vpack.c.bf16 %v3619_v16, %v3618_v37  ;;  %v8880_v32 = vunpack.i.h.bf16 %v11276_v26  ;;  %v8879_v53 = vunpack.i.l.bf16 %v11276_v26  ;;  %v8874_v23 = vunpack.i.l.bf16 %v11265_v35 }
 0x34b   :  { %v8884_v14 = vunpack.i.l.bf16 %v11283_v42 }
 0x34c   :  { %7648 = vmatmul.mubr.msk.f32.gmra.mrb[18].mxu1 %vm2903_vm10, %v7117_v45  ;;  %v3604_v45 = vsel %vm902_vm5, %v8819_v63, %v8824_v50  ;;  %v3606_v63 = vsel %vm902_vm5, %v8834_v5, %v8839_v27  ;;  %v3608_v50 = vsel %vm902_vm5, %v8849_v17, %v8854_v52  ;;  %v3610_v27 = vsel %vm902_vm5, %v8864_v56, %v8869_v36  ;;  %v7129_v52 = vld [vmem:[%s12404_s3 + $0x78] sm:$0xff] }
 0x34d   :  { %7984 = vmatpush1.bf16.msra.mxu1 %v7983_v0  ;;  %3704 = vmatprep.mubr.f32.mxu1 %v12438_v38  ;;  %v7993_v58 = vpack.c.bf16 %v3605_v54, %v3604_v45  ;;  %v7997_v51 = vpack.c.bf16 %v3607_v47, %v3606_v63  ;;  %v8001_v5 = vpack.c.bf16 %v3609_v60, %v3608_v50  ;;  %v11286_v10 = vpop.permute.xlu0 %8887  ;;  %v11292_v6 = vpop.permute.xlu1 %8892  ;;  %v8885_v56 = vunpack.i.h.bf16 %v11283_v42 }
 0x34e   :  { %7986 = vmatprep.subr.bf16.mxu1 %v7985_v59  ;;  %v8005_v17 = vpack.c.bf16 %v3611_v48, %v3610_v27  ;;  %v8889_v2 = vunpack.i.l.bf16 %v11286_v10  ;;  %v8890_v15 = vunpack.i.h.bf16 %v11286_v10  ;;  %v8895_v0 = vunpack.i.h.bf16 %v11292_v6  ;;  %v7141_v59 = vld [vmem:[%s12404_s3 + $0x98] sm:$0xff] }
 0x34f   :  { %v4082_v57 = vsel %vm1477_vm6, %v8874_v23, %v8879_v53  ;;  %v4083_v36 = vsel %vm1477_vm6, %v8875_v34, %v8880_v32  ;;  %v4090_v37 = vsel %vm1477_vm6, %v8884_v14, %v8874_v23  ;;  %v4091_v16 = vsel %vm1477_vm6, %v8885_v56, %v8875_v34 }
 0x350   :  { %v8041_v4 = vpack.c.bf16 %v4083_v36, %v4082_v57  ;;  %v8043_v47 = vpack.c.bf16 %v4091_v16, %v4090_v37 }
 0x351   :  { %7988 = vmatpush1.bf16.msra.mxu1 %v7987_v30  ;;  %v11302_v31 = vpop.permute.xlu0 %8897  ;;  %v11309_v18 = vpop.permute.xlu1 %8902 }
 0x352   :  { %7990 = vmatprep.subr.bf16.mxu1 %v7989_v28  ;;  %v8900_v28 = vunpack.i.h.bf16 %v11302_v31 }
 0x354   :  { %v4093_v60 = vsel %vm1477_vm6, %v8900_v28, %v8890_v15  ;;  %v4101_v42 = vsel %vm1477_vm6, %v8895_v0, %v8900_v28 }
 0x355   :  { %7992 = vmatpush1.bf16.msra.mxu1 %v7991_v25  ;;  %v11314_v22 = vpop.permute.xlu0 %8907  ;;  %v11322_v39 = vpop.permute.xlu1 %8912  ;;  %v4085_v25 = vsel %vm1477_vm6, %v8890_v15, %v8895_v0 }
 0x356   :  { %7994 = vmatprep.subr.bf16.mxu1 %v7993_v58  ;;  %v8910_v45 = vunpack.i.h.bf16 %v11314_v22  ;;  %v8909_v54 = vunpack.i.l.bf16 %v11314_v22 }
 0x358   :  { %7130 = vmatmul.mubr.msk.f32.vlgmr.msra.gmra.mrb[8].mxu1 %vm2903_vm10, %v7126_v49 }
 0x359   :  { %7996 = vmatpush3.bf16.msra.mxu1 %v7993_v58  ;;  %3710 = vmatprep.mubr.f32.mxu1 %v12438_v38  ;;  %v11331_v8 = vpop.permute.xlu0 %8922  ;;  %v11339_v40 = vpop.permute.xlu1 %8917  ;;  %v8905_v58 = vunpack.i.h.bf16 %v11309_v18 }
 0x35a   :  { %7998 = vmatprep.subr.bf16.mxu1 %v7997_v51  ;;  %v8924_v27 = vunpack.i.l.bf16 %v11331_v8  ;;  %v8920_v48 = vunpack.i.h.bf16 %v11339_v40 }
 0x35c   :  { %7131 = vmatmul.mubr.msk.f32.gmra.mrb[10].mxu1 %vm2903_vm10, %v7127_v20 }
 0x35d   :  { %8000 = vmatpush3.bf16.msra.mxu1 %v7997_v51  ;;  %3716 = vmatprep.mubr.f32.mxu1 %v12438_v38  ;;  %v11345_v33 = vpop.permute.xlu0 %8927  ;;  %v11361_v9 = vpop.permute.xlu1 %8932 }
 0x35e   :  { %8002 = vmatprep.subr.bf16.mxu1 %v8001_v5  ;;  %v8935_v37 = vunpack.i.h.bf16 %v11361_v9  ;;  %v8934_v16 = vunpack.i.l.bf16 %v11361_v9 }
 0x360   :  { %7132 = vmatmul.mubr.msk.f32.gmra.mrb[12].mxu1 %vm2903_vm10, %v7128_v24 }
 0x361   :  { %8004 = vmatpush3.bf16.msra.mxu1 %v8001_v5  ;;  %3722 = vmatprep.mubr.f32.mxu1 %v12438_v38  ;;  %v11387_v30 = vpop.permute.xlu0 %8937  ;;  %v11405_v63 = vpop.permute.xlu1 %8942  ;;  %v4087_v5 = vsel %vm1477_vm6, %v8905_v58, %v8910_v45 }
 0x362   :  { %8006 = vmatprep.subr.bf16.mxu1 %v8005_v17  ;;  %v8940_v0 = vunpack.i.h.bf16 %v11387_v30  ;;  %v8939_v57 = vunpack.i.l.bf16 %v11387_v30 }
 0x364   :  { %7133 = vmatmul.mubr.msk.f32.gmra.mrb[14].mxu1 %vm2903_vm10, %v7129_v52  ;;  %v4357_v9 = vsel %vm1771_vm7, %v8934_v16, %v8939_v57 }
 0x365   :  { %8008 = vmatpush3.bf16.msra.mxu1 %v8005_v17  ;;  %7666 = vmatprep.mubr.msk.f32.mxu1 %vm2903_vm10, %v7126_v49  ;;  %v8904_v49 = vunpack.i.l.bf16 %v11309_v18  ;;  %v8919_v17 = vunpack.i.l.bf16 %v11339_v40  ;;  %v4099_v40 = vsel %vm1477_vm6, %v8880_v32, %v8885_v56 }
 0x366   :  { %8010 = vmatprep.subr.bf16.mxu1 %v12455_v12 }
 0x367   :  { %v4086_v35 = vsel %vm1477_vm6, %v8904_v49, %v8909_v54 }
 0x368   :  { %7667 = vmatmul.mubr.msk.f32.vlgmr.msra.gmra.mrb[16].mxu1 %vm2903_vm10, %v7127_v20  ;;  %v8914_v20 = vunpack.i.l.bf16 %v11322_v39  ;;  %v8049_v18 = vpack.c.bf16 %v4087_v5, %v4086_v35 }
 0x369   :  { %8012 = vmatpush1.bf16.msra.mxu1 %v12456_v7  ;;  %7669 = vmatprep.mubr.msk.f32.mxu1 %vm2903_vm10, %v7128_v24  ;;  %v8925_v24 = vunpack.i.h.bf16 %v11331_v8 }
 0x36a   :  { %8014 = vmatprep.subr.bf16.mxu1 %v12457_v21  ;;  %v4094_v12 = vsel %vm1477_vm6, %v8914_v20, %v8904_v49  ;;  %v8930_v21 = vunpack.i.h.bf16 %v11345_v33  ;;  %v4358_v49 = vsel %vm1771_vm7, %v8935_v37, %v8940_v0 }
 0x36c   :  { %7670 = vmatmul.mubr.msk.f32.gmra.mrb[18].mxu1 %vm2903_vm10, %v7129_v52  ;;  %v11424_v52 = vpop.permute.xlu0 %8947  ;;  %v4105_v36 = vsel %vm1477_vm6, %v8920_v48, %v8930_v21 }
 0x36d   :  { %8016 = vmatpush1.bf16.msra.mxu1 %v12458_v11  ;;  %3907 = vmatprep.mubr.f32.mxu1 %v12438_v38  ;;  %v11433_v11 = vpop.permute.xlu1 %8952  ;;  %v8949_v28 = vunpack.i.l.bf16 %v11424_v52 }
 0x36e   :  { %8018 = vmatprep.subr.bf16.mxu1 %v12459_v19  ;;  %v4088_v19 = vsel %vm1477_vm6, %v8924_v27, %v8919_v17 }
 0x371   :  { %8020 = vmatpush1.bf16.msra.mxu1 %v12460_v41  ;;  %v4089_v41 = vsel %vm1477_vm6, %v8925_v24, %v8920_v48 }
 0x372   :  { %8022 = vmatprep.subr.bf16.mxu1 %v12461_v43  ;;  %v8053_v8 = vpack.c.bf16 %v4089_v41, %v4088_v19 }
 0x375   :  { %8024 = vmatpush1.bf16.msra.mxu1 %v12462_v29 }
 0x376   :  { %8026 = vmatprep.subr.bf16.mxu1 %v10337_v46 }
 0x378   :  { %7142 = vmatmul.mubr.msk.f32.vlgmr.msra.gmra.mrb[8].mxu1 %vm2903_vm10, %v7138_v62 }
 0x379   :  { %8028 = vmatpush3.bf16.msra.mxu1 %v10337_v46  ;;  %3913 = vmatprep.mubr.f32.mxu1 %v12438_v38  ;;  %v7140_v46 = vld [vmem:[%s12404_s3 + $0x90] sm:$0xff] }
 0x37a   :  { %8030 = vmatprep.subr.bf16.mxu1 %v10351_v55 }
 0x37c   :  { %7143 = vmatmul.mubr.msk.f32.gmra.mrb[10].mxu1 %vm2903_vm10, %v7139_v61 }
 0x37d   :  { %8032 = vmatpush3.bf16.msra.mxu1 %v10351_v55  ;;  %3919 = vmatprep.mubr.f32.mxu1 %v12438_v38  ;;  %v8894_v55 = vunpack.i.l.bf16 %v11292_v6  ;;  %v7151_v6 = vld [vmem:[%s12404_s3 + $0xa8] sm:$0xff] }
 0x37e   :  { %8034 = vmatprep.subr.bf16.mxu1 %v10361_v1 }
 0x37f   :  { %v4084_v44 = vsel %vm1477_vm6, %v8889_v2, %v8894_v55 }
 0x380   :  { %7144 = vmatmul.mubr.msk.f32.gmra.mrb[12].mxu1 %vm2903_vm10, %v7140_v46  ;;  %v8045_v50 = vpack.c.bf16 %v4085_v25, %v4084_v44  ;;  %v8945_v44 = vunpack.i.h.bf16 %v11405_v63  ;;  %v8950_v25 = vunpack.i.h.bf16 %v11424_v52 }
 0x381   :  { %8036 = vmatpush3.bf16.msra.mxu1 %v10361_v1  ;;  %3925 = vmatprep.mubr.f32.mxu1 %v12438_v38  ;;  %v8899_v1 = vunpack.i.l.bf16 %v11302_v31  ;;  %v8929_v31 = vunpack.i.l.bf16 %v11345_v33  ;;  %v11459_v33 = vpop.permute.xlu1 %8962 }
 0x382   :  { %8038 = vmatprep.subr.bf16.mxu1 %v10365_v3  ;;  %v8965_v52 = vunpack.i.h.bf16 %v11459_v33 }
 0x383   :  { %v4092_v51 = vsel %vm1477_vm6, %v8899_v1, %v8889_v2  ;;  %v4096_v29 = vsel %vm1477_vm6, %v8929_v31, %v8924_v27  ;;  %v7150_v2 = vld [vmem:[%s12404_s3 + $0xa0] sm:$0xff]  ;;  %v4100_v26 = vsel %vm1477_vm6, %v8894_v55, %v8899_v1  ;;  %v4104_v22 = vsel %vm1477_vm6, %v8919_v17, %v8929_v31 }
 0x384   :  { %7145 = vmatmul.mubr.msk.f32.gmra.mrb[14].mxu1 %vm2903_vm10, %v7141_v59  ;;  %v8047_v10 = vpack.c.bf16 %v4093_v60, %v4092_v51  ;;  %v8944_v1 = vunpack.i.l.bf16 %v11405_v63  ;;  %v7153_v51 = vld [vmem:[%s12404_s3 + $0xb8] sm:$0xff] }
 0x385   :  { %8040 = vmatpush3.bf16.msra.mxu1 %v10365_v3  ;;  %7688 = vmatprep.mubr.msk.f32.mxu1 %vm2903_vm10, %v7138_v62  ;;  %v8915_v3 = vunpack.i.h.bf16 %v11322_v39  ;;  %v11441_v39 = vpop.permute.xlu0 %8957  ;;  %v4097_v62 = vsel %vm1477_vm6, %v8930_v21, %v8925_v24  ;;  %v11474_v32 = vpop.permute.xlu1 %8972 }
 0x386   :  { %8042 = vmatprep.subr.bf16.mxu1 %v8041_v4  ;;  %v8959_v60 = vunpack.i.l.bf16 %v11441_v39  ;;  %v8960_v5 = vunpack.i.h.bf16 %v11441_v39  ;;  %v8974_v21 = vunpack.i.l.bf16 %v11474_v32  ;;  %v8975_v41 = vunpack.i.h.bf16 %v11474_v32 }
 0x387   :  { %v4095_v7 = vsel %vm1477_vm6, %v8915_v3, %v8905_v58  ;;  %v4103_v56 = vsel %vm1477_vm6, %v8910_v45, %v8915_v3  ;;  %v8954_v45 = vunpack.i.l.bf16 %v11433_v11  ;;  %v8955_v58 = vunpack.i.h.bf16 %v11433_v11  ;;  %v7163_v11 = vld [vmem:[%s12404_s3 + $0xc8] sm:$0xff] }
 0x388   :  { %7689 = vmatmul.mubr.msk.f32.vlgmr.msra.gmra.mrb[16].mxu1 %vm2903_vm10, %v7139_v61  ;;  %v8051_v43 = vpack.c.bf16 %v4095_v7, %v4094_v12  ;;  %v4098_v61 = vsel %vm1477_vm6, %v8879_v53, %v8884_v14  ;;  %v8061_v53 = vpack.c.bf16 %v4101_v42, %v4100_v26  ;;  %v4102_v14 = vsel %vm1477_vm6, %v8909_v54, %v8914_v20 }
 0x389   :  { %8044 = vmatpush1.bf16.msra.mxu1 %v8043_v47  ;;  %7691 = vmatprep.mubr.msk.f32.mxu1 %vm2903_vm10, %v7140_v46  ;;  %v8055_v46 = vpack.c.bf16 %v4097_v62, %v4096_v29  ;;  %v8057_v34 = vpack.c.bf16 %v4099_v40, %v4098_v61  ;;  %v11461_v23 = vpop.permute.xlu0 %8967  ;;  %v8065_v15 = vpack.c.bf16 %v4103_v56, %v4102_v14  ;;  %v11503_v4 = vpop.permute.xlu1 %8977 }
 0x38a   :  { %8046 = vmatprep.subr.bf16.mxu1 %v8045_v50  ;;  %v8069_v54 = vpack.c.bf16 %v4105_v36, %v4104_v22  ;;  %v4365_v20 = vsel %vm1771_vm7, %v8944_v1, %v8934_v16  ;;  %v4366_v50 = vsel %vm1771_vm7, %v8945_v44, %v8935_v37  ;;  %v8073_v3 = vpack.c.bf16 %v4358_v49, %v4357_v9 }
 0x38b   :  { %v4359_v35 = vsel %vm1771_vm7, %v8949_v28, %v8954_v45  ;;  %v8970_v24 = vunpack.i.h.bf16 %v11461_v23  ;;  %v8969_v27 = vunpack.i.l.bf16 %v11461_v23  ;;  %v4360_v17 = vsel %vm1771_vm7, %v8950_v25, %v8955_v58 }
 0x38c   :  { %7692 = vmatmul.mubr.msk.f32.gmra.mrb[18].mxu1 %vm2903_vm10, %v7141_v59  ;;  %v7152_v59 = vld [vmem:[%s12404_s3 + $0xb0] sm:$0xff]  ;;  %v8075_v12 = vpack.c.bf16 %v4366_v50, %v4365_v20  ;;  %v4367_v7 = vsel %vm1771_vm7, %v8959_v60, %v8949_v28  ;;  %v4368_v19 = vsel %vm1771_vm7, %v8960_v5, %v8950_v25  ;;  %v8979_v61 = vunpack.i.l.bf16 %v11503_v4  ;;  %v7162_v28 = vld [vmem:[%s12404_s3 + $0xc0] sm:$0xff] }
 0x38d   :  { %8048 = vmatpush1.bf16.msra.mxu1 %v8047_v10  ;;  %4182 = vmatprep.mubr.f32.mxu1 %v12438_v38  ;;  %v11487_v55 = vpop.permute.xlu0 %8982  ;;  %v11541_v48 = vpop.permute.xlu1 %8992  ;;  %v8964_v10 = vunpack.i.l.bf16 %v11459_v33  ;;  %v4362_v39 = vsel %vm1771_vm7, %v8965_v52, %v8970_v24  ;;  %v8079_v33 = vpack.c.bf16 %v4368_v19, %v4367_v7  ;;  %v4373_v36 = vsel %vm1771_vm7, %v8939_v57, %v8944_v1 }
 0x38e   :  { %8050 = vmatprep.subr.bf16.mxu1 %v8049_v18  ;;  %v8077_v18 = vpack.c.bf16 %v4360_v17, %v4359_v35  ;;  %v8985_v29 = vunpack.i.h.bf16 %v11487_v55  ;;  %v8984_v62 = vunpack.i.l.bf16 %v11487_v55  ;;  %v4375_v63 = vsel %vm1771_vm7, %v8954_v45, %v8959_v60 }
 0x38f   :  { %v4376_v30 = vsel %vm1771_vm7, %v8955_v58, %v8960_v5  ;;  %v4377_v1 = vsel %vm1771_vm7, %v8969_v27, %v8974_v21  ;;  %v8994_v20 = vunpack.i.l.bf16 %v11541_v48 }
 0x390   :  { %v8093_v57 = vpack.c.bf16 %v4376_v30, %v4375_v63 }
 0x391   :  { %8052 = vmatpush1.bf16.msra.mxu1 %v8051_v43  ;;  %v11519_v47 = vpop.permute.xlu0 %8987  ;;  %v4361_v43 = vsel %vm1771_vm7, %v8964_v10, %v8969_v27  ;;  %v11571_v40 = vpop.permute.xlu1 %9002 }
 0x392   :  { %8054 = vmatprep.subr.bf16.mxu1 %v8053_v8  ;;  %v8980_v8 = vunpack.i.h.bf16 %v11503_v4  ;;  %v8989_v26 = vunpack.i.l.bf16 %v11519_v47  ;;  %v8081_v42 = vpack.c.bf16 %v4362_v39, %v4361_v43  ;;  %v9004_v50 = vunpack.i.l.bf16 %v11571_v40 }
 0x393   :  { %v9005_v60 = vunpack.i.h.bf16 %v11571_v40 }
 0x394   :  { %v4364_v14 = vsel %vm1771_vm7, %v8985_v29, %v8980_v8  ;;  %v4379_v23 = vsel %vm1771_vm7, %v8979_v61, %v8989_v26 }
 0x395   :  { %8056 = vmatpush1.bf16.msra.mxu1 %v8055_v46  ;;  %v11554_v31 = vpop.permute.xlu0 %8997  ;;  %v4369_v46 = vsel %vm1771_vm7, %v8974_v21, %v8964_v10  ;;  %v7165_v10 = vld [vmem:[%s12404_s3 + $0xd8] sm:$0xff] }
 0x396   :  { %8058 = vmatprep.subr.bf16.mxu1 %v8057_v34  ;;  %v9000_v25 = vunpack.i.h.bf16 %v11554_v31  ;;  %v8999_v58 = vunpack.i.l.bf16 %v11554_v31 }
 0x398   :  { %7154 = vmatmul.mubr.msk.f32.vlgmr.msra.gmra.mrb[8].mxu1 %vm2903_vm10, %v7150_v2 }
 0x399   :  { %8060 = vmatpush3.bf16.msra.mxu1 %v8057_v34  ;;  %4188 = vmatprep.mubr.f32.mxu1 %v12438_v38  ;;  %v4370_v34 = vsel %vm1771_vm7, %v8975_v41, %v8965_v52  ;;  %v11580_v32 = vpop.permute.xlu0 %9007 }
 0x39a   :  { %8062 = vmatprep.subr.bf16.mxu1 %v8061_v53  ;;  %v8083_v56 = vpack.c.bf16 %v4370_v34, %v4369_v46  ;;  %v9010_v27 = vunpack.i.h.bf16 %v11580_v32 }
 0x39c   :  { %7155 = vmatmul.mubr.msk.f32.gmra.mrb[10].mxu1 %vm2903_vm10, %v7151_v6 }
 0x39d   :  { %8064 = vmatpush3.bf16.msra.mxu1 %v8061_v53  ;;  %4194 = vmatprep.mubr.f32.mxu1 %v12438_v38  ;;  %v4363_v53 = vsel %vm1771_vm7, %v8984_v62, %v8979_v61  ;;  %v11605_v16 = vpop.permute.xlu0 %9017 }
 0x39e   :  { %8066 = vmatprep.subr.bf16.mxu1 %v8065_v15  ;;  %v8085_v22 = vpack.c.bf16 %v4364_v14, %v4363_v53  ;;  %v9020_v43 = vunpack.i.h.bf16 %v11605_v16 }
 0x3a0   :  { %7156 = vmatmul.mubr.msk.f32.gmra.mrb[12].mxu1 %vm2903_vm10, %v7152_v59 }
 0x3a1   :  { %8068 = vmatpush3.bf16.msra.mxu1 %v8065_v15  ;;  %4200 = vmatprep.mubr.f32.mxu1 %v12438_v38  ;;  %v11591_v15 = vpop.permute.xlu1 %9012  ;;  %v11627_v45 = vpop.permute.xlu0 %9027 }
 0x3a2   :  { %8070 = vmatprep.subr.bf16.mxu1 %v8069_v54  ;;  %v9014_v35 = vunpack.i.l.bf16 %v11591_v15  ;;  %v9015_v17 = vunpack.i.h.bf16 %v11591_v15  ;;  %v9030_v39 = vunpack.i.h.bf16 %v11627_v45  ;;  %v7175_v15 = vld [vmem:[%s12404_s3 + $0xe8] sm:$0xff] }
 0x3a4   :  { %7157 = vmatmul.mubr.msk.f32.gmra.mrb[14].mxu1 %vm2903_vm10, %v7153_v51  ;;  %v4651_v31 = vsel %vm2065_vm8, %v9015_v17, %v9020_v43 }
 0x3a5   :  { %8072 = vmatpush3.bf16.msra.mxu1 %v8069_v54  ;;  %7710 = vmatprep.mubr.msk.f32.mxu1 %vm2903_vm10, %v7150_v2  ;;  %v8990_v2 = vunpack.i.h.bf16 %v11519_v47  ;;  %v7164_v47 = vld [vmem:[%s12404_s3 + $0xd0] sm:$0xff]  ;;  %v11652_v5 = vpop.permute.xlu0 %9042 }
 0x3a6   :  { %8074 = vmatprep.subr.bf16.mxu1 %v8073_v3  ;;  %v9009_v3 = vunpack.i.l.bf16 %v11580_v32 }
 0x3a7   :  { %v4372_v55 = vsel %vm1771_vm7, %v8990_v2, %v8985_v29  ;;  %v4380_v49 = vsel %vm1771_vm7, %v8980_v8, %v8990_v2  ;;  %v9029_v29 = vunpack.i.l.bf16 %v11627_v45 }
 0x3a8   :  { %7711 = vmatmul.mubr.msk.f32.vlgmr.msra.gmra.mrb[16].mxu1 %vm2903_vm10, %v7151_v6  ;;  %v4371_v6 = vsel %vm1771_vm7, %v8989_v26, %v8984_v62  ;;  %v4635_v62 = vsel %vm2065_vm8, %v9010_v27, %v9015_v17 }
 0x3a9   :  { %8076 = vmatpush1.bf16.msra.mxu1 %v8075_v12  ;;  %7713 = vmatprep.mubr.msk.f32.mxu1 %vm2903_vm10, %v7152_v59  ;;  %v4374_v59 = vsel %vm1771_vm7, %v8940_v0, %v8945_v44  ;;  %v8087_v37 = vpack.c.bf16 %v4372_v55, %v4371_v6  ;;  %v11618_v0 = vpop.permute.xlu1 %9022  ;;  %v4378_v44 = vsel %vm1771_vm7, %v8970_v24, %v8975_v41  ;;  %v11692_v8 = vpop.permute.xlu0 %9047  ;;  %v9045_v6 = vunpack.i.h.bf16 %v11652_v5 }
 0x3aa   :  { %8078 = vmatprep.subr.bf16.mxu1 %v8077_v18  ;;  %v8089_v4 = vpack.c.bf16 %v4374_v59, %v4373_v36  ;;  %v8097_v54 = vpack.c.bf16 %v4378_v44, %v4377_v1  ;;  %v8101_v24 = vpack.c.bf16 %v4380_v49, %v4379_v23  ;;  %v4640_v12 = vsel %vm2065_vm8, %v9004_v50, %v8994_v20 }
 0x3ab   :  { %v9019_v18 = vunpack.i.l.bf16 %v11605_v16  ;;  %v4634_v41 = vsel %vm2065_vm8, %v9009_v3, %v9014_v35  ;;  %v9025_v61 = vunpack.i.h.bf16 %v11618_v0  ;;  %v9044_v55 = vunpack.i.l.bf16 %v11652_v5  ;;  %v7174_v5 = vld [vmem:[%s12404_s3 + $0xe0] sm:$0xff] }
 0x3ac   :  { %7714 = vmatmul.mubr.msk.f32.gmra.mrb[18].mxu1 %vm2903_vm10, %v7153_v51  ;;  %v8995_v51 = vunpack.i.h.bf16 %v11541_v48  ;;  %v4632_v48 = vsel %vm2065_vm8, %v8994_v20, %v8999_v58  ;;  %v8109_v26 = vpack.c.bf16 %v4635_v62, %v4634_v41  ;;  %v9049_v63 = vunpack.i.l.bf16 %v11692_v8 }
 0x3ad   :  { %8080 = vmatpush1.bf16.msra.mxu1 %v8079_v33  ;;  %4457 = vmatprep.mubr.f32.mxu1 %v12438_v38  ;;  %v11635_v9 = vpop.permute.xlu1 %9032  ;;  %v9024_v33 = vunpack.i.l.bf16 %v11618_v0  ;;  %v4642_v34 = vsel %vm2065_vm8, %v9019_v18, %v9009_v3  ;;  %v11719_v16 = vpop.permute.xlu0 %9057  ;;  %v4648_v49 = vsel %vm2065_vm8, %v8999_v58, %v9004_v50  ;;  %v4650_v40 = vsel %vm2065_vm8, %v9014_v35, %v9019_v18 }
 0x3ae   :  { %8082 = vmatprep.subr.bf16.mxu1 %v8081_v42  ;;  %v4633_v52 = vsel %vm2065_vm8, %v8995_v51, %v9000_v25  ;;  %v4641_v21 = vsel %vm2065_vm8, %v9005_v60, %v8995_v51  ;;  %v9034_v2 = vunpack.i.l.bf16 %v11635_v9  ;;  %v4643_v42 = vsel %vm2065_vm8, %v9020_v43, %v9010_v27 }
 0x3af   :  { %v8105_v19 = vpack.c.bf16 %v4633_v52, %v4632_v48  ;;  %v8107_v46 = vpack.c.bf16 %v4641_v21, %v4640_v12  ;;  %v9035_v32 = vunpack.i.h.bf16 %v11635_v9  ;;  %v4636_v14 = vsel %vm2065_vm8, %v9024_v33, %v9029_v29 }
 0x3b0   :  { %v8111_v59 = vpack.c.bf16 %v4643_v42, %v4642_v34  ;;  %v8125_v58 = vpack.c.bf16 %v4651_v31, %v4650_v40  ;;  %v4652_v50 = vsel %vm2065_vm8, %v9029_v29, %v9034_v2  ;;  %v9060_v27 = vunpack.i.h.bf16 %v11719_v16 }
 0x3b1   :  { %8084 = vmatpush1.bf16.msra.mxu1 %v8083_v56  ;;  %v11673_v7 = vpop.permute.xlu1 %9037  ;;  %v4637_v56 = vsel %vm2065_vm8, %v9025_v61, %v9030_v39  ;;  %v11737_v23 = vpop.permute.xlu0 %9067  ;;  %v9059_v17 = vunpack.i.l.bf16 %v11719_v16 }
 0x3b2   :  { %8086 = vmatprep.subr.bf16.mxu1 %v8085_v22  ;;  %v9040_v22 = vunpack.i.h.bf16 %v11673_v7  ;;  %v9039_v36 = vunpack.i.l.bf16 %v11673_v7  ;;  %v8113_v30 = vpack.c.bf16 %v4637_v56, %v4636_v14 }
 0x3b4   :  { %v4638_v0 = vsel %vm2065_vm8, %v9044_v55, %v9039_v36  ;;  %v4654_v45 = vsel %vm2065_vm8, %v9039_v36, %v9049_v63 }
 0x3b5   :  { %8088 = vmatpush1.bf16.msra.mxu1 %v8087_v37  ;;  %v11703_v53 = vpop.permute.xlu1 %9052  ;;  %v4644_v37 = vsel %vm2065_vm8, %v9034_v2, %v9024_v33  ;;  %v7177_v33 = vld [vmem:[%s12404_s3 + $0xf8] sm:$0xff] }
 0x3b6   :  { %8090 = vmatprep.subr.bf16.mxu1 %v8089_v4  ;;  %v9055_v12 = vunpack.i.h.bf16 %v11703_v53  ;;  %v9054_v7 = vunpack.i.l.bf16 %v11703_v53 }
 0x3b8   :  { %7166 = vmatmul.mubr.msk.f32.vlgmr.msra.gmra.mrb[8].mxu1 %vm2903_vm10, %v7162_v28 }
 0x3b9   :  { %8092 = vmatpush3.bf16.msra.mxu1 %v8089_v4  ;;  %4463 = vmatprep.mubr.f32.mxu1 %v12438_v38  ;;  %v4645_v4 = vsel %vm2065_vm8, %v9035_v32, %v9025_v61  ;;  %v11731_v1 = vpop.permute.xlu1 %9062  ;;  %v4908_v61 = vsel %vm2359_vm9, %v9055_v12, %v9060_v27 }
 0x3ba   :  { %8094 = vmatprep.subr.bf16.mxu1 %v8093_v57  ;;  %v8115_v44 = vpack.c.bf16 %v4645_v4, %v4644_v37  ;;  %v9064_v21 = vunpack.i.l.bf16 %v11731_v1  ;;  %v9065_v18 = vunpack.i.h.bf16 %v11731_v1 }
 0x3bc   :  { %7167 = vmatmul.mubr.msk.f32.gmra.mrb[10].mxu1 %vm2903_vm10, %v7163_v11  ;;  %v4916_v34 = vsel %vm2359_vm9, %v9065_v18, %v9055_v12 }
 0x3bd   :  { %8096 = vmatpush3.bf16.msra.mxu1 %v8093_v57  ;;  %4469 = vmatprep.mubr.f32.mxu1 %v12438_v38  ;;  %v4639_v57 = vsel %vm2065_vm8, %v9045_v6, %v9040_v22  ;;  %v11751_v20 = vpop.permute.xlu1 %9072 }
 0x3be   :  { %8098 = vmatprep.subr.bf16.mxu1 %v8097_v54  ;;  %v8117_v9 = vpack.c.bf16 %v4639_v57, %v4638_v0  ;;  %v9074_v41 = vunpack.i.l.bf16 %v11751_v20  ;;  %v9075_v29 = vunpack.i.h.bf16 %v11751_v20 }
 0x3c0   :  { %7168 = vmatmul.mubr.msk.f32.gmra.mrb[12].mxu1 %vm2903_vm10, %v7164_v47 }
 0x3c1   :  { %8100 = vmatpush3.bf16.msra.mxu1 %v8097_v54  ;;  %4475 = vmatprep.mubr.f32.mxu1 %v12438_v38  ;;  %v11777_v35 = vpop.permute.xlu1 %9082 }
 0x3c2   :  { %8102 = vmatprep.subr.bf16.mxu1 %v8101_v24 }
 0x3c4   :  { %7169 = vmatmul.mubr.msk.f32.gmra.mrb[14].mxu1 %vm2903_vm10, %v7165_v10 }
 0x3c5   :  { %8104 = vmatpush3.bf16.msra.mxu1 %v8101_v24  ;;  %7732 = vmatprep.mubr.msk.f32.mxu1 %vm2903_vm10, %v7162_v28  ;;  %v9050_v28 = vunpack.i.h.bf16 %v11692_v8  ;;  %v11800_v62 = vpop.permute.xlu1 %9092  ;;  %v4907_v8 = vsel %vm2359_vm9, %v9054_v7, %v9059_v17 }
 0x3c6   :  { %8106 = vmatprep.subr.bf16.mxu1 %v8105_v19  ;;  %v9069_v19 = vunpack.i.l.bf16 %v11737_v23  ;;  %v8137_v42 = vpack.c.bf16 %v4908_v61, %v4907_v8  ;;  %v9094_v4 = vunpack.i.l.bf16 %v11800_v62 }
 0x3c7   :  { %v4647_v54 = vsel %vm2065_vm8, %v9050_v28, %v9045_v6  ;;  %v4655_v48 = vsel %vm2065_vm8, %v9040_v22, %v9050_v28  ;;  %v9084_v22 = vunpack.i.l.bf16 %v11777_v35 }
 0x3c8   :  { %7733 = vmatmul.mubr.msk.f32.vlgmr.msra.gmra.mrb[16].mxu1 %vm2903_vm10, %v7163_v11  ;;  %v4646_v11 = vsel %vm2065_vm8, %v9049_v63, %v9044_v55  ;;  %v8133_v43 = vpack.c.bf16 %v4655_v48, %v4654_v45  ;;  %v9085_v55 = vunpack.i.h.bf16 %v11777_v35  ;;  %v4923_v35 = vsel %vm2359_vm9, %v9059_v17, %v9064_v21 }
 0x3c9   :  { %8108 = vmatpush1.bf16.msra.mxu1 %v8107_v46  ;;  %7735 = vmatprep.mubr.msk.f32.mxu1 %vm2903_vm10, %v7164_v47  ;;  %v4649_v47 = vsel %vm2065_vm8, %v9000_v25, %v9005_v60  ;;  %v8119_v51 = vpack.c.bf16 %v4647_v54, %v4646_v11  ;;  %v11764_v25 = vpop.permute.xlu0 %9077  ;;  %v4653_v60 = vsel %vm2065_vm8, %v9030_v39, %v9035_v32  ;;  %v9070_v39 = vunpack.i.h.bf16 %v11737_v23  ;;  %v9098_v36 = vpop.permute.xlu1 %9097 }
 0x3ca   :  { %8110 = vmatprep.subr.bf16.mxu1 %v8109_v26  ;;  %v8121_v3 = vpack.c.bf16 %v4649_v47, %v4648_v49  ;;  %v8129_v24 = vpack.c.bf16 %v4653_v60, %v4652_v50  ;;  %v4915_v46 = vsel %vm2359_vm9, %v9064_v21, %v9054_v7  ;;  %v9079_v2 = vunpack.i.l.bf16 %v11764_v25  ;;  %v7188_v7 = vld [vmem:[%s12404_s3 + $0x110] sm:$0xff] }
 0x3cb   :  { %v4909_v32 = vsel %vm2359_vm9, %v9069_v19, %v9074_v41  ;;  %v9080_v53 = vunpack.i.h.bf16 %v11764_v25  ;;  %v4910_v6 = vsel %vm2359_vm9, %v9070_v39, %v9075_v29  ;;  %v9100_v54 = vunpack.i.h.bf16 %v9098_v36 }
 0x3cc   :  { %7736 = vmatmul.mubr.msk.f32.gmra.mrb[18].mxu1 %vm2903_vm10, %v7165_v10  ;;  %v7176_v10 = vld [vmem:[%s12404_s3 + $0xf0] sm:$0xff]  ;;  %v4917_v37 = vsel %vm2359_vm9, %v9079_v2, %v9069_v19  ;;  %v8141_v28 = vpack.c.bf16 %v4910_v6, %v4909_v32  ;;  %v4919_v47 = vsel %vm2359_vm9, %v9094_v4, %v9084_v22  ;;  %v4925_v17 = vsel %vm2359_vm9, %v9074_v41, %v9079_v2  ;;  %v7189_v41 = vld [vmem:[%s12404_s3 + $0x118] sm:$0xff] }
 0x3cd   :  { %8112 = vmatpush1.bf16.msra.mxu1 %v8111_v59  ;;  %4732 = vmatprep.mubr.f32.mxu1 %v12438_v38  ;;  %v11786_v52 = vpop.permute.xlu0 %9087  ;;  %v8139_v59 = vpack.c.bf16 %v4916_v34, %v4915_v46  ;;  %v4918_v63 = vsel %vm2359_vm9, %v9080_v53, %v9070_v39  ;;  %v4926_v16 = vsel %vm2359_vm9, %v9075_v29, %v9080_v53  ;;  %v5136_v29 = vpop.permute.xlu1 %5135  ;;  %v12464_v53 = vld [vmem:[#allocation5_spill] sm:$0xff] }
 0x3ce   :  { %8114 = vmatprep.subr.bf16.mxu1 %v8113_v30  ;;  %v9090_v14 = vunpack.i.h.bf16 %v11786_v52  ;;  %v9089_v56 = vunpack.i.l.bf16 %v11786_v52  ;;  %v9095_v30 = vunpack.i.h.bf16 %v11800_v62  ;;  %v8143_v49 = vpack.c.bf16 %v4918_v63, %v4917_v37  ;;  %v7186_v52 = vld [vmem:[%s12404_s3 + $0x100] sm:$0xff] }
 0x3cf   :  { %v8157_v1 = vpack.c.bf16 %v4926_v16, %v4925_v17 }
 0x3d0   :  { %v4911_v0 = vsel %vm2359_vm9, %v9084_v22, %v9089_v56  ;;  %v4912_v57 = vsel %vm2359_vm9, %v9085_v55, %v9090_v14  ;;  %v4928_v20 = vsel %vm2359_vm9, %v9090_v14, %v9095_v30 }
 0x3d1   :  { %8116 = vmatpush1.bf16.msra.mxu1 %v8115_v44  ;;  %v9103_v26 = vpop.permute.xlu0 %9102  ;;  %v8145_v40 = vpack.c.bf16 %v4912_v57, %v4911_v0 }
 0x3d2   :  { %8118 = vmatprep.subr.bf16.mxu1 %v8117_v9  ;;  %v9105_v44 = vunpack.i.h.bf16 %v9103_v26  ;;  %v9104_v11 = vunpack.i.l.bf16 %v9103_v26  ;;  %v9099_v9 = vunpack.i.l.bf16 %v9098_v36  ;;  %v12463_v26 = vld [vmem:[#allocation4_spill] sm:$0xff]  ;;  %v5146_v36 = vpop.permute.xlu1 %5145 }
 0x3d4   :  { %v4913_v31 = vsel %vm2359_vm9, %v9104_v11, %v9099_v9  ;;  %v4914_v25 = vsel %vm2359_vm9, %v9105_v44, %v9100_v54 }
 0x3d5   :  { %8120 = vmatpush1.bf16.msra.mxu1 %v8119_v51  ;;  %v9108_v23 = vpop.permute.xlu0 %9107  ;;  %v4920_v51 = vsel %vm2359_vm9, %v9095_v30, %v9085_v55 }
 0x3d6   :  { %8122 = vmatprep.subr.bf16.mxu1 %v8121_v3 }
 0x3d8   :  { %7178 = vmatmul.mubr.msk.f32.vlgmr.msra.gmra.mrb[8].mxu1 %vm2903_vm10, %v7174_v5 }
 0x3d9   :  { %8124 = vmatpush3.bf16.msra.mxu1 %v8121_v3  ;;  %4738 = vmatprep.mubr.f32.mxu1 %v12438_v38  ;;  %v9110_v3 = vunpack.i.h.bf16 %v9108_v23  ;;  %v5141_v8 = vpop.permute.xlu0 %5140 }
 0x3da   :  { %8126 = vmatprep.subr.bf16.mxu1 %v8125_v58 }
 0x3db   :  { %v4922_v60 = vsel %vm2359_vm9, %v9110_v3, %v9105_v44 }
 0x3dc   :  { %7179 = vmatmul.mubr.msk.f32.gmra.mrb[10].mxu1 %vm2903_vm10, %v7175_v15 }
 0x3dd   :  { %8128 = vmatpush3.bf16.msra.mxu1 %v8125_v58  ;;  %4744 = vmatprep.mubr.f32.mxu1 %v12438_v38  ;;  %v8147_v58 = vpack.c.bf16 %v4920_v51, %v4919_v47 }
 0x3de   :  { %8130 = vmatprep.subr.bf16.mxu1 %v8129_v24 }
 0x3e0   :  { %7180 = vmatmul.mubr.msk.f32.gmra.mrb[12].mxu1 %vm2903_vm10, %v7176_v10 }
 0x3e1   :  { %8132 = vmatpush3.bf16.msra.mxu1 %v8129_v24  ;;  %4750 = vmatprep.mubr.f32.mxu1 %v12438_v38  ;;  %v4924_v24 = vsel %vm2359_vm9, %v9060_v27, %v9065_v18  ;;  %v7187_v27 = vld [vmem:[%s12404_s3 + $0x108] sm:$0xff]  ;;  %v4930_v18 = vsel %vm2359_vm9, %v9100_v54, %v9110_v3 }
 0x3e2   :  { %8134 = vmatprep.subr.bf16.mxu1 %v8133_v43  ;;  %v8153_v48 = vpack.c.bf16 %v4924_v24, %v4923_v35 }
 0x3e4   :  { %7181 = vmatmul.mubr.msk.f32.gmra.mrb[14].mxu1 %vm2903_vm10, %v7177_v33 }
 0x3e5   :  { %8136 = vmatpush3.bf16.msra.mxu1 %v8133_v43  ;;  %7754 = vmatprep.mubr.msk.f32.mxu1 %vm2903_vm10, %v7174_v5  ;;  %v9109_v5 = vunpack.i.l.bf16 %v9108_v23 }
 0x3e6   :  { %8138 = vmatprep.subr.bf16.mxu1 %v8137_v42 }
 0x3e7   :  { %v4921_v50 = vsel %vm2359_vm9, %v9109_v5, %v9104_v11  ;;  %v4929_v21 = vsel %vm2359_vm9, %v9099_v9, %v9109_v5 }
 0x3e8   :  { %7755 = vmatmul.mubr.msk.f32.vlgmr.msra.gmra.mrb[16].mxu1 %vm2903_vm10, %v7175_v15  ;;  %v8149_v15 = vpack.c.bf16 %v4914_v25, %v4913_v31  ;;  %v8151_v45 = vpack.c.bf16 %v4922_v60, %v4921_v50  ;;  %v8165_v19 = vpack.c.bf16 %v4930_v18, %v4929_v21  ;;  %v12465_v25 = vld [vmem:[#allocation3_spill] sm:$0xff] }
 0x3e9   :  { %8140 = vmatpush1.bf16.msra.mxu1 %v8139_v59  ;;  %7757 = vmatprep.mubr.msk.f32.mxu1 %vm2903_vm10, %v7176_v10  ;;  %v4927_v10 = vsel %vm2359_vm9, %v9089_v56, %v9094_v4  ;;  %v5151_v4 = vpop.permute.xlu0 %5150 }
 0x3ea   :  { %8142 = vmatprep.subr.bf16.mxu1 %v8141_v28  ;;  %v8161_v12 = vpack.c.bf16 %v4928_v20, %v4927_v10 }
 0x3ec   :  { %7758 = vmatmul.mubr.msk.f32.gmra.mrb[18].mxu1 %vm2903_vm10, %v7177_v33 }
 0x3ed   :  { %8144 = vmatpush1.bf16.msra.mxu1 %v8143_v49  ;;  %5007 = vmatprep.mubr.f32.mxu1 %v12438_v38 }
 0x3ee   :  { %8146 = vmatprep.subr.bf16.mxu1 %v8145_v40 }
 0x3f1   :  { %8148 = vmatpush1.bf16.msra.mxu1 %v8147_v58 }
 0x3f2   :  { %8150 = vmatprep.subr.bf16.mxu1 %v8149_v15 }
 0x3f5   :  { %8152 = vmatpush1.bf16.msra.mxu1 %v8151_v45 }
 0x3f6   :  { %8154 = vmatprep.subr.bf16.mxu1 %v8153_v48 }
 0x3f8   :  { %7190 = vmatmul.mubr.msk.f32.vlgmr.msra.gmra.mrb[8].mxu1 %vm2903_vm10, %v7186_v52 }
 0x3f9   :  { %8156 = vmatpush3.bf16.msra.mxu1 %v8153_v48  ;;  %5013 = vmatprep.mubr.f32.mxu1 %v12438_v38 }
 0x3fa   :  { %8158 = vmatprep.subr.bf16.mxu1 %v8157_v1 }
 0x3fc   :  { %7191 = vmatmul.mubr.msk.f32.gmra.mrb[10].mxu1 %vm2903_vm10, %v7187_v27 }
 0x3fd   :  { %8160 = vmatpush3.bf16.msra.mxu1 %v8157_v1  ;;  %5019 = vmatprep.mubr.f32.mxu1 %v12438_v38 }
 0x3fe   :  { %8162 = vmatprep.subr.bf16.mxu1 %v8161_v12 }
 0x400   :  { %7192 = vmatmul.mubr.msk.f32.gmra.mrb[12].mxu1 %vm2903_vm10, %v7188_v7 }
 0x401   :  { %8164 = vmatpush3.bf16.msra.mxu1 %v8161_v12  ;;  %5025 = vmatprep.mubr.f32.mxu1 %v12438_v38 }
 0x402   :  { %8166 = vmatprep.subr.bf16.mxu1 %v8165_v19 }
 0x404   :  { %7193 = vmatmul.mubr.msk.f32.gmra.mrb[14].mxu1 %vm2903_vm10, %v7189_v41 }
 0x405   :  { %8168 = vmatpush3.bf16.msra.mxu1 %v8165_v19  ;;  %7776 = vmatprep.mubr.msk.f32.mxu1 %vm2903_vm10, %v7186_v52 }
 0x408   :  { %7777 = vmatmul.mubr.msk.f32.vlgmr.msra.gmra.mrb[16].mxu1 %vm2903_vm10, %v7187_v27 }
 0x409   :  { %7779 = vmatprep.mubr.msk.f32.mxu1 %vm2903_vm10, %v7188_v7 }
 0x40c   :  { %7780 = vmatmul.mubr.msk.f32.gmra.mrb[18].mxu1 %vm2903_vm10, %v7189_v41 }
 0x4cb   :  { %v5009_v43 = vpop.f32.mrb[8].mxu1 }
 0x4cc   :  { %v5011_v39 = vpop.f32.mrb[9].mxu1  ;;  %v5153_v62 = vadd.f32 %v5136_v29, %v5009_v43 }
 0x4cd   :  { %v5154_v61 = vadd.f32 %v5136_v29, %v5011_v39 }
 0x4ce   :  { %v11917_v42 = vmul.f32 %v5153_v62, %v12463_v26 }
 0x4cf   :  { %v5015_v33 = vpop.f32.mrb[10].mxu1  ;;  %v11923_v14 = vmul.f32 %v5154_v61, %v12464_v53 }
 0x4d0   :  { %v5156_v46 = vadd.f32 %v5141_v8, %v5015_v33  ;;  %v5017_v34 = vpop.f32.mrb[11].mxu1 }
 0x4d1   :  { %v5157_v2 = vadd.f32 %v5141_v8, %v5017_v34 }
 0x4d2   :  { %v11920_v32 = vmul.f32 %v5156_v46, %v12463_v26 }
 0x4d3   :  { %v11926_v56 = vmul.f32 %v5157_v2, %v12464_v53  ;;  %v5021_v6 = vpop.f32.mrb[12].mxu1 }
 0x4d4   :  { %v5023_v55 = vpop.f32.mrb[13].mxu1  ;;  %v11930_v22 = vpack.i.bf16 %v11920_v32, %v11917_v42  ;;  %v5159_v37 = vadd.f32 %v5146_v36, %v5021_v6  ;;  %v8227_v11 = vpack.c.bf16 %v11920_v32, %v11917_v42  ;;  %v7209_v42 = vld [vmem:[%s12406_s5 + $0x4] sm:$0x1] }
 0x4d5   :  { %v11934_v59 = vpack.i.bf16 %v11926_v56, %v11923_v14  ;;  %v5160_v28 = vadd.f32 %v5146_v36, %v5023_v55  ;;  %v8225_v44 = vpack.c.bf16 %v11926_v56, %v11923_v14 }
 0x4d6   :  { %9112 = vrot.lane.b32.xlu1 %v11930_v22, %s9354_s0  ;;  %v11945_v54 = vmul.f32 %v5159_v37, %v12463_v26 }
 0x4d7   :  { %9117 = vrot.lane.b32.xlu0 %v11934_v59, %s9354_s0  ;;  %v5027_v63 = vpop.f32.mrb[14].mxu1  ;;  %v11951_v23 = vmul.f32 %v5160_v28, %v12464_v53 }
 0x4d8   :  { %v5162_v30 = vadd.f32 %v5151_v4, %v5027_v63  ;;  %v5029_v0 = vpop.f32.mrb[15].mxu1 }
 0x4d9   :  { %v5163_v57 = vadd.f32 %v5151_v4, %v5029_v0 }
 0x4da   :  { %v11948_v9 = vmul.f32 %v5162_v30, %v12463_v26 }
 0x4db   :  { %v11954_v49 = vmul.f32 %v5163_v57, %v12464_v53  ;;  %v7778_v47 = vpop.f32.mrb[16].mxu1 }
 0x4dc   :  { %v5158_v51 = vadd.f32 %v7778_v47, %v5141_v8  ;;  %v5098_v3 = vpop.f32.mrb[17].mxu1  ;;  %v9121_v5 = vpack.i.bf16 %v11948_v9, %v11945_v54  ;;  %v8231_v16 = vpack.c.bf16 %v11948_v9, %v11945_v54 }
 0x4dd   :  { %v5155_v40 = vadd.f32 %v5136_v29, %v5098_v3  ;;  %v9131_v31 = vpack.i.bf16 %v11954_v49, %v11951_v23  ;;  %v8229_v17 = vpack.c.bf16 %v11954_v49, %v11951_v23 }
 0x4de   :  { %v11961_v58 = vmul.f32 %v5158_v51, %v12465_v25  ;;  %9122 = vrot.lane.b32.xlu0 %v9121_v5, %s9354_s0 }
 0x4df   :  { %v11965_v50 = vmul.f32 %v5155_v40, %v12465_v25  ;;  %v7781_v60 = vpop.f32.mrb[18].mxu1 }
 0x4e0   :  { %v5164_v15 = vadd.f32 %v7781_v60, %v5151_v4  ;;  %v5108_v35 = vpop.f32.mrb[19].mxu1 }
 0x4e1   :  { %v5161_v24 = vadd.f32 %v5146_v36, %v5108_v35  ;;  %v9126_v45 = vpack.i.bf16 %v11961_v58, %v11965_v50  ;;  %v8234_v1 = vpack.c.bf16 %v11961_v58, %v11965_v50 }
 0x4e2   :  { %v11970_v48 = vmul.f32 %v5164_v15, %v12465_v25 }
 0x4e3   :  { %v11973_v52 = vmul.f32 %v5161_v24, %v12465_v25  ;;  %9127 = vrot.lane.b32.xlu1 %v9126_v45, %s9354_s0 }
 0x4e5   :  { %v9136_v27 = vpack.i.bf16 %v11970_v48, %v11973_v52  ;;  %v8237_v10 = vpack.c.bf16 %v11970_v48, %v11973_v52 }
 0x4e7   :  { %9132 = vrot.lane.b32.xlu1 %v9131_v31, %s9354_s0  ;;  %9137 = vrot.lane.b32.xlu0 %v9136_v27, %s9354_s0 }
 0x4eb   :  { %9142 = vrot.lane.b32.xlu1 %v11930_v22, %s9355_s28  ;;  %9147 = vrot.lane.b32.xlu0 %v11934_v59, %s9355_s28 }
 0x4ef   :  { %9152 = vrot.lane.b32.xlu1 %v9126_v45, %s9355_s28  ;;  %9157 = vrot.lane.b32.xlu0 %v9121_v5, %s9355_s28 }
 0x4f3   :  { %9162 = vrot.lane.b32.xlu1 %v9131_v31, %s9355_s28  ;;  %9167 = vrot.lane.b32.xlu0 %v9136_v27, %s9355_s28 }
 0x4f7   :  { %9172 = vrot.lane.b32.xlu1 %v11930_v22, %s9356_s29  ;;  %9177 = vrot.lane.b32.xlu0 %v11934_v59, %s9356_s29 }
 0x4fb   :  { %9182 = vrot.lane.b32.xlu1 %v9126_v45, %s9356_s29  ;;  %9187 = vrot.lane.b32.xlu0 %v9121_v5, %s9356_s29 }
 0x4ff   :  { %9192 = vrot.lane.b32.xlu1 %v9131_v31, %s9356_s29  ;;  %9197 = vrot.lane.b32.xlu0 %v9136_v27, %s9356_s29 }
 0x503   :  { %9202 = vrot.lane.b32.xlu1 %v11930_v22, %s9357_s30  ;;  %9207 = vrot.lane.b32.xlu0 %v11934_v59, %s9357_s30 }
 0x507   :  { %9212 = vrot.lane.b32.xlu1 %v9126_v45, %s9357_s30  ;;  %9217 = vrot.lane.b32.xlu0 %v9121_v5, %s9357_s30 }
 0x50b   :  { %9222 = vrot.lane.b32.xlu1 %v9131_v31, %s9357_s30  ;;  %9227 = vrot.lane.b32.xlu0 %v9136_v27, %s9357_s30 }
 0x50f   :  { %9232 = vrot.lane.b32.xlu1 %v11934_v59, %s9358_s8  ;;  %9237 = vrot.lane.b32.xlu0 %v9126_v45, %s9358_s8 }
 0x513   :  { %9242 = vrot.lane.b32.xlu1 %v11930_v22, %s9358_s8  ;;  %9247 = vrot.lane.b32.xlu0 %v9131_v31, %s9358_s8 }
 0x517   :  { %9252 = vrot.lane.b32.xlu1 %v9136_v27, %s9358_s8  ;;  %9257 = vrot.lane.b32.xlu0 %v9121_v5, %s9358_s8 }
 0x51b   :  { %9262 = vrot.lane.b32.xlu1 %v11934_v59, %s9359_s9  ;;  %9267 = vrot.lane.b32.xlu0 %v9126_v45, %s9359_s9 }
 0x51f   :  { %9272 = vrot.lane.b32.xlu1 %v11930_v22, %s9359_s9  ;;  %9277 = vrot.lane.b32.xlu0 %v9131_v31, %s9359_s9 }
 0x523   :  { %9282 = vrot.lane.b32.xlu1 %v9136_v27, %s9359_s9  ;;  %9287 = vrot.lane.b32.xlu0 %v9121_v5, %s9359_s9 }
 0x527   :  { %9292 = vrot.lane.b32.xlu1 %v11934_v59, %s9360_s10  ;;  %9297 = vrot.lane.b32.xlu0 %v9126_v45, %s9360_s10 }
 0x52b   :  { %9302 = vrot.lane.b32.xlu1 %v11930_v22, %s9360_s10  ;;  %9307 = vrot.lane.b32.xlu0 %v9131_v31, %s9360_s10 }
 0x52f   :  { %9312 = vrot.lane.b32.xlu1 %v9136_v27, %s9360_s10  ;;  %9317 = vrot.lane.b32.xlu0 %v9121_v5, %s9360_s10 }
 0x533   :  { %9322 = vrot.lane.b32.xlu1 %v11934_v59, %s9361_s11  ;;  %9327 = vrot.lane.b32.xlu0 %v9126_v45, %s9361_s11 }
 0x537   :  { %9332 = vrot.lane.b32.xlu1 %v11930_v22, %s9361_s11  ;;  %9337 = vrot.lane.b32.xlu0 %v9131_v31, %s9361_s11 }
 0x53b   :  { %9342 = vrot.lane.b32.xlu1 %v9136_v27, %s9361_s11  ;;  %9347 = vrot.lane.b32.xlu0 %v9121_v5, %s9361_s11  ;;  %v7198_v27 = vld [vmem:[%s12406_s5 + $0x1] sm:$0x1] }
 0x548   :  { %v9113_v20 = vpop.permute.xlu1 %9112 }
 0x549   :  { %v9115_v12 = vunpack.i.h.bf16 %v9113_v20  ;;  %v9114_v7 = vunpack.i.l.bf16 %v9113_v20  ;;  %v9118_v21 = vpop.permute.xlu0 %9117  ;;  %v9363_v20 = vmov 0.0|0.0  }
 0x54a   :  { %v9120_v18 = vunpack.i.h.bf16 %v9118_v21  ;;  %v9119_v19 = vunpack.i.l.bf16 %v9118_v21 }
 0x54c   :  { %v5244_v41 = vsel %vm85_vm1, %v9114_v7, %v9119_v19  ;;  %v5245_v43 = vsel %vm85_vm1, %v9115_v12, %v9120_v18 }
 0x54d   :  { %v8169_v39 = vpack.c.bf16 %v5245_v43, %v5244_v41 }
 0x54f   :  { %8170 = vmatprep.subr.bf16.mxu0 %v8169_v39 }
 0x550   :  { %v9123_v29 = vpop.permute.xlu0 %9122 }
 0x551   :  { %v9125_v34 = vunpack.i.h.bf16 %v9123_v29  ;;  %v9124_v2 = vunpack.i.l.bf16 %v9123_v29 }
 0x555   :  { %v9128_v62 = vpop.permute.xlu1 %9127 }
 0x556   :  { %v9130_v8 = vunpack.i.h.bf16 %v9128_v62  ;;  %v9129_v61 = vunpack.i.l.bf16 %v9128_v62 }
 0x558   :  { %v5249_v33 = vsel %vm85_vm1, %v9130_v8, %v9115_v12  ;;  %v5248_v46 = vsel %vm85_vm1, %v9129_v61, %v9114_v7  ;;  %v5241_v5 = vsel %vm85_vm1, %v9120_v18, %v9130_v8  ;;  %v5240_v40 = vsel %vm85_vm1, %v9119_v19, %v9129_v61 }
 0x559   :  { %v8171_v6 = vpack.c.bf16 %v5249_v33, %v5248_v46  ;;  %v9133_v55 = vpop.permute.xlu1 %9132  ;;  %v9138_v22 = vpop.permute.xlu0 %9137  ;;  %v8178_v12 = vpack.c.bf16 %v5241_v5, %v5240_v40 }
 0x55a   :  { %v9135_v36 = vunpack.i.h.bf16 %v9133_v55  ;;  %v9134_v59 = vunpack.i.l.bf16 %v9133_v55  ;;  %v9140_v37 = vunpack.i.h.bf16 %v9138_v22  ;;  %v9139_v4 = vunpack.i.l.bf16 %v9138_v22 }
 0x55b   :  { %8172 = vmatpush1.bf16.msra.mxu0 %v8171_v6 }
 0x55c   :  { %v5251_v28 = vsel %vm85_vm1, %v9140_v37, %v9125_v34  ;;  %v5250_v63 = vsel %vm85_vm1, %v9139_v4, %v9124_v2  ;;  %v5246_v57 = vsel %vm85_vm1, %v9124_v2, %v9134_v59  ;;  %v5247_v47 = vsel %vm85_vm1, %v9125_v34, %v9135_v36 }
 0x55d   :  { %v9143_v30 = vpop.permute.xlu1 %9142  ;;  %v12056_v0 = vpop.permute.xlu0 %9147  ;;  %v8175_v51 = vpack.c.bf16 %v5251_v28, %v5250_v63  ;;  %v8173_v3 = vpack.c.bf16 %v5247_v47, %v5246_v57  ;;  %v5243_v7 = vsel %vm85_vm1, %v9135_v36, %v9140_v37  ;;  %v5242_v21 = vsel %vm85_vm1, %v9134_v59, %v9139_v4 }
 0x55e   :  { %v9145_v31 = vunpack.i.h.bf16 %v9143_v30  ;;  %v9144_v60 = vunpack.i.l.bf16 %v9143_v30  ;;  %v9150_v15 = vunpack.i.h.bf16 %v12056_v0  ;;  %v9149_v35 = vunpack.i.l.bf16 %v12056_v0 }
 0x55f   :  { %8174 = vmatprep.subr.bf16.mxu0 %v8173_v3  ;;  %v8181_v61 = vpack.c.bf16 %v5243_v7, %v5242_v21 }
 0x560   :  { %8176 = vmatpush1.bf16.msra.mxu0 %v8175_v51  ;;  %v5206_v39 = vsel %vm66_vm3, %v9144_v60, %v9149_v35  ;;  %v5207_v29 = vsel %vm66_vm3, %v9145_v31, %v9150_v15 }
 0x561   :  { %v9153_v24 = vpop.permute.xlu1 %9152  ;;  %v9158_v45 = vpop.permute.xlu0 %9157  ;;  %8177 = vmatprep.subr.bf16.mxu0 %v9363_v20  ;;  %v8183_v34 = vpack.c.bf16 %v5207_v29, %v5206_v39 }
 0x562   :  { %v9155_v18 = vunpack.i.h.bf16 %v9153_v24  ;;  %v9154_v19 = vunpack.i.l.bf16 %v9153_v24  ;;  %v9160_v33 = vunpack.i.h.bf16 %v9158_v45  ;;  %v9159_v46 = vunpack.i.l.bf16 %v9158_v45 }
 0x563   :  { %7199 = vmatmul.mubr.msk.f32.vlgmr.msra.gmra.mrb[16].mxu0 %vm5252_vm11, %v7198_v27 }
 0x564   :  { %8179 = vmatpush3.bf16.msra.mxu0 %v8178_v12  ;;  %7790 = vmatprep.mubr.msk.f32.mxu0 %vm9364_vm12, %v12438_v38  ;;  %v5210_v2 = vsel %vm66_vm3, %v9154_v19, %v9144_v60  ;;  %v5211_v6 = vsel %vm66_vm3, %v9155_v18, %v9145_v31  ;;  %v5202_v51 = vsel %vm66_vm3, %v9149_v35, %v9154_v19 }
 0x565   :  { %v9163_v41 = vpop.permute.xlu1 %9162  ;;  %v9168_v43 = vpop.permute.xlu0 %9167  ;;  %8180 = vmatprep.subr.bf16.mxu0 %v9363_v20  ;;  %v8185_v28 = vpack.c.bf16 %v5211_v6, %v5210_v2  ;;  %v5203_v3 = vsel %vm66_vm3, %v9150_v15, %v9155_v18 }
 0x566   :  { %v9165_v62 = vunpack.i.h.bf16 %v9163_v41  ;;  %v9164_v8 = vunpack.i.l.bf16 %v9163_v41  ;;  %v9170_v55 = vunpack.i.h.bf16 %v9168_v43  ;;  %v9169_v22 = vunpack.i.l.bf16 %v9168_v43 }
 0x567   :  { %v8192_v12 = vpack.c.bf16 %v5203_v3, %v5202_v51 }
 0x568   :  { %8182 = vmatpush3.bf16.msra.mxu0 %v8181_v61  ;;  %v5208_v37 = vsel %vm66_vm3, %v9159_v46, %v9164_v8  ;;  %v5209_v4 = vsel %vm66_vm3, %v9160_v33, %v9165_v62  ;;  %v5212_v63 = vsel %vm66_vm3, %v9169_v22, %v9159_v46  ;;  %v5213_v30 = vsel %vm66_vm3, %v9170_v55, %v9160_v33 }
 0x569   :  { %v9173_v36 = vpop.permute.xlu1 %9172  ;;  %v12088_v59 = vpop.permute.xlu0 %9177  ;;  %8184 = vmatprep.subr.bf16.mxu0 %v8183_v34  ;;  %v8187_v57 = vpack.c.bf16 %v5209_v4, %v5208_v37  ;;  %v8189_v5 = vpack.c.bf16 %v5213_v30, %v5212_v63  ;;  %v5205_v35 = vsel %vm66_vm3, %v9165_v62, %v9170_v55  ;;  %v5204_v15 = vsel %vm66_vm3, %v9164_v8, %v9169_v22 }
 0x56a   :  { %v9175_v40 = vunpack.i.h.bf16 %v9173_v36  ;;  %v9174_v31 = vunpack.i.l.bf16 %v9173_v36  ;;  %v9180_v60 = vunpack.i.h.bf16 %v12088_v59  ;;  %v9179_v24 = vunpack.i.l.bf16 %v12088_v59 }
 0x56b   :  { %7791 = vmatmul.mubr.msk.f32.vlgmr.msra.gmra.mrb[18].mxu0 %vm5252_vm11, %v7198_v27  ;;  %v5177_v27 = vld [vmem:[%s12406_s5] sm:$0x1]  ;;  %v8195_v62 = vpack.c.bf16 %v5205_v35, %v5204_v15 }
 0x56c   :  { %8186 = vmatpush1.bf16.msra.mxu0 %v8185_v28  ;;  %5464 = vmatprep.mubr.f32.mxu0 %v12438_v38  ;;  %v5571_v19 = vsel %vm608_vm4, %v9174_v31, %v9179_v24  ;;  %v5572_v41 = vsel %vm608_vm4, %v9175_v40, %v9180_v60 }
 0x56d   :  { %v9183_v0 = vpop.permute.xlu1 %9182  ;;  %v9188_v47 = vpop.permute.xlu0 %9187  ;;  %8188 = vmatprep.subr.bf16.mxu0 %v8187_v57  ;;  %v8197_v33 = vpack.c.bf16 %v5572_v41, %v5571_v19 }
 0x56e   :  { %v9185_v21 = vunpack.i.h.bf16 %v9183_v0  ;;  %v9184_v18 = vunpack.i.l.bf16 %v9183_v0  ;;  %v9190_v8 = vunpack.i.h.bf16 %v9188_v47  ;;  %v9189_v61 = vunpack.i.l.bf16 %v9188_v47 }
 0x570   :  { %8190 = vmatpush1.bf16.msra.mxu0 %v8189_v5  ;;  %v5575_v46 = vsel %vm608_vm4, %v9184_v18, %v9174_v31  ;;  %v5576_v34 = vsel %vm608_vm4, %v9185_v21, %v9175_v40  ;;  %v5567_v30 = vsel %vm608_vm4, %v9179_v24, %v9184_v18  ;;  %v5568_v0 = vsel %vm608_vm4, %v9180_v60, %v9185_v21  ;;  %v7203_v31 = vld [vmem:[%s12406_s5 + $0x2] sm:$0x1] }
 0x571   :  { %v9193_v45 = vpop.permute.xlu1 %9192  ;;  %8191 = vmatprep.subr.bf16.mxu0 %v9363_v20  ;;  %v9198_v7 = vpop.permute.xlu0 %9197  ;;  %v8199_v59 = vpack.c.bf16 %v5576_v34, %v5575_v46  ;;  %v8206_v24 = vpack.c.bf16 %v5568_v0, %v5567_v30 }
 0x572   :  { %v9195_v43 = vunpack.i.h.bf16 %v9193_v45  ;;  %v9194_v39 = vunpack.i.l.bf16 %v9193_v45  ;;  %v9200_v2 = vunpack.i.h.bf16 %v9198_v7  ;;  %v9199_v6 = vunpack.i.l.bf16 %v9198_v7 }
 0x573   :  { %7201 = vmatmul.mubr.msk.f32.vlgmr.msra.gmra.mrb[16].mxu0 %vm5252_vm11, %v5177_v27 }
 0x574   :  { %8193 = vmatpush3.bf16.msra.mxu0 %v8192_v12  ;;  %7801 = vmatprep.mubr.msk.f32.mxu0 %vm9364_vm12, %v12438_v38  ;;  %v5573_v22 = vsel %vm608_vm4, %v9189_v61, %v9194_v39  ;;  %v5574_v36 = vsel %vm608_vm4, %v9190_v8, %v9195_v43  ;;  %v5577_v37 = vsel %vm608_vm4, %v9199_v6, %v9189_v61 }
 0x575   :  { %v9203_v29 = vpop.permute.xlu1 %9202  ;;  %8194 = vmatprep.subr.bf16.mxu0 %v9363_v20  ;;  %v12126_v55 = vpop.permute.xlu0 %9207  ;;  %v5578_v4 = vsel %vm608_vm4, %v9200_v2, %v9190_v8  ;;  %v8201_v63 = vpack.c.bf16 %v5574_v36, %v5573_v22  ;;  %v5570_v60 = vsel %vm608_vm4, %v9195_v43, %v9200_v2 }
 0x576   :  { %v8203_v57 = vpack.c.bf16 %v5578_v4, %v5577_v37  ;;  %v9205_v51 = vunpack.i.h.bf16 %v9203_v29  ;;  %v9204_v3 = vunpack.i.l.bf16 %v9203_v29  ;;  %v9210_v5 = vunpack.i.h.bf16 %v12126_v55 }
 0x577   :  { %v9209_v40 = vunpack.i.l.bf16 %v12126_v55 }
 0x578   :  { %8196 = vmatpush3.bf16.msra.mxu0 %v8195_v62  ;;  %v5757_v7 = vsel %vm902_vm5, %v9205_v51, %v9210_v5 }
 0x579   :  { %8198 = vmatprep.subr.bf16.mxu0 %v8197_v33  ;;  %v9213_v28 = vpop.permute.xlu1 %9212  ;;  %v9218_v47 = vpop.permute.xlu0 %9217  ;;  %v5756_v15 = vsel %vm902_vm5, %v9204_v3, %v9209_v40 }
 0x57a   :  { %v9215_v12 = vunpack.i.h.bf16 %v9213_v28  ;;  %v9214_v35 = vunpack.i.l.bf16 %v9213_v28  ;;  %v9220_v43 = vunpack.i.h.bf16 %v9218_v47  ;;  %v8211_v29 = vpack.c.bf16 %v5757_v7, %v5756_v15  ;;  %v7206_v28 = vld [vmem:[%s12406_s5 + $0x3] sm:$0x1] }
 0x57b   :  { %7802 = vmatmul.mubr.msk.f32.vlgmr.msra.gmra.mrb[18].mxu0 %vm5252_vm11, %v5177_v27  ;;  %v5569_v27 = vsel %vm608_vm4, %v9194_v39, %v9199_v6  ;;  %v9219_v39 = vunpack.i.l.bf16 %v9218_v47 }
 0x57c   :  { %8200 = vmatpush1.bf16.msra.mxu0 %v8199_v59  ;;  %5646 = vmatprep.mubr.f32.mxu0 %v12438_v38  ;;  %v8209_v41 = vpack.c.bf16 %v5570_v60, %v5569_v27  ;;  %v5760_v62 = vsel %vm902_vm5, %v9214_v35, %v9204_v3  ;;  %v5761_v8 = vsel %vm902_vm5, %v9215_v12, %v9205_v51 }
 0x57d   :  { %8202 = vmatprep.subr.bf16.mxu0 %v8201_v63  ;;  %v9223_v45 = vpop.permute.xlu1 %9222  ;;  %v9228_v19 = vpop.permute.xlu0 %9227  ;;  %v8213_v2 = vpack.c.bf16 %v5761_v8, %v5760_v62  ;;  %v5752_v59 = vsel %vm902_vm5, %v9209_v40, %v9214_v35  ;;  %v5753_v37 = vsel %vm902_vm5, %v9210_v5, %v9215_v12 }
 0x57e   :  { %v9225_v21 = vunpack.i.h.bf16 %v9223_v45  ;;  %v9224_v18 = vunpack.i.l.bf16 %v9223_v45  ;;  %v9230_v61 = vunpack.i.h.bf16 %v9228_v19  ;;  %v9229_v33 = vunpack.i.l.bf16 %v9228_v19 }
 0x57f   :  { %v8220_v63 = vpack.c.bf16 %v5753_v37, %v5752_v59 }
 0x580   :  { %8204 = vmatpush1.bf16.msra.mxu0 %v8203_v57  ;;  %v5758_v46 = vsel %vm902_vm5, %v9219_v39, %v9224_v18  ;;  %v5759_v34 = vsel %vm902_vm5, %v9220_v43, %v9225_v21  ;;  %v5762_v6 = vsel %vm902_vm5, %v9229_v33, %v9219_v39  ;;  %v5763_v55 = vsel %vm902_vm5, %v9230_v61, %v9220_v43 }
 0x581   :  { %8205 = vmatprep.subr.bf16.mxu0 %v9363_v20  ;;  %v8215_v22 = vpack.c.bf16 %v5759_v34, %v5758_v46  ;;  %v8217_v36 = vpack.c.bf16 %v5763_v55, %v5762_v6  ;;  %v9233_v4 = vpop.permute.xlu1 %9232  ;;  %v9238_v30 = vpop.permute.xlu0 %9237  ;;  %v5755_v0 = vsel %vm902_vm5, %v9225_v21, %v9230_v61  ;;  %v5754_v57 = vsel %vm902_vm5, %v9224_v18, %v9229_v33  ;;  %v7212_v33 = vld [vmem:[%s12406_s5 + $0x5] sm:$0x1] }
 0x582   :  { %v8223_v51 = vpack.c.bf16 %v5755_v0, %v5754_v57  ;;  %v9234_v45 = vunpack.i.l.bf16 %v9233_v4  ;;  %v9239_v60 = vunpack.i.l.bf16 %v9238_v30 }
 0x583   :  { %7204 = vmatmul.mubr.msk.f32.vlgmr.msra.gmra.mrb[16].mxu0 %vm5252_vm11, %v7203_v31 }
 0x584   :  { %8207 = vmatpush3.bf16.msra.mxu0 %v8206_v24  ;;  %7812 = vmatprep.mubr.msk.f32.mxu0 %vm9364_vm12, %v12438_v38  ;;  %v9240_v24 = vunpack.i.h.bf16 %v9238_v30 }
 0x585   :  { %8208 = vmatprep.subr.bf16.mxu0 %v9363_v20  ;;  %v9243_v47 = vpop.permute.xlu1 %9242  ;;  %v9248_v3 = vpop.permute.xlu0 %9247 }
 0x586   :  { %v9245_v14 = vunpack.i.h.bf16 %v9243_v47  ;;  %v9244_v56 = vunpack.i.l.bf16 %v9243_v47  ;;  %v9250_v49 = vunpack.i.h.bf16 %v9248_v3 }
 0x588   :  { %8210 = vmatpush3.bf16.msra.mxu0 %v8209_v41  ;;  %v6090_v27 = vsel %vm1477_vm6, %v9244_v56, %v9234_v45  ;;  %v6094_v52 = vsel %vm1477_vm6, %v9239_v60, %v9244_v56 }
 0x589   :  { %8212 = vmatprep.subr.bf16.mxu0 %v8211_v29  ;;  %v9253_v5 = vpop.permute.xlu1 %9252  ;;  %v9258_v40 = vpop.permute.xlu0 %9257 }
 0x58a   :  { %v9255_v54 = vunpack.i.h.bf16 %v9253_v5  ;;  %v9254_v9 = vunpack.i.l.bf16 %v9253_v5  ;;  %v9260_v35 = vunpack.i.h.bf16 %v9258_v40  ;;  %v9259_v15 = vunpack.i.l.bf16 %v9258_v40 }
 0x58b   :  { %7813 = vmatmul.mubr.msk.f32.vlgmr.msra.gmra.mrb[18].mxu0 %vm5252_vm11, %v7203_v31  ;;  %v9235_v31 = vunpack.i.h.bf16 %v9233_v4 }
 0x58c   :  { %8214 = vmatpush1.bf16.msra.mxu0 %v8213_v2  ;;  %5831 = vmatprep.mubr.f32.mxu0 %v12438_v38  ;;  %v6089_v50 = vsel %vm1477_vm6, %v9250_v49, %v9255_v54  ;;  %v6093_v19 = vsel %vm1477_vm6, %v9260_v35, %v9250_v49  ;;  %v6097_v34 = vsel %vm1477_vm6, %v9255_v54, %v9260_v35 }
 0x58d   :  { %8216 = vmatprep.subr.bf16.mxu0 %v8215_v22  ;;  %v12207_v32 = vpop.permute.xlu1 %9262  ;;  %v12215_v23 = vpop.permute.xlu0 %9267  ;;  %v6091_v12 = vsel %vm1477_vm6, %v9245_v14, %v9235_v31  ;;  %v6096_v2 = vsel %vm1477_vm6, %v9254_v9, %v9259_v15 }
 0x58e   :  { %v9265_v39 = vunpack.i.h.bf16 %v12207_v32  ;;  %v9264_v29 = vunpack.i.l.bf16 %v12207_v32  ;;  %v9270_v62 = vunpack.i.h.bf16 %v12215_v23  ;;  %v9269_v8 = vunpack.i.l.bf16 %v12215_v23 }
 0x590   :  { %8218 = vmatpush1.bf16.msra.mxu0 %v8217_v36  ;;  %v6271_v36 = vsel %vm1771_vm7, %v9264_v29, %v9269_v8  ;;  %v6272_v59 = vsel %vm1771_vm7, %v9265_v39, %v9270_v62 }
 0x591   :  { %8219 = vmatprep.subr.bf16.mxu0 %v9363_v20  ;;  %v12227_v7 = vpop.permute.xlu1 %9272  ;;  %v9278_v21 = vpop.permute.xlu0 %9277  ;;  %v8253_v57 = vpack.c.bf16 %v6272_v59, %v6271_v36 }
 0x592   :  { %v9275_v6 = vunpack.i.h.bf16 %v12227_v7  ;;  %v9274_v55 = vunpack.i.l.bf16 %v12227_v7  ;;  %v9279_v30 = vunpack.i.l.bf16 %v9278_v21 }
 0x593   :  { %7207 = vmatmul.mubr.msk.f32.vlgmr.msra.gmra.mrb[16].mxu0 %vm5252_vm11, %v7206_v28 }
 0x594   :  { %8221 = vmatpush3.bf16.msra.mxu0 %v8220_v63  ;;  %7823 = vmatprep.mubr.msk.f32.mxu0 %vm9364_vm12, %v12438_v38  ;;  %v9280_v63 = vunpack.i.h.bf16 %v9278_v21  ;;  %v6275_v47 = vsel %vm1771_vm7, %v9274_v55, %v9264_v29  ;;  %v6279_v56 = vsel %vm1771_vm7, %v9269_v8, %v9274_v55 }
 0x595   :  { %8222 = vmatprep.subr.bf16.mxu0 %v9363_v20  ;;  %v12242_v48 = vpop.permute.xlu1 %9282  ;;  %v9288_v61 = vpop.permute.xlu0 %9287 }
 0x596   :  { %v9285_v37 = vunpack.i.h.bf16 %v12242_v48  ;;  %v9284_v4 = vunpack.i.l.bf16 %v12242_v48  ;;  %v9289_v5 = vunpack.i.l.bf16 %v9288_v61 }
 0x598   :  { %8224 = vmatpush3.bf16.msra.mxu0 %v8223_v51  ;;  %v6276_v51 = vsel %vm1771_vm7, %v9275_v6, %v9265_v39  ;;  %v6273_v40 = vsel %vm1771_vm7, %v9279_v30, %v9284_v4  ;;  %v6281_v35 = vsel %vm1771_vm7, %v9284_v4, %v9289_v5 }
 0x599   :  { %8226 = vmatprep.subr.bf16.mxu0 %v8225_v44  ;;  %v6086_v44 = vsel %vm1477_vm6, %v9234_v45, %v9239_v60  ;;  %v12262_v22 = vpop.permute.xlu1 %9292  ;;  %v12274_v0 = vpop.permute.xlu0 %9297  ;;  %v6277_v60 = vsel %vm1771_vm7, %v9289_v5, %v9279_v30 }
 0x59a   :  { %v9295_v54 = vunpack.i.h.bf16 %v12262_v22  ;;  %v9300_v23 = vunpack.i.h.bf16 %v12274_v0  ;;  %v9299_v49 = vunpack.i.l.bf16 %v12274_v0  ;;  %v7218_v0 = vld [vmem:[%s12406_s5 + $0x7] sm:$0x1] }
 0x59b   :  { %7824 = vmatmul.mubr.msk.f32.vlgmr.msra.gmra.mrb[18].mxu0 %vm5252_vm11, %v7206_v28  ;;  %v8251_v28 = vpack.c.bf16 %v6097_v34, %v6096_v2 }
 0x59c   :  { %8228 = vmatpush1.bf16.msra.mxu0 %v8227_v11  ;;  %5980 = vmatprep.mubr.f32.mxu0 %v12438_v38  ;;  %v6087_v11 = vsel %vm1477_vm6, %v9235_v31, %v9240_v24  ;;  %v6274_v31 = vsel %vm1771_vm7, %v9280_v63, %v9285_v37 }
 0x59d   :  { %8230 = vmatprep.subr.bf16.mxu0 %v8229_v17  ;;  %v9249_v17 = vunpack.i.l.bf16 %v9248_v3  ;;  %v9290_v3 = vunpack.i.h.bf16 %v9288_v61  ;;  %v9303_v45 = vpop.permute.xlu1 %9302  ;;  %v8257_v32 = vpack.c.bf16 %v6274_v31, %v6273_v40 }
 0x59e   :  { %v9305_v7 = vunpack.i.h.bf16 %v9303_v45 }
 0x59f   :  { %v6088_v58 = vsel %vm1477_vm6, %v9249_v17, %v9254_v9  ;;  %v6092_v18 = vsel %vm1477_vm6, %v9259_v15, %v9249_v17  ;;  %v9294_v9 = vunpack.i.l.bf16 %v12262_v22 }
 0x5a0   :  { %8232 = vmatpush1.bf16.msra.mxu0 %v8231_v16  ;;  %v8239_v16 = vpack.c.bf16 %v6087_v11, %v6086_v44  ;;  %v8243_v41 = vpack.c.bf16 %v6089_v50, %v6088_v58  ;;  %v8245_v43 = vpack.c.bf16 %v6093_v19, %v6092_v18  ;;  %v6280_v44 = vsel %vm1771_vm7, %v9270_v62, %v9275_v6 }
 0x5a1   :  { %8233 = vmatprep.subr.bf16.mxu0 %v9363_v20  ;;  %v9313_v17 = vpop.permute.xlu1 %9312  ;;  %v9304_v58 = vunpack.i.l.bf16 %v9303_v45  ;;  %v6456_v50 = vsel %vm2065_vm8, %v9294_v9, %v9299_v49  ;;  %v6461_v39 = vsel %vm2065_vm8, %v9305_v7, %v9295_v54  ;;  %v6465_v36 = vsel %vm2065_vm8, %v9300_v23, %v9305_v7 }
 0x5a2   :  { %v9315_v21 = vunpack.i.h.bf16 %v9313_v17  ;;  %v9314_v18 = vunpack.i.l.bf16 %v9313_v17 }
 0x5a3   :  { %7210 = vmatmul.mubr.msk.f32.vlgmr.msra.gmra.mrb[16].mxu0 %vm5252_vm11, %v7209_v42  ;;  %v6464_v22 = vsel %vm2065_vm8, %v9299_v49, %v9304_v58 }
 0x5a4   :  { %8235 = vmatpush3.bf16.msra.mxu0 %v8234_v1  ;;  %7834 = vmatprep.mubr.msk.f32.mxu0 %vm9364_vm12, %v12438_v38  ;;  %v8241_v1 = vpack.c.bf16 %v6091_v12, %v6090_v27  ;;  %v8262_v27 = vpack.c.bf16 %v6280_v44, %v6279_v56  ;;  %v6282_v12 = vsel %vm1771_vm7, %v9285_v37, %v9290_v3 }
 0x5a5   :  { %8236 = vmatprep.subr.bf16.mxu0 %v9363_v20  ;;  %v9323_v19 = vpop.permute.xlu1 %9322 }
 0x5a6   :  { %v9325_v4 = vunpack.i.h.bf16 %v9323_v19 }
 0x5a8   :  { %8238 = vmatpush3.bf16.msra.mxu0 %v8237_v10  ;;  %v6095_v10 = vsel %vm1477_vm6, %v9240_v24, %v9245_v14  ;;  %v8255_v24 = vpack.c.bf16 %v6276_v51, %v6275_v47  ;;  %v9308_v14 = vpop.permute.xlu0 %9307  ;;  %v8276_v47 = vpack.c.bf16 %v6465_v36, %v6464_v22 }
 0x5a9   :  { %8240 = vmatprep.subr.bf16.mxu0 %v8239_v16  ;;  %v8248_v46 = vpack.c.bf16 %v6095_v10, %v6094_v52  ;;  %v7215_v16 = vld [vmem:[%s12406_s5 + $0x6] sm:$0x1]  ;;  %v9310_v48 = vunpack.i.h.bf16 %v9308_v14  ;;  %v9309_v52 = vunpack.i.l.bf16 %v9308_v14  ;;  %v9333_v6 = vpop.permute.xlu1 %9332 }
 0x5aa   :  { %v9335_v5 = vunpack.i.h.bf16 %v9333_v6  ;;  %v9334_v40 = vunpack.i.l.bf16 %v9333_v6 }
 0x5ab   :  { %7835 = vmatmul.mubr.msk.f32.vlgmr.msra.gmra.mrb[18].mxu0 %vm5252_vm11, %v7209_v42  ;;  %v6278_v42 = vsel %vm1771_vm7, %v9290_v3, %v9280_v63  ;;  %v6458_v61 = vsel %vm2065_vm8, %v9309_v52, %v9314_v18 }
 0x5ac   :  { %8242 = vmatpush1.bf16.msra.mxu0 %v8241_v1  ;;  %6165 = vmatprep.mubr.f32.mxu0 %v12438_v38  ;;  %v8259_v11 = vpack.c.bf16 %v6278_v42, %v6277_v60  ;;  %v9318_v15 = vpop.permute.xlu0 %9317  ;;  %v6457_v1 = vsel %vm2065_vm8, %v9295_v54, %v9300_v23  ;;  %v6646_v54 = vsel %vm2359_vm9, %v9335_v5, %v9325_v4 }
 0x5ad   :  { %8244 = vmatprep.subr.bf16.mxu0 %v8243_v41  ;;  %v8265_v41 = vpack.c.bf16 %v6282_v12, %v6281_v35  ;;  %v8267_v10 = vpack.c.bf16 %v6457_v1, %v6456_v50  ;;  %v9320_v29 = vunpack.i.h.bf16 %v9318_v15  ;;  %v9319_v62 = vunpack.i.l.bf16 %v9318_v15  ;;  %v7221_v50 = vld [vmem:[%s12406_s5 + $0x8] sm:$0x1] }
 0x5af   :  { %v6462_v34 = vsel %vm2065_vm8, %v9319_v62, %v9309_v52  ;;  %v6463_v2 = vsel %vm2065_vm8, %v9320_v29, %v9310_v48  ;;  %v6467_v51 = vsel %vm2065_vm8, %v9315_v21, %v9320_v29  ;;  %v6466_v3 = vsel %vm2065_vm8, %v9314_v18, %v9319_v62 }
 0x5b0   :  { %8246 = vmatpush1.bf16.msra.mxu0 %v8245_v43  ;;  %v6460_v43 = vsel %vm2065_vm8, %v9304_v58, %v9294_v9  ;;  %v12318_v8 = vpop.permute.xlu0 %9327  ;;  %v8273_v59 = vpack.c.bf16 %v6463_v2, %v6462_v34  ;;  %v9365_v62 = vmov 1966171168  }
 0x5b1   :  { %8247 = vmatprep.subr.bf16.mxu0 %v9363_v20  ;;  %v9330_v63 = vunpack.i.h.bf16 %v12318_v8  ;;  %v9329_v30 = vunpack.i.l.bf16 %v12318_v8 }
 0x5b3   :  { %7213 = vmatmul.mubr.msk.f32.vlgmr.msra.gmra.mrb[16].mxu0 %vm5252_vm11, %v7212_v33  ;;  %v6642_v45 = vsel %vm2359_vm9, %v9325_v4, %v9330_v63  ;;  %v6649_v7 = vsel %vm2359_vm9, %v9329_v30, %v9334_v40  ;;  %v6650_v58 = vsel %vm2359_vm9, %v9330_v63, %v9335_v5  ;;  %v12470_v63 = vlaneseq }
 0x5b4   :  { %8249 = vmatpush3.bf16.msra.mxu0 %v8248_v46  ;;  %7845 = vmatprep.mubr.msk.f32.mxu0 %vm9364_vm12, %v12438_v38  ;;  %v8269_v46 = vpack.c.bf16 %v6461_v39, %v6460_v43  ;;  %v9338_v37 = vpop.permute.xlu0 %9337  ;;  %v8290_v1 = vpack.c.bf16 %v6650_v58, %v6649_v7 }
 0x5b5   :  { %8250 = vmatprep.subr.bf16.mxu0 %v9363_v20  ;;  %v9340_v14 = vunpack.i.h.bf16 %v9338_v37  ;;  %v9339_v56 = vunpack.i.l.bf16 %v9338_v37  ;;  %vm6851_vm13 = vcmp.lt.s32.totalorder %v12470_v63, 384 }
 0x5b8   :  { %8252 = vmatpush3.bf16.msra.mxu0 %v8251_v28  ;;  %v9324_v28 = vunpack.i.l.bf16 %v9323_v19  ;;  %v9348_v42 = vpop.permute.xlu0 %9347 }
 0x5b9   :  { %8254 = vmatprep.subr.bf16.mxu0 %v8253_v57  ;;  %v9343_v57 = vpop.permute.xlu1 %9342  ;;  %v9350_v9 = vunpack.i.h.bf16 %v9348_v42  ;;  %v9349_v23 = vunpack.i.l.bf16 %v9348_v42 }
 0x5ba   :  { %v6641_v31 = vsel %vm2359_vm9, %v9324_v28, %v9329_v30  ;;  %v9344_v60 = vunpack.i.l.bf16 %v9343_v57 }
 0x5bb   :  { %7846 = vmatmul.mubr.msk.f32.vlgmr.msra.gmra.mrb[18].mxu0 %vm5252_vm11, %v7212_v33  ;;  %v6459_v33 = vsel %vm2065_vm8, %v9310_v48, %v9315_v21  ;;  %v8281_v44 = vpack.c.bf16 %v6642_v45, %v6641_v31  ;;  %v6648_v12 = vsel %vm2359_vm9, %v9350_v9, %v9340_v14  ;;  %v12466_v48 = vld [vmem:[#allocation2_spill] sm:$0xff] }
 0x5bc   :  { %8256 = vmatpush1.bf16.msra.mxu0 %v8255_v24  ;;  %6350 = vmatprep.mubr.f32.mxu0 %v12438_v38  ;;  %v8271_v55 = vpack.c.bf16 %v6459_v33, %v6458_v61  ;;  %v9345_v24 = vunpack.i.h.bf16 %v9343_v57  ;;  %v6643_v49 = vsel %vm2359_vm9, %v9339_v56, %v9344_v60  ;;  %v6651_v18 = vsel %vm2359_vm9, %v9344_v60, %v9349_v23 }
 0x5bd   :  { %8258 = vmatprep.subr.bf16.mxu0 %v8257_v32  ;;  %v8279_v32 = vpack.c.bf16 %v6467_v51, %v6466_v3  ;;  %v12467_v52 = vsub.s32 0, %v12466_v48  ;;  %v12468_v43 = vsub.s32 1, %v12466_v48  ;;  %v12469_v2 = vsub.s32 2, %v12466_v48 }
 0x5be   :  { %v6644_v17 = vsel %vm2359_vm9, %v9340_v14, %v9345_v24  ;;  %v6652_v21 = vsel %vm2359_vm9, %v9345_v24, %v9350_v9 }
 0x5bf   :  { %v8285_v35 = vpack.c.bf16 %v6644_v17, %v6643_v49  ;;  %v8293_v19 = vpack.c.bf16 %v6652_v21, %v6651_v18 }
 0x5c0   :  { %8260 = vmatpush1.bf16.msra.mxu0 %v8259_v11  ;;  %v6645_v11 = vsel %vm2359_vm9, %v9334_v40, %v9324_v28 }
 0x5c1   :  { %8261 = vmatprep.subr.bf16.mxu0 %v9363_v20 }
 0x5c3   :  { %7216 = vmatmul.mubr.msk.f32.vlgmr.msra.gmra.mrb[16].mxu0 %vm5252_vm11, %v7215_v16 }
 0x5c4   :  { %8263 = vmatpush3.bf16.msra.mxu0 %v8262_v27  ;;  %7856 = vmatprep.mubr.msk.f32.mxu0 %vm9364_vm12, %v12438_v38  ;;  %v6647_v27 = vsel %vm2359_vm9, %v9349_v23, %v9339_v56 }
 0x5c5   :  { %8264 = vmatprep.subr.bf16.mxu0 %v9363_v20  ;;  %v8287_v15 = vpack.c.bf16 %v6648_v12, %v6647_v27 }
 0x5c8   :  { %8266 = vmatpush3.bf16.msra.mxu0 %v8265_v41  ;;  %v6858_v41 = vld [vmem:[%s12403_s6 + $0x1] ss:$2 sm:$0x7] }
 0x5c9   :  { %8268 = vmatprep.subr.bf16.mxu0 %v8267_v10  ;;  %v6807_v13 = vrot.slane %v6858_v41, %v12467_v52  ;;  %v6811_v39 = vrot.slane %v6858_v41, %v12468_v43  ;;  %v6815_v6 = vrot.slane %v6858_v41, %v12469_v2 }
 0x5cb   :  { %7857 = vmatmul.mubr.msk.f32.vlgmr.msra.gmra.mrb[18].mxu0 %vm5252_vm11, %v7215_v16  ;;  %v8283_v16 = vpack.c.bf16 %v6646_v54, %v6645_v11 }
 0x5cc   :  { %8270 = vmatpush1.bf16.msra.mxu0 %v8269_v46  ;;  %6535 = vmatprep.mubr.f32.mxu0 %v12438_v38 }
 0x5cd   :  { %8272 = vmatprep.subr.bf16.mxu0 %v8271_v55 }
 0x5d0   :  { %8274 = vmatpush1.bf16.msra.mxu0 %v8273_v59 }
 0x5d1   :  { %8275 = vmatprep.subr.bf16.mxu0 %v9363_v20 }
 0x5d3   :  { %7219 = vmatmul.mubr.msk.f32.vlgmr.msra.gmra.mrb[16].mxu0 %vm5252_vm11, %v7218_v0 }
 0x5d4   :  { %8277 = vmatpush3.bf16.msra.mxu0 %v8276_v47  ;;  %7867 = vmatprep.mubr.msk.f32.mxu0 %vm9364_vm12, %v12438_v38 }
 0x5d5   :  { %8278 = vmatprep.subr.bf16.mxu0 %v9363_v20 }
 0x5d8   :  { %8280 = vmatpush3.bf16.msra.mxu0 %v8279_v32 }
 0x5d9   :  { %8282 = vmatprep.subr.bf16.mxu0 %v8281_v44 }
 0x5db   :  { %7868 = vmatmul.mubr.msk.f32.vlgmr.msra.gmra.mrb[18].mxu0 %vm5252_vm11, %v7218_v0 }
 0x5dc   :  { %8284 = vmatpush1.bf16.msra.mxu0 %v8283_v16  ;;  %6720 = vmatprep.mubr.f32.mxu0 %v12438_v38 }
 0x5dd   :  { %8286 = vmatprep.subr.bf16.mxu0 %v8285_v35 }
 0x5e0   :  { %8288 = vmatpush1.bf16.msra.mxu0 %v8287_v15 }
 0x5e1   :  { %8289 = vmatprep.subr.bf16.mxu0 %v9363_v20 }
 0x5e3   :  { %7222 = vmatmul.mubr.msk.f32.vlgmr.msra.gmra.mrb[16].mxu0 %vm5252_vm11, %v7221_v50 }
 0x5e4   :  { %8291 = vmatpush3.bf16.msra.mxu0 %v8290_v1  ;;  %7878 = vmatprep.mubr.msk.f32.mxu0 %vm9364_vm12, %v12438_v38 }
 0x5e5   :  { %8292 = vmatprep.subr.bf16.mxu0 %v9363_v20  ;;  %v6827_v20 = vunpack.c.l.s4 %v9365_v62 }
 0x5e7   :  { %v6828_v46 = vunpack.c.0.s8 %v6827_v20 }
 0x5e8   :  { %8294 = vmatpush3.bf16.msra.mxu0 %v8293_v19 }
 0x5e9   :  { %v6831_v22 = vsub.s32 %v6828_v46, %v12466_v48 }
 0x5eb   :  { %7879 = vmatmul.mubr.msk.f32.vlgmr.msra.gmra.mrb[18].mxu0 %vm5252_vm11, %v7221_v50 }
 0x6b6   :  { %v6722_v10 = vpop.f32.mrb[16].mxu0 }
 0x6b7   :  { %v6800_v29 = vmul.f32 %v6722_v10, %v12463_v26  ;;  %v6724_v38 = vpop.f32.mrb[17].mxu0 }
 0x6b8   :  { %v6801_v8 = vmul.f32 %v6724_v38, %v12464_v53 }
 0x6b9   :  { %v6819_v61 = vadd.f32 %v6807_v13, %v6800_v29 }
 0x6ba   :  { %v6820_v33 = vadd.f32 %v6811_v39, %v6801_v8 }
 0x6bc   :  { %v6825_v34 = vcombine.low %v6819_v61, %v6820_v33 }
 0x6be   :  { %v6793_v55 = vpop.f32.mrb[18].mxu0  ;;  %v6832_v26 = vrot.slane %v6825_v34, %v6831_v22 }
 0x6bf   :  { %v6802_v36 = vmul.f32 %v6793_v55, %v12465_v25  ;;  %v7880_v59 = vpop.f32.mrb[19].mxu0 }
 0x6c1   :  { %v6821_v37 = vadd.f32 %v6815_v6, %v6802_v36 }
 0x6c3   :  { %v6839_v4 = vrot.slane %v6821_v37, %v6831_v22 }
 0x6c5   :  { %v6840_v28 = vcombine.low %v6832_v26, %v6839_v4 }
 0x6c7   :  { %v6847_v53 = vrot.slane %v6840_v28, %v6831_v22 }
 0x6c9   :  { %6853 = vst.msk [vmem:[%s12407_s7] sm:$0x7] %vm6851_vm13, %v6847_v53 }

</bundles_post_ra>
